<compile_context>
chip_gen: v5e
topology: v5e:2x2
jax: 0.10.0
libtpu: 0.0.40
codegen_flags: <defaults>
</compile_context>

<pallas_src>
import functools

import jax
import jax.numpy as jnp
from jax.experimental import pallas as pl
from jax.experimental.pallas import tpu as pltpu

LANE = 128  # TPU lane width; pad the (batch*spatial) axis to a multiple of this.


def _round_up(x, m):
    return (x + m - 1) // m * m


# ---------------------------------------------------------------------------
# Pallas kernels
# ---------------------------------------------------------------------------
def _convt_bn_relu_kernel(w_ref, p_ref, mt_ref, gb_ref, o_ref, *, cout,
                          inv_count, eps):
    """Fused ConvTranspose2d(4x4, stride 2) + BatchNorm(batch stats) + ReLU.

    Sub-pixel form, phase-major rows (ph_h, ph_w, cout):
      w_ref  : (C4, K)   bf16  sub-pixel weights, C4 = 4*Cout, K = 4*Cin
      p_ref  : (K, Mt)   bf16  patches, Mt = N*Hc*Wc padded to 128 lanes
      mt_ref : (Mt, 4)   f32   per-phase validity of each coarse column
                               (crop + lane padding); column q = 2*ph_h + ph_w
      gb_ref : (C4, 2)   f32   col 0 = gamma, col 1 = beta (tiled over phases)
      o_ref  : (C4, Mt)  bf16  normalized + ReLU'd coarse output
    Conv bias is dropped: BN with batch statistics cancels it exactly.
    """
    c4 = o_ref.shape[0]
    acc = jnp.dot(w_ref[...], p_ref[...],
                  preferred_element_type=jnp.float32)                  # (C4, Mt)

    # --- BN statistics, sum-then-pool ------------------------------------
    # Masked row sums via a skinny matmul: s*_all[r, q] = sum_col acc[r,c]*mask[c,q].
    mask = mt_ref[...]                                                  # (Mt, 4)
    s1_all = jnp.dot(acc, mask, preferred_element_type=jnp.float32)    # (C4, 4)
    s2_all = jnp.dot(acc * acc, mask,
                     preferred_element_type=jnp.float32)               # (C4, 4)

    # Select each row's own phase column: phase(row) = row // Cout (no vector div).
    row4 = jax.lax.broadcasted_iota(jnp.int32, (c4, 4), 0)
    col4 = jax.lax.broadcasted_iota(jnp.int32, (c4, 4), 1)
    own = (row4 >= col4 * cout) & (row4 < (col4 + 1) * cout)
    s1 = jnp.sum(jnp.where(own, s1_all, 0.0), axis=1, keepdims=True)   # (C4, 1)
    s2 = jnp.sum(jnp.where(own, s2_all, 0.0), axis=1, keepdims=True)   # (C4, 1)

    # Pool the 4 sub-pixel phases of each channel: rows share a channel iff
    # row mod Cout matches; Cout is a power of two -> bitwise AND, no division.
    r = jax.lax.broadcasted_iota(jnp.int32, (c4, c4), 0)
    rp = jax.lax.broadcasted_iota(jnp.int32, (c4, c4), 1)
    pool = jnp.where((r & (cout - 1)) == (rp & (cout - 1)),
                     inv_count, 0.0)                                    # (C4, C4)
    mean = jnp.dot(pool, s1, preferred_element_type=jnp.float32)       # (C4, 1)
    ex2 = jnp.dot(pool, s2, preferred_element_type=jnp.float32)        # (C4, 1)
    var = jnp.maximum(ex2 - mean * mean, 0.0)                          # biased

    gb = gb_ref[...]                                                   # (C4, 2)
    gamma = gb[:, 0:1]
    beta = gb[:, 1:2]
    scale = gamma * jax.lax.rsqrt(var + eps)
    shift = beta - mean * scale
    o_ref[...] = jnp.maximum(acc * scale + shift, 0.0).astype(o_ref.dtype)


def _convt_tanh_kernel(w_ref, p_ref, b_ref, o_ref):
    """Final ConvTranspose2d(4x4, stride 2) + bias + tanh (no BN)."""
    acc = jnp.dot(w_ref[...], p_ref[...],
                  preferred_element_type=jnp.float32) + b_ref[...]
    o_ref[...] = jnp.tanh(acc).astype(o_ref.dtype)


# ---------------------------------------------------------------------------
# Sub-pixel ConvTranspose glue (pure layout work, left to XLA / constant-folded)
# ---------------------------------------------------------------------------
def _subpixel_weight(w_t):
    """(Cin, Cout, 4, 4) ConvTranspose2d weight -> (4*Cout, 4*Cin) LHS.

    Row index = (ph_h, ph_w, cout), column index = (a, b, cin) with
      w_lhs[row, col] = w_t[cin, cout, 2 - 2a + ph_h, 2 - 2b + ph_w].
    """
    cin, cout = w_t.shape[0], w_t.shape[1]
    w = w_t.reshape(cin, cout, 2, 2, 2, 2)   # (ci, co, kh_hi, ph_h, kw_hi, ph_w)
    w = jnp.flip(w, axis=(2, 4))             # kh_hi -> a, kw_hi -> b
    return jnp.transpose(w, (3, 5, 1, 2, 4, 0)).reshape(4 * cout, 4 * cin)


def _subpixel_patches(x_nhwc):
    """NHWC activations -> (4*Cin, N*Hc*Wc) patch matrix, rows ordered (a,b,ci)."""
    n, h, w, c = x_nhwc.shape
    hc, wc = h + 1, w + 1
    xp = jnp.pad(x_nhwc, ((0, 0), (1, 1), (1, 1), (0, 0)))
    pats = jnp.stack([xp[:, a:a + hc, b:b + wc, :]
                      for a in range(2) for b in range(2)], axis=0)
    pats = jnp.transpose(pats, (0, 4, 1, 2, 3))          # (4, C, N, Hc, Wc)
    return pats.reshape(4 * c, n * hc * wc), hc, wc


def _depth_to_space(y_c4m, n, hc, wc, cout, oh, ow, padding):
    """(4*Cout, N*Hc*Wc) coarse kernel output -> (N, OH, OW, Cout)."""
    y = y_c4m.reshape(2, 2, cout, n, hc, wc)             # (ph_h, ph_w, co, n, t, u)
    y = jnp.transpose(y, (3, 4, 0, 5, 1, 2)).reshape(n, 2 * hc, 2 * wc, cout)
    return y[:, padding:padding + oh, padding:padding + ow, :]


def _phase_mask(n, hc, wc, oh, ow, padding, mt):
    """(Mt, 4) f32: column q = 2*ph_h + ph_w is 1.0 where that phase's output
    pixel survives the crop (lane-padding columns are 0).  Shape-only, so XLA
    constant-folds it at compile time."""
    ph = jnp.arange(2)
    oh_idx = 2 * jnp.arange(hc)[None, :] + ph[:, None] - padding        # (2, Hc)
    ow_idx = 2 * jnp.arange(wc)[None, :] + ph[:, None] - padding        # (2, Wc)
    vh = (oh_idx >= 0) & (oh_idx < oh)
    vw = (ow_idx >= 0) & (ow_idx < ow)
    v = vh[:, None, :, None] & vw[None, :, None, :]                     # (2,2,Hc,Wc)
    v = jnp.broadcast_to(v[:, :, None, :, :], (2, 2, n, hc, wc))
    v = v.reshape(4, n * hc * wc).astype(jnp.float32)
    v = jnp.pad(v, ((0, 0), (0, mt - n * hc * wc)))
    return v.T                                                          # (Mt, 4)


def _layer_operands(x_nhwc, w_t):
    """Shared per-layer preprocessing for the sub-pixel conv kernels."""
    n, h, w_sp, cin = x_nhwc.shape
    cout = w_t.shape[1]
    c4, k = 4 * cout, 4 * cin
    patches, hc, wc = _subpixel_patches(x_nhwc)
    m = n * hc * wc
    mt = _round_up(m, LANE)
    patches = jnp.pad(patches, ((0, 0), (0, mt - m))).astype(jnp.bfloat16)
    w_lhs = _subpixel_weight(w_t).astype(jnp.bfloat16)
    return patches, w_lhs, n, hc, wc, cout, c4, k, m, mt


# ---------------------------------------------------------------------------
# Layer wrappers
# ---------------------------------------------------------------------------
def convt_bn_relu_layer(x_nhwc, w_t, gamma, beta, padding, eps=1e-5):
    """ConvTranspose2d(k=4,s=2,p=padding) + BatchNorm2d(train stats) + ReLU."""
    patches, w_lhs, n, hc, wc, cout, c4, k, m, mt = _layer_operands(x_nhwc, w_t)
    h, w_sp = x_nhwc.shape[1], x_nhwc.shape[2]
    oh = 2 * h + 2 - 2 * padding
    ow = 2 * w_sp + 2 - 2 * padding
    assert cout > 0 and cout & (cout - 1) == 0, "power-of-two Cout required"

    mask = _phase_mask(n, hc, wc, oh, ow, padding, mt)                  # (Mt, 4)
    gb = jnp.stack([jnp.tile(gamma, 4), jnp.tile(beta, 4)],
                   axis=1).astype(jnp.float32)                          # (C4, 2)

    y = pl.pallas_call(
        functools.partial(_convt_bn_relu_kernel, cout=cout,
                          inv_count=1.0 / float(n * oh * ow), eps=eps),
        out_shape=jax.ShapeDtypeStruct((c4, mt), jnp.bfloat16),
        grid=(1,),
        in_specs=[
            pl.BlockSpec((c4, k), lambda i: (0, 0)),
            pl.BlockSpec((k, mt), lambda i: (0, 0)),
            pl.BlockSpec((mt, 4), lambda i: (0, 0)),
            pl.BlockSpec((c4, 2), lambda i: (0, 0)),
        ],
        out_specs=pl.BlockSpec((c4, mt), lambda i: (0, 0)),
        compiler_params=pltpu.CompilerParams(
            dimension_semantics=("arbitrary",)),
    )(w_lhs, patches, mask, gb)

    return _depth_to_space(y[:, :m], n, hc, wc, cout, oh, ow, padding)


def convt_tanh_layer(x_nhwc, w_t, bias, padding):
    """Final ConvTranspose2d(k=4,s=2,p=padding) + Tanh."""
    patches, w_lhs, n, hc, wc, cout, c4, k, m, mt = _layer_operands(x_nhwc, w_t)
    h, w_sp = x_nhwc.shape[1], x_nhwc.shape[2]
    oh = 2 * h + 2 - 2 * padding
    ow = 2 * w_sp + 2 - 2 * padding
    bias4 = jnp.tile(bias, 4).reshape(c4, 1).astype(jnp.float32)

    y = pl.pallas_call(
        _convt_tanh_kernel,
        out_shape=jax.ShapeDtypeStruct((c4, mt), jnp.float32),
        grid=(1,),
        in_specs=[
            pl.BlockSpec((c4, k), lambda i: (0, 0)),
            pl.BlockSpec((k, mt), lambda i: (0, 0)),
            pl.BlockSpec((c4, 1), lambda i: (0, 0)),
        ],
        out_specs=pl.BlockSpec((c4, mt), lambda i: (0, 0)),
        compiler_params=pltpu.CompilerParams(
            dimension_semantics=("arbitrary",)),
    )(w_lhs, patches, bias4)

    return _depth_to_space(y[:, :m], n, hc, wc, cout, oh, ow, padding)


@jax.jit
def generator_forward(x_nchw, params):
    """Matches Generator.forward: 4x [ConvT(4,2,p)+BN+ReLU], ConvT(4,2,1), Tanh."""
    x = jnp.transpose(x_nchw, (0, 2, 3, 1)).astype(jnp.float32)   # NCHW -> NHWC
    for i, padding in enumerate((0, 1, 1, 1)):
        w, _b, g, bt = params[f"block{i}"]   # conv bias is exactly cancelled by BN
        x = convt_bn_relu_layer(x, w, g, bt, padding)
    w, b = params["final"]
    y = convt_tanh_layer(x, w, b, 1)
    return jnp.transpose(y, (0, 3, 1, 2))                         # NHWC -> NCHW


# ---------------------------------------------------------------------------
# Pure-JAX f32 reference (for correctness checking only; includes the biases)
# ---------------------------------------------------------------------------
def _ref_forward(x_nchw, params, eps=1e-5):
    def convt(x, w, b, padding):
        kk = w.shape[2]
        wk = jnp.transpose(jnp.flip(w, (2, 3)), (1, 0, 2, 3))     # (Cout,Cin,k,k)
        y = jax.lax.conv_general_dilated(
            x, wk, window_strides=(1, 1),
            padding=[(kk - 1 - padding, kk - 1 - padding)] * 2,
            lhs_dilation=(2, 2),
            dimension_numbers=("NCHW", "OIHW", "NCHW"),
            precision=jax.lax.Precision.HIGHEST)
        return y + b.reshape(1, -1, 1, 1)

    def bn_relu(y, g, bt):
        mean = jnp.mean(y, axis=(0, 2, 3), keepdims=True)
        var = jnp.var(y, axis=(0, 2, 3), keepdims=True)           # biased
        yn = (y - mean) * jax.lax.rsqrt(var + eps)
        return jnp.maximum(yn * g.reshape(1, -1, 1, 1)
                           + bt.reshape(1, -1, 1, 1), 0.0)

    x = x_nchw.astype(jnp.float32)
    for i, padding in enumerate((0, 1, 1, 1)):
        w, b, g, bt = params[f"block{i}"]
        x = bn_relu(convt(x, w, b, padding), g, bt)
    w, b = params["final"]
    return jnp.tanh(convt(x, w, b, 1))


# ---------------------------------------------------------------------------
# Deterministic parameter init (shapes follow Generator.__init__)
# ---------------------------------------------------------------------------
def init_params(key, input_channels, features, output_channels):
    chans = [input_channels, features // 2, features // 4,
             features // 8, features // 16, output_channels]
    keys = jax.random.split(key, 18)
    params = {}
    ki = 0
    for i in range(4):
        cin, cout = chans[i], chans[i + 1]
        w = 0.05 * jax.random.normal(keys[ki], (cin, cout, 4, 4), jnp.float32); ki += 1
        b = 0.05 * jax.random.normal(keys[ki], (cout,), jnp.float32); ki += 1
        gamma = 1.0 + 0.1 * jax.random.normal(keys[ki], (cout,), jnp.float32); ki += 1
        beta = 0.1 * jax.random.normal(keys[ki], (cout,), jnp.float32); ki += 1
        params[f"block{i}"] = (w, b, gamma, beta)
    cin, cout = chans[4], chans[5]
    w = 0.05 * jax.random.normal(keys[ki], (cin, cout, 4, 4), jnp.float32); ki += 1
    b = 0.05 * jax.random.normal(keys[ki], (cout,), jnp.float32)
    params["final"] = (w, b)
    return params


if __name__ == "__main__":
    key = jax.random.PRNGKey(0)
    kp, kx = jax.random.split(key)

    # Small DCGAN config: latent (N, nz, 1, 1) -> image (N, 3, 64, 64)
    input_channels, features, output_channels = 8, 32, 3
    params = init_params(kp, input_channels, features, output_channels)
    x = jax.random.normal(kx, (2, input_channels, 1, 1), jnp.float32)  # NCHW

    out = jax.block_until_ready(generator_forward(x, params))

    assert out.shape == (2, output_channels, 64, 64), out.shape
    assert bool(jnp.all(jnp.isfinite(out)))
    assert bool(jnp.all(jnp.abs(out) <= 1.0 + 1e-6))                   # tanh range

    ref = _ref_forward(x, params)
    err = float(jnp.max(jnp.abs(out - ref)))
    assert err < 0.1, f"max abs err vs f32 reference: {err}"           # bf16 operands/activations
    print("KERNEL_OK")
</pallas_src>

<mosaic_0001>
module attributes {stable_mosaic.version = 11 : i64} {
  func.func @_convt_bn_relu_kernel(%arg0: i32, %arg1: memref<64x32xbf16, #tpu.memory_space<vmem>>, %arg2: memref<32x128xbf16, #tpu.memory_space<vmem>>, %arg3: memref<128x4xf32, #tpu.memory_space<vmem>>, %arg4: memref<64x2xf32, #tpu.memory_space<vmem>>, %arg5: memref<64x128xbf16, #tpu.memory_space<vmem>>) attributes {dimension_semantics = [#tpu.dimension_semantics<arbitrary>], iteration_bounds = array<i64: 1>, scalar_prefetch = 0 : i64, scratch_operands = 0 : i64, tpu.core_type = #tpu.core_type<tc>, window_params = [{pipeline_mode = #tpu.pipeline_mode<synchronous>, transform_indices = @transform_0, window_bounds = array<i64: 64, 32>}, {pipeline_mode = #tpu.pipeline_mode<synchronous>, transform_indices = @transform_1, window_bounds = array<i64: 32, 128>}, {pipeline_mode = #tpu.pipeline_mode<synchronous>, transform_indices = @transform_2, window_bounds = array<i64: 128, 4>}, {pipeline_mode = #tpu.pipeline_mode<synchronous>, transform_indices = @transform_3, window_bounds = array<i64: 64, 2>}, {pipeline_mode = #tpu.pipeline_mode<synchronous>, transform_indices = @transform_4, window_bounds = array<i64: 64, 128>}]} {
    %c0 = arith.constant 0 : index
    %c0_0 = arith.constant 0 : index
    %0 = vector.load %arg1[%c0, %c0_0] : memref<64x32xbf16, #tpu.memory_space<vmem>>, vector<64x32xbf16>
    %c0_1 = arith.constant 0 : index
    %c0_2 = arith.constant 0 : index
    %1 = vector.load %arg2[%c0_1, %c0_2] : memref<32x128xbf16, #tpu.memory_space<vmem>>, vector<32x128xbf16>
    %cst = arith.constant dense<0.000000e+00> : vector<64x128xf32>
    %2 = tpu.matmul %0, %1, %cst {dimension_numbers = #tpu.dot_dimension_numbers<[1], [0], [0], [1], [0, 0, 1, 1], [], []>} : vector<64x32xbf16>, vector<32x128xbf16>, vector<64x128xf32> -> vector<64x128xf32>
    %c0_3 = arith.constant 0 : index
    %c0_4 = arith.constant 0 : index
    %3 = vector.load %arg3[%c0_3, %c0_4] : memref<128x4xf32, #tpu.memory_space<vmem>>, vector<128x4xf32>
    %cst_5 = arith.constant dense<0.000000e+00> : vector<64x4xf32>
    %4 = tpu.matmul %2, %3, %cst_5 {dimension_numbers = #tpu.dot_dimension_numbers<[1], [0], [0], [1], [0, 0, 1, 1], [], []>} : vector<64x128xf32>, vector<128x4xf32>, vector<64x4xf32> -> vector<64x4xf32>
    %5 = arith.mulf %2, %2 : vector<64x128xf32>
    %cst_6 = arith.constant dense<0.000000e+00> : vector<64x4xf32>
    %6 = tpu.matmul %5, %3, %cst_6 {dimension_numbers = #tpu.dot_dimension_numbers<[1], [0], [0], [1], [0, 0, 1, 1], [], []>} : vector<64x128xf32>, vector<128x4xf32>, vector<64x4xf32> -> vector<64x4xf32>
    %7 = tpu.iota {dimensions = array<i32: 0>} : vector<64x4xi32>
    %8 = tpu.iota {dimensions = array<i32: 1>} : vector<64x4xi32>
    %c16_i32 = arith.constant 16 : i32
    %9 = vector.broadcast %c16_i32 : i32 to vector<64x4xi32>
    %10 = arith.muli %8, %9 : vector<64x4xi32>
    %11 = arith.cmpi sge, %7, %10 : vector<64x4xi32>
    %c1_i32 = arith.constant 1 : i32
    %12 = vector.broadcast %c1_i32 : i32 to vector<64x4xi32>
    %13 = arith.addi %8, %12 : vector<64x4xi32>
    %c16_i32_7 = arith.constant 16 : i32
    %14 = vector.broadcast %c16_i32_7 : i32 to vector<64x4xi32>
    %15 = arith.muli %13, %14 : vector<64x4xi32>
    %16 = arith.cmpi slt, %7, %15 : vector<64x4xi32>
    %17 = arith.andi %11, %16 : vector<64x4xi1>
    %cst_8 = arith.constant 0.000000e+00 : f32
    %18 = vector.broadcast %cst_8 : f32 to vector<64x4xf32>
    %19 = arith.select %17, %4, %18 : vector<64x4xi1>, vector<64x4xf32>
    %cst_9 = arith.constant dense<0.000000e+00> : vector<64xf32>
    %20 = vector.multi_reduction <add>, %19, %cst_9 [1] : vector<64x4xf32> to vector<64xf32>
    %21 = vector.shape_cast %20 : vector<64xf32> to vector<64x1xf32>
    %cst_10 = arith.constant 0.000000e+00 : f32
    %22 = vector.broadcast %cst_10 : f32 to vector<64x4xf32>
    %23 = arith.select %17, %6, %22 : vector<64x4xi1>, vector<64x4xf32>
    %cst_11 = arith.constant dense<0.000000e+00> : vector<64xf32>
    %24 = vector.multi_reduction <add>, %23, %cst_11 [1] : vector<64x4xf32> to vector<64xf32>
    %25 = vector.shape_cast %24 : vector<64xf32> to vector<64x1xf32>
    %26 = tpu.iota {dimensions = array<i32: 0>} : vector<64x64xi32>
    %27 = tpu.iota {dimensions = array<i32: 1>} : vector<64x64xi32>
    %c15_i32 = arith.constant 15 : i32
    %28 = vector.broadcast %c15_i32 : i32 to vector<64x64xi32>
    %29 = arith.andi %26, %28 : vector<64x64xi32>
    %c15_i32_12 = arith.constant 15 : i32
    %30 = vector.broadcast %c15_i32_12 : i32 to vector<64x64xi32>
    %31 = arith.andi %27, %30 : vector<64x64xi32>
    %32 = arith.cmpi eq, %29, %31 : vector<64x64xi32>
    %cst_13 = arith.constant 3.125000e-02 : f32
    %cst_14 = arith.constant 0.000000e+00 : f32
    %33 = vector.broadcast %cst_13 : f32 to vector<64x64xf32>
    %34 = vector.broadcast %cst_14 : f32 to vector<64x64xf32>
    %35 = arith.select %32, %33, %34 : vector<64x64xi1>, vector<64x64xf32>
    %cst_15 = arith.constant dense<0.000000e+00> : vector<64x1xf32>
    %36 = tpu.matmul %35, %21, %cst_15 {dimension_numbers = #tpu.dot_dimension_numbers<[1], [0], [0], [1], [0, 0, 1, 1], [], []>} : vector<64x64xf32>, vector<64x1xf32>, vector<64x1xf32> -> vector<64x1xf32>
    %cst_16 = arith.constant dense<0.000000e+00> : vector<64x1xf32>
    %37 = tpu.matmul %35, %25, %cst_16 {dimension_numbers = #tpu.dot_dimension_numbers<[1], [0], [0], [1], [0, 0, 1, 1], [], []>} : vector<64x64xf32>, vector<64x1xf32>, vector<64x1xf32> -> vector<64x1xf32>
    %38 = arith.mulf %36, %36 : vector<64x1xf32>
    %39 = arith.subf %37, %38 : vector<64x1xf32>
    %cst_17 = arith.constant 0.000000e+00 : f32
    %40 = vector.broadcast %cst_17 : f32 to vector<64x1xf32>
    %41 = arith.maximumf %39, %40 : vector<64x1xf32>
    %c0_18 = arith.constant 0 : index
    %c0_19 = arith.constant 0 : index
    %42 = vector.load %arg4[%c0_18, %c0_19] : memref<64x2xf32, #tpu.memory_space<vmem>>, vector<64x2xf32>
    %43 = vector.extract_strided_slice %42 {offsets = [0, 0], sizes = [64, 1], strides = [1, 1]} : vector<64x2xf32> to vector<64x1xf32>
    %44 = vector.extract_strided_slice %42 {offsets = [0, 1], sizes = [64, 1], strides = [1, 1]} : vector<64x2xf32> to vector<64x1xf32>
    %cst_20 = arith.constant 9.99999974E-6 : f32
    %45 = vector.broadcast %cst_20 : f32 to vector<64x1xf32>
    %46 = arith.addf %41, %45 : vector<64x1xf32>
    %47 = math.rsqrt %46 : vector<64x1xf32>
    %48 = arith.mulf %43, %47 : vector<64x1xf32>
    %49 = arith.mulf %36, %48 : vector<64x1xf32>
    %50 = arith.subf %44, %49 : vector<64x1xf32>
    %51 = vector.broadcast %48 : vector<64x1xf32> to vector<64x128xf32>
    %52 = arith.mulf %2, %51 : vector<64x128xf32>
    %53 = vector.broadcast %50 : vector<64x1xf32> to vector<64x128xf32>
    %54 = arith.addf %52, %53 : vector<64x128xf32>
    %cst_21 = arith.constant 0.000000e+00 : f32
    %55 = vector.broadcast %cst_21 : f32 to vector<64x128xf32>
    %56 = arith.maximumf %54, %55 : vector<64x128xf32>
    %57 = arith.truncf %56 : vector<64x128xf32> to vector<64x128xbf16>
    %c0_22 = arith.constant 0 : index
    %c0_23 = arith.constant 0 : index
    %58 = vector.load %arg5[%c0_22, %c0_23] : memref<64x128xbf16, #tpu.memory_space<vmem>>, vector<64x128xbf16>
    tpu.vector_store %arg5[%c0_22, %c0_23], %57 {strides = array<i32>} : memref<64x128xbf16, #tpu.memory_space<vmem>>, vector<64x128xbf16>,
    return
  }
  func.func @transform_0(%arg0: i32) -> (i32, i32) {
    %c0_i32 = arith.constant 0 : i32
    %c0_i32_0 = arith.constant 0 : i32
    %c0_i32_1 = arith.constant 0 : i32
    return %c0_i32, %c0_i32_0 : i32, i32
  }
  func.func @transform_1(%arg0: i32) -> (i32, i32) {
    %c0_i32 = arith.constant 0 : i32
    %c0_i32_0 = arith.constant 0 : i32
    %c0_i32_1 = arith.constant 0 : i32
    return %c0_i32, %c0_i32_0 : i32, i32
  }
  func.func @transform_2(%arg0: i32) -> (i32, i32) {
    %c0_i32 = arith.constant 0 : i32
    %c0_i32_0 = arith.constant 0 : i32
    %c0_i32_1 = arith.constant 0 : i32
    return %c0_i32, %c0_i32_0 : i32, i32
  }
  func.func @transform_3(%arg0: i32) -> (i32, i32) {
    %c0_i32 = arith.constant 0 : i32
    %c0_i32_0 = arith.constant 0 : i32
    %c0_i32_1 = arith.constant 0 : i32
    return %c0_i32, %c0_i32_0 : i32, i32
  }
  func.func @transform_4(%arg0: i32) -> (i32, i32) {
    %c0_i32 = arith.constant 0 : i32
    %c0_i32_0 = arith.constant 0 : i32
    %c0_i32_1 = arith.constant 0 : i32
    return %c0_i32, %c0_i32_0 : i32, i32
  }
}

module attributes {stable_mosaic.version = 11 : i64} {
  func.func @_convt_bn_relu_kernel(%arg0: i32, %arg1: memref<32x64xbf16, #tpu.memory_space<vmem>>, %arg2: memref<64x128xbf16, #tpu.memory_space<vmem>>, %arg3: memref<128x4xf32, #tpu.memory_space<vmem>>, %arg4: memref<32x2xf32, #tpu.memory_space<vmem>>, %arg5: memref<32x128xbf16, #tpu.memory_space<vmem>>) attributes {dimension_semantics = [#tpu.dimension_semantics<arbitrary>], iteration_bounds = array<i64: 1>, scalar_prefetch = 0 : i64, scratch_operands = 0 : i64, tpu.core_type = #tpu.core_type<tc>, window_params = [{pipeline_mode = #tpu.pipeline_mode<synchronous>, transform_indices = @transform_0, window_bounds = array<i64: 32, 64>}, {pipeline_mode = #tpu.pipeline_mode<synchronous>, transform_indices = @transform_1, window_bounds = array<i64: 64, 128>}, {pipeline_mode = #tpu.pipeline_mode<synchronous>, transform_indices = @transform_2, window_bounds = array<i64: 128, 4>}, {pipeline_mode = #tpu.pipeline_mode<synchronous>, transform_indices = @transform_3, window_bounds = array<i64: 32, 2>}, {pipeline_mode = #tpu.pipeline_mode<synchronous>, transform_indices = @transform_4, window_bounds = array<i64: 32, 128>}]} {
    %c0 = arith.constant 0 : index
    %c0_0 = arith.constant 0 : index
    %0 = vector.load %arg1[%c0, %c0_0] : memref<32x64xbf16, #tpu.memory_space<vmem>>, vector<32x64xbf16>
    %c0_1 = arith.constant 0 : index
    %c0_2 = arith.constant 0 : index
    %1 = vector.load %arg2[%c0_1, %c0_2] : memref<64x128xbf16, #tpu.memory_space<vmem>>, vector<64x128xbf16>
    %cst = arith.constant dense<0.000000e+00> : vector<32x128xf32>
    %2 = tpu.matmul %0, %1, %cst {dimension_numbers = #tpu.dot_dimension_numbers<[1], [0], [0], [1], [0, 0, 1, 1], [], []>} : vector<32x64xbf16>, vector<64x128xbf16>, vector<32x128xf32> -> vector<32x128xf32>
    %c0_3 = arith.constant 0 : index
    %c0_4 = arith.constant 0 : index
    %3 = vector.load %arg3[%c0_3, %c0_4] : memref<128x4xf32, #tpu.memory_space<vmem>>, vector<128x4xf32>
    %cst_5 = arith.constant dense<0.000000e+00> : vector<32x4xf32>
    %4 = tpu.matmul %2, %3, %cst_5 {dimension_numbers = #tpu.dot_dimension_numbers<[1], [0], [0], [1], [0, 0, 1, 1], [], []>} : vector<32x128xf32>, vector<128x4xf32>, vector<32x4xf32> -> vector<32x4xf32>
    %5 = arith.mulf %2, %2 : vector<32x128xf32>
    %cst_6 = arith.constant dense<0.000000e+00> : vector<32x4xf32>
    %6 = tpu.matmul %5, %3, %cst_6 {dimension_numbers = #tpu.dot_dimension_numbers<[1], [0], [0], [1], [0, 0, 1, 1], [], []>} : vector<32x128xf32>, vector<128x4xf32>, vector<32x4xf32> -> vector<32x4xf32>
    %7 = tpu.iota {dimensions = array<i32: 0>} : vector<32x4xi32>
    %8 = tpu.iota {dimensions = array<i32: 1>} : vector<32x4xi32>
    %c8_i32 = arith.constant 8 : i32
    %9 = vector.broadcast %c8_i32 : i32 to vector<32x4xi32>
    %10 = arith.muli %8, %9 : vector<32x4xi32>
    %11 = arith.cmpi sge, %7, %10 : vector<32x4xi32>
    %c1_i32 = arith.constant 1 : i32
    %12 = vector.broadcast %c1_i32 : i32 to vector<32x4xi32>
    %13 = arith.addi %8, %12 : vector<32x4xi32>
    %c8_i32_7 = arith.constant 8 : i32
    %14 = vector.broadcast %c8_i32_7 : i32 to vector<32x4xi32>
    %15 = arith.muli %13, %14 : vector<32x4xi32>
    %16 = arith.cmpi slt, %7, %15 : vector<32x4xi32>
    %17 = arith.andi %11, %16 : vector<32x4xi1>
    %cst_8 = arith.constant 0.000000e+00 : f32
    %18 = vector.broadcast %cst_8 : f32 to vector<32x4xf32>
    %19 = arith.select %17, %4, %18 : vector<32x4xi1>, vector<32x4xf32>
    %cst_9 = arith.constant dense<0.000000e+00> : vector<32xf32>
    %20 = vector.multi_reduction <add>, %19, %cst_9 [1] : vector<32x4xf32> to vector<32xf32>
    %21 = vector.shape_cast %20 : vector<32xf32> to vector<32x1xf32>
    %cst_10 = arith.constant 0.000000e+00 : f32
    %22 = vector.broadcast %cst_10 : f32 to vector<32x4xf32>
    %23 = arith.select %17, %6, %22 : vector<32x4xi1>, vector<32x4xf32>
    %cst_11 = arith.constant dense<0.000000e+00> : vector<32xf32>
    %24 = vector.multi_reduction <add>, %23, %cst_11 [1] : vector<32x4xf32> to vector<32xf32>
    %25 = vector.shape_cast %24 : vector<32xf32> to vector<32x1xf32>
    %26 = tpu.iota {dimensions = array<i32: 0>} : vector<32x32xi32>
    %27 = tpu.iota {dimensions = array<i32: 1>} : vector<32x32xi32>
    %c7_i32 = arith.constant 7 : i32
    %28 = vector.broadcast %c7_i32 : i32 to vector<32x32xi32>
    %29 = arith.andi %26, %28 : vector<32x32xi32>
    %c7_i32_12 = arith.constant 7 : i32
    %30 = vector.broadcast %c7_i32_12 : i32 to vector<32x32xi32>
    %31 = arith.andi %27, %30 : vector<32x32xi32>
    %32 = arith.cmpi eq, %29, %31 : vector<32x32xi32>
    %cst_13 = arith.constant 7.812500e-03 : f32
    %cst_14 = arith.constant 0.000000e+00 : f32
    %33 = vector.broadcast %cst_13 : f32 to vector<32x32xf32>
    %34 = vector.broadcast %cst_14 : f32 to vector<32x32xf32>
    %35 = arith.select %32, %33, %34 : vector<32x32xi1>, vector<32x32xf32>
    %cst_15 = arith.constant dense<0.000000e+00> : vector<32x1xf32>
    %36 = tpu.matmul %35, %21, %cst_15 {dimension_numbers = #tpu.dot_dimension_numbers<[1], [0], [0], [1], [0, 0, 1, 1], [], []>} : vector<32x32xf32>, vector<32x1xf32>, vector<32x1xf32> -> vector<32x1xf32>
    %cst_16 = arith.constant dense<0.000000e+00> : vector<32x1xf32>
    %37 = tpu.matmul %35, %25, %cst_16 {dimension_numbers = #tpu.dot_dimension_numbers<[1], [0], [0], [1], [0, 0, 1, 1], [], []>} : vector<32x32xf32>, vector<32x1xf32>, vector<32x1xf32> -> vector<32x1xf32>
    %38 = arith.mulf %36, %36 : vector<32x1xf32>
    %39 = arith.subf %37, %38 : vector<32x1xf32>
    %cst_17 = arith.constant 0.000000e+00 : f32
    %40 = vector.broadcast %cst_17 : f32 to vector<32x1xf32>
    %41 = arith.maximumf %39, %40 : vector<32x1xf32>
    %c0_18 = arith.constant 0 : index
    %c0_19 = arith.constant 0 : index
    %42 = vector.load %arg4[%c0_18, %c0_19] : memref<32x2xf32, #tpu.memory_space<vmem>>, vector<32x2xf32>
    %43 = vector.extract_strided_slice %42 {offsets = [0, 0], sizes = [32, 1], strides = [1, 1]} : vector<32x2xf32> to vector<32x1xf32>
    %44 = vector.extract_strided_slice %42 {offsets = [0, 1], sizes = [32, 1], strides = [1, 1]} : vector<32x2xf32> to vector<32x1xf32>
    %cst_20 = arith.constant 9.99999974E-6 : f32
    %45 = vector.broadcast %cst_20 : f32 to vector<32x1xf32>
    %46 = arith.addf %41, %45 : vector<32x1xf32>
    %47 = math.rsqrt %46 : vector<32x1xf32>
    %48 = arith.mulf %43, %47 : vector<32x1xf32>
    %49 = arith.mulf %36, %48 : vector<32x1xf32>
    %50 = arith.subf %44, %49 : vector<32x1xf32>
    %51 = vector.broadcast %48 : vector<32x1xf32> to vector<32x128xf32>
    %52 = arith.mulf %2, %51 : vector<32x128xf32>
    %53 = vector.broadcast %50 : vector<32x1xf32> to vector<32x128xf32>
    %54 = arith.addf %52, %53 : vector<32x128xf32>
    %cst_21 = arith.constant 0.000000e+00 : f32
    %55 = vector.broadcast %cst_21 : f32 to vector<32x128xf32>
    %56 = arith.maximumf %54, %55 : vector<32x128xf32>
    %57 = arith.truncf %56 : vector<32x128xf32> to vector<32x128xbf16>
    %c0_22 = arith.constant 0 : index
    %c0_23 = arith.constant 0 : index
    %58 = vector.load %arg5[%c0_22, %c0_23] : memref<32x128xbf16, #tpu.memory_space<vmem>>, vector<32x128xbf16>
    tpu.vector_store %arg5[%c0_22, %c0_23], %57 {strides = array<i32>} : memref<32x128xbf16, #tpu.memory_space<vmem>>, vector<32x128xbf16>,
    return
  }
  func.func @transform_0(%arg0: i32) -> (i32, i32) {
    %c0_i32 = arith.constant 0 : i32
    %c0_i32_0 = arith.constant 0 : i32
    %c0_i32_1 = arith.constant 0 : i32
    return %c0_i32, %c0_i32_0 : i32, i32
  }
  func.func @transform_1(%arg0: i32) -> (i32, i32) {
    %c0_i32 = arith.constant 0 : i32
    %c0_i32_0 = arith.constant 0 : i32
    %c0_i32_1 = arith.constant 0 : i32
    return %c0_i32, %c0_i32_0 : i32, i32
  }
  func.func @transform_2(%arg0: i32) -> (i32, i32) {
    %c0_i32 = arith.constant 0 : i32
    %c0_i32_0 = arith.constant 0 : i32
    %c0_i32_1 = arith.constant 0 : i32
    return %c0_i32, %c0_i32_0 : i32, i32
  }
  func.func @transform_3(%arg0: i32) -> (i32, i32) {
    %c0_i32 = arith.constant 0 : i32
    %c0_i32_0 = arith.constant 0 : i32
    %c0_i32_1 = arith.constant 0 : i32
    return %c0_i32, %c0_i32_0 : i32, i32
  }
  func.func @transform_4(%arg0: i32) -> (i32, i32) {
    %c0_i32 = arith.constant 0 : i32
    %c0_i32_0 = arith.constant 0 : i32
    %c0_i32_1 = arith.constant 0 : i32
    return %c0_i32, %c0_i32_0 : i32, i32
  }
}

module attributes {stable_mosaic.version = 11 : i64} {
  func.func @_convt_bn_relu_kernel(%arg0: i32, %arg1: memref<16x32xbf16, #tpu.memory_space<vmem>>, %arg2: memref<32x256xbf16, #tpu.memory_space<vmem>>, %arg3: memref<256x4xf32, #tpu.memory_space<vmem>>, %arg4: memref<16x2xf32, #tpu.memory_space<vmem>>, %arg5: memref<16x256xbf16, #tpu.memory_space<vmem>>) attributes {dimension_semantics = [#tpu.dimension_semantics<arbitrary>], iteration_bounds = array<i64: 1>, scalar_prefetch = 0 : i64, scratch_operands = 0 : i64, tpu.core_type = #tpu.core_type<tc>, window_params = [{pipeline_mode = #tpu.pipeline_mode<synchronous>, transform_indices = @transform_0, window_bounds = array<i64: 16, 32>}, {pipeline_mode = #tpu.pipeline_mode<synchronous>, transform_indices = @transform_1, window_bounds = array<i64: 32, 256>}, {pipeline_mode = #tpu.pipeline_mode<synchronous>, transform_indices = @transform_2, window_bounds = array<i64: 256, 4>}, {pipeline_mode = #tpu.pipeline_mode<synchronous>, transform_indices = @transform_3, window_bounds = array<i64: 16, 2>}, {pipeline_mode = #tpu.pipeline_mode<synchronous>, transform_indices = @transform_4, window_bounds = array<i64: 16, 256>}]} {
    %c0 = arith.constant 0 : index
    %c0_0 = arith.constant 0 : index
    %0 = vector.load %arg1[%c0, %c0_0] : memref<16x32xbf16, #tpu.memory_space<vmem>>, vector<16x32xbf16>
    %c0_1 = arith.constant 0 : index
    %c0_2 = arith.constant 0 : index
    %1 = vector.load %arg2[%c0_1, %c0_2] : memref<32x256xbf16, #tpu.memory_space<vmem>>, vector<32x256xbf16>
    %cst = arith.constant dense<0.000000e+00> : vector<16x256xf32>
    %2 = tpu.matmul %0, %1, %cst {dimension_numbers = #tpu.dot_dimension_numbers<[1], [0], [0], [1], [0, 0, 1, 1], [], []>} : vector<16x32xbf16>, vector<32x256xbf16>, vector<16x256xf32> -> vector<16x256xf32>
    %c0_3 = arith.constant 0 : index
    %c0_4 = arith.constant 0 : index
    %3 = vector.load %arg3[%c0_3, %c0_4] : memref<256x4xf32, #tpu.memory_space<vmem>>, vector<256x4xf32>
    %cst_5 = arith.constant dense<0.000000e+00> : vector<16x4xf32>
    %4 = tpu.matmul %2, %3, %cst_5 {dimension_numbers = #tpu.dot_dimension_numbers<[1], [0], [0], [1], [0, 0, 1, 1], [], []>} : vector<16x256xf32>, vector<256x4xf32>, vector<16x4xf32> -> vector<16x4xf32>
    %5 = arith.mulf %2, %2 : vector<16x256xf32>
    %cst_6 = arith.constant dense<0.000000e+00> : vector<16x4xf32>
    %6 = tpu.matmul %5, %3, %cst_6 {dimension_numbers = #tpu.dot_dimension_numbers<[1], [0], [0], [1], [0, 0, 1, 1], [], []>} : vector<16x256xf32>, vector<256x4xf32>, vector<16x4xf32> -> vector<16x4xf32>
    %7 = tpu.iota {dimensions = array<i32: 0>} : vector<16x4xi32>
    %8 = tpu.iota {dimensions = array<i32: 1>} : vector<16x4xi32>
    %c4_i32 = arith.constant 4 : i32
    %9 = vector.broadcast %c4_i32 : i32 to vector<16x4xi32>
    %10 = arith.muli %8, %9 : vector<16x4xi32>
    %11 = arith.cmpi sge, %7, %10 : vector<16x4xi32>
    %c1_i32 = arith.constant 1 : i32
    %12 = vector.broadcast %c1_i32 : i32 to vector<16x4xi32>
    %13 = arith.addi %8, %12 : vector<16x4xi32>
    %c4_i32_7 = arith.constant 4 : i32
    %14 = vector.broadcast %c4_i32_7 : i32 to vector<16x4xi32>
    %15 = arith.muli %13, %14 : vector<16x4xi32>
    %16 = arith.cmpi slt, %7, %15 : vector<16x4xi32>
    %17 = arith.andi %11, %16 : vector<16x4xi1>
    %cst_8 = arith.constant 0.000000e+00 : f32
    %18 = vector.broadcast %cst_8 : f32 to vector<16x4xf32>
    %19 = arith.select %17, %4, %18 : vector<16x4xi1>, vector<16x4xf32>
    %cst_9 = arith.constant dense<0.000000e+00> : vector<16xf32>
    %20 = vector.multi_reduction <add>, %19, %cst_9 [1] : vector<16x4xf32> to vector<16xf32>
    %21 = vector.shape_cast %20 : vector<16xf32> to vector<16x1xf32>
    %cst_10 = arith.constant 0.000000e+00 : f32
    %22 = vector.broadcast %cst_10 : f32 to vector<16x4xf32>
    %23 = arith.select %17, %6, %22 : vector<16x4xi1>, vector<16x4xf32>
    %cst_11 = arith.constant dense<0.000000e+00> : vector<16xf32>
    %24 = vector.multi_reduction <add>, %23, %cst_11 [1] : vector<16x4xf32> to vector<16xf32>
    %25 = vector.shape_cast %24 : vector<16xf32> to vector<16x1xf32>
    %26 = tpu.iota {dimensions = array<i32: 0>} : vector<16x16xi32>
    %27 = tpu.iota {dimensions = array<i32: 1>} : vector<16x16xi32>
    %c3_i32 = arith.constant 3 : i32
    %28 = vector.broadcast %c3_i32 : i32 to vector<16x16xi32>
    %29 = arith.andi %26, %28 : vector<16x16xi32>
    %c3_i32_12 = arith.constant 3 : i32
    %30 = vector.broadcast %c3_i32_12 : i32 to vector<16x16xi32>
    %31 = arith.andi %27, %30 : vector<16x16xi32>
    %32 = arith.cmpi eq, %29, %31 : vector<16x16xi32>
    %cst_13 = arith.constant 0.001953125 : f32
    %cst_14 = arith.constant 0.000000e+00 : f32
    %33 = vector.broadcast %cst_13 : f32 to vector<16x16xf32>
    %34 = vector.broadcast %cst_14 : f32 to vector<16x16xf32>
    %35 = arith.select %32, %33, %34 : vector<16x16xi1>, vector<16x16xf32>
    %cst_15 = arith.constant dense<0.000000e+00> : vector<16x1xf32>
    %36 = tpu.matmul %35, %21, %cst_15 {dimension_numbers = #tpu.dot_dimension_numbers<[1], [0], [0], [1], [0, 0, 1, 1], [], []>} : vector<16x16xf32>, vector<16x1xf32>, vector<16x1xf32> -> vector<16x1xf32>
    %cst_16 = arith.constant dense<0.000000e+00> : vector<16x1xf32>
    %37 = tpu.matmul %35, %25, %cst_16 {dimension_numbers = #tpu.dot_dimension_numbers<[1], [0], [0], [1], [0, 0, 1, 1], [], []>} : vector<16x16xf32>, vector<16x1xf32>, vector<16x1xf32> -> vector<16x1xf32>
    %38 = arith.mulf %36, %36 : vector<16x1xf32>
    %39 = arith.subf %37, %38 : vector<16x1xf32>
    %cst_17 = arith.constant 0.000000e+00 : f32
    %40 = vector.broadcast %cst_17 : f32 to vector<16x1xf32>
    %41 = arith.maximumf %39, %40 : vector<16x1xf32>
    %c0_18 = arith.constant 0 : index
    %c0_19 = arith.constant 0 : index
    %42 = vector.load %arg4[%c0_18, %c0_19] : memref<16x2xf32, #tpu.memory_space<vmem>>, vector<16x2xf32>
    %43 = vector.extract_strided_slice %42 {offsets = [0, 0], sizes = [16, 1], strides = [1, 1]} : vector<16x2xf32> to vector<16x1xf32>
    %44 = vector.extract_strided_slice %42 {offsets = [0, 1], sizes = [16, 1], strides = [1, 1]} : vector<16x2xf32> to vector<16x1xf32>
    %cst_20 = arith.constant 9.99999974E-6 : f32
    %45 = vector.broadcast %cst_20 : f32 to vector<16x1xf32>
    %46 = arith.addf %41, %45 : vector<16x1xf32>
    %47 = math.rsqrt %46 : vector<16x1xf32>
    %48 = arith.mulf %43, %47 : vector<16x1xf32>
    %49 = arith.mulf %36, %48 : vector<16x1xf32>
    %50 = arith.subf %44, %49 : vector<16x1xf32>
    %51 = vector.broadcast %48 : vector<16x1xf32> to vector<16x256xf32>
    %52 = arith.mulf %2, %51 : vector<16x256xf32>
    %53 = vector.broadcast %50 : vector<16x1xf32> to vector<16x256xf32>
    %54 = arith.addf %52, %53 : vector<16x256xf32>
    %cst_21 = arith.constant 0.000000e+00 : f32
    %55 = vector.broadcast %cst_21 : f32 to vector<16x256xf32>
    %56 = arith.maximumf %54, %55 : vector<16x256xf32>
    %57 = arith.truncf %56 : vector<16x256xf32> to vector<16x256xbf16>
    %c0_22 = arith.constant 0 : index
    %c0_23 = arith.constant 0 : index
    %58 = vector.load %arg5[%c0_22, %c0_23] : memref<16x256xbf16, #tpu.memory_space<vmem>>, vector<16x256xbf16>
    tpu.vector_store %arg5[%c0_22, %c0_23], %57 {strides = array<i32>} : memref<16x256xbf16, #tpu.memory_space<vmem>>, vector<16x256xbf16>,
    return
  }
  func.func @transform_0(%arg0: i32) -> (i32, i32) {
    %c0_i32 = arith.constant 0 : i32
    %c0_i32_0 = arith.constant 0 : i32
    %c0_i32_1 = arith.constant 0 : i32
    return %c0_i32, %c0_i32_0 : i32, i32
  }
  func.func @transform_1(%arg0: i32) -> (i32, i32) {
    %c0_i32 = arith.constant 0 : i32
    %c0_i32_0 = arith.constant 0 : i32
    %c0_i32_1 = arith.constant 0 : i32
    return %c0_i32, %c0_i32_0 : i32, i32
  }
  func.func @transform_2(%arg0: i32) -> (i32, i32) {
    %c0_i32 = arith.constant 0 : i32
    %c0_i32_0 = arith.constant 0 : i32
    %c0_i32_1 = arith.constant 0 : i32
    return %c0_i32, %c0_i32_0 : i32, i32
  }
  func.func @transform_3(%arg0: i32) -> (i32, i32) {
    %c0_i32 = arith.constant 0 : i32
    %c0_i32_0 = arith.constant 0 : i32
    %c0_i32_1 = arith.constant 0 : i32
    return %c0_i32, %c0_i32_0 : i32, i32
  }
  func.func @transform_4(%arg0: i32) -> (i32, i32) {
    %c0_i32 = arith.constant 0 : i32
    %c0_i32_0 = arith.constant 0 : i32
    %c0_i32_1 = arith.constant 0 : i32
    return %c0_i32, %c0_i32_0 : i32, i32
  }
}

module attributes {stable_mosaic.version = 11 : i64} {
  func.func @_convt_bn_relu_kernel(%arg0: i32, %arg1: memref<8x16xbf16, #tpu.memory_space<vmem>>, %arg2: memref<16x640xbf16, #tpu.memory_space<vmem>>, %arg3: memref<640x4xf32, #tpu.memory_space<vmem>>, %arg4: memref<8x2xf32, #tpu.memory_space<vmem>>, %arg5: memref<8x640xbf16, #tpu.memory_space<vmem>>) attributes {dimension_semantics = [#tpu.dimension_semantics<arbitrary>], iteration_bounds = array<i64: 1>, scalar_prefetch = 0 : i64, scratch_operands = 0 : i64, tpu.core_type = #tpu.core_type<tc>, window_params = [{pipeline_mode = #tpu.pipeline_mode<synchronous>, transform_indices = @transform_0, window_bounds = array<i64: 8, 16>}, {pipeline_mode = #tpu.pipeline_mode<synchronous>, transform_indices = @transform_1, window_bounds = array<i64: 16, 640>}, {pipeline_mode = #tpu.pipeline_mode<synchronous>, transform_indices = @transform_2, window_bounds = array<i64: 640, 4>}, {pipeline_mode = #tpu.pipeline_mode<synchronous>, transform_indices = @transform_3, window_bounds = array<i64: 8, 2>}, {pipeline_mode = #tpu.pipeline_mode<synchronous>, transform_indices = @transform_4, window_bounds = array<i64: 8, 640>}]} {
    %c0 = arith.constant 0 : index
    %c0_0 = arith.constant 0 : index
    %0 = vector.load %arg1[%c0, %c0_0] : memref<8x16xbf16, #tpu.memory_space<vmem>>, vector<8x16xbf16>
    %c0_1 = arith.constant 0 : index
    %c0_2 = arith.constant 0 : index
    %1 = vector.load %arg2[%c0_1, %c0_2] : memref<16x640xbf16, #tpu.memory_space<vmem>>, vector<16x640xbf16>
    %cst = arith.constant dense<0.000000e+00> : vector<8x640xf32>
    %2 = tpu.matmul %0, %1, %cst {dimension_numbers = #tpu.dot_dimension_numbers<[1], [0], [0], [1], [0, 0, 1, 1], [], []>} : vector<8x16xbf16>, vector<16x640xbf16>, vector<8x640xf32> -> vector<8x640xf32>
    %c0_3 = arith.constant 0 : index
    %c0_4 = arith.constant 0 : index
    %3 = vector.load %arg3[%c0_3, %c0_4] : memref<640x4xf32, #tpu.memory_space<vmem>>, vector<640x4xf32>
    %cst_5 = arith.constant dense<0.000000e+00> : vector<8x4xf32>
    %4 = tpu.matmul %2, %3, %cst_5 {dimension_numbers = #tpu.dot_dimension_numbers<[1], [0], [0], [1], [0, 0, 1, 1], [], []>} : vector<8x640xf32>, vector<640x4xf32>, vector<8x4xf32> -> vector<8x4xf32>
    %5 = arith.mulf %2, %2 : vector<8x640xf32>
    %cst_6 = arith.constant dense<0.000000e+00> : vector<8x4xf32>
    %6 = tpu.matmul %5, %3, %cst_6 {dimension_numbers = #tpu.dot_dimension_numbers<[1], [0], [0], [1], [0, 0, 1, 1], [], []>} : vector<8x640xf32>, vector<640x4xf32>, vector<8x4xf32> -> vector<8x4xf32>
    %7 = tpu.iota {dimensions = array<i32: 0>} : vector<8x4xi32>
    %8 = tpu.iota {dimensions = array<i32: 1>} : vector<8x4xi32>
    %c2_i32 = arith.constant 2 : i32
    %9 = vector.broadcast %c2_i32 : i32 to vector<8x4xi32>
    %10 = arith.muli %8, %9 : vector<8x4xi32>
    %11 = arith.cmpi sge, %7, %10 : vector<8x4xi32>
    %c1_i32 = arith.constant 1 : i32
    %12 = vector.broadcast %c1_i32 : i32 to vector<8x4xi32>
    %13 = arith.addi %8, %12 : vector<8x4xi32>
    %c2_i32_7 = arith.constant 2 : i32
    %14 = vector.broadcast %c2_i32_7 : i32 to vector<8x4xi32>
    %15 = arith.muli %13, %14 : vector<8x4xi32>
    %16 = arith.cmpi slt, %7, %15 : vector<8x4xi32>
    %17 = arith.andi %11, %16 : vector<8x4xi1>
    %cst_8 = arith.constant 0.000000e+00 : f32
    %18 = vector.broadcast %cst_8 : f32 to vector<8x4xf32>
    %19 = arith.select %17, %4, %18 : vector<8x4xi1>, vector<8x4xf32>
    %cst_9 = arith.constant dense<0.000000e+00> : vector<8xf32>
    %20 = vector.multi_reduction <add>, %19, %cst_9 [1] : vector<8x4xf32> to vector<8xf32>
    %21 = vector.shape_cast %20 : vector<8xf32> to vector<8x1xf32>
    %cst_10 = arith.constant 0.000000e+00 : f32
    %22 = vector.broadcast %cst_10 : f32 to vector<8x4xf32>
    %23 = arith.select %17, %6, %22 : vector<8x4xi1>, vector<8x4xf32>
    %cst_11 = arith.constant dense<0.000000e+00> : vector<8xf32>
    %24 = vector.multi_reduction <add>, %23, %cst_11 [1] : vector<8x4xf32> to vector<8xf32>
    %25 = vector.shape_cast %24 : vector<8xf32> to vector<8x1xf32>
    %26 = tpu.iota {dimensions = array<i32: 0>} : vector<8x8xi32>
    %27 = tpu.iota {dimensions = array<i32: 1>} : vector<8x8xi32>
    %c1_i32_12 = arith.constant 1 : i32
    %28 = vector.broadcast %c1_i32_12 : i32 to vector<8x8xi32>
    %29 = arith.andi %26, %28 : vector<8x8xi32>
    %c1_i32_13 = arith.constant 1 : i32
    %30 = vector.broadcast %c1_i32_13 : i32 to vector<8x8xi32>
    %31 = arith.andi %27, %30 : vector<8x8xi32>
    %32 = arith.cmpi eq, %29, %31 : vector<8x8xi32>
    %cst_14 = arith.constant 4.8828125E-4 : f32
    %cst_15 = arith.constant 0.000000e+00 : f32
    %33 = vector.broadcast %cst_14 : f32 to vector<8x8xf32>
    %34 = vector.broadcast %cst_15 : f32 to vector<8x8xf32>
    %35 = arith.select %32, %33, %34 : vector<8x8xi1>, vector<8x8xf32>
    %cst_16 = arith.constant dense<0.000000e+00> : vector<8x1xf32>
    %36 = tpu.matmul %35, %21, %cst_16 {dimension_numbers = #tpu.dot_dimension_numbers<[1], [0], [0], [1], [0, 0, 1, 1], [], []>} : vector<8x8xf32>, vector<8x1xf32>, vector<8x1xf32> -> vector<8x1xf32>
    %cst_17 = arith.constant dense<0.000000e+00> : vector<8x1xf32>
    %37 = tpu.matmul %35, %25, %cst_17 {dimension_numbers = #tpu.dot_dimension_numbers<[1], [0], [0], [1], [0, 0, 1, 1], [], []>} : vector<8x8xf32>, vector<8x1xf32>, vector<8x1xf32> -> vector<8x1xf32>
    %38 = arith.mulf %36, %36 : vector<8x1xf32>
    %39 = arith.subf %37, %38 : vector<8x1xf32>
    %cst_18 = arith.constant 0.000000e+00 : f32
    %40 = vector.broadcast %cst_18 : f32 to vector<8x1xf32>
    %41 = arith.maximumf %39, %40 : vector<8x1xf32>
    %c0_19 = arith.constant 0 : index
    %c0_20 = arith.constant 0 : index
    %42 = vector.load %arg4[%c0_19, %c0_20] : memref<8x2xf32, #tpu.memory_space<vmem>>, vector<8x2xf32>
    %43 = vector.extract_strided_slice %42 {offsets = [0, 0], sizes = [8, 1], strides = [1, 1]} : vector<8x2xf32> to vector<8x1xf32>
    %44 = vector.extract_strided_slice %42 {offsets = [0, 1], sizes = [8, 1], strides = [1, 1]} : vector<8x2xf32> to vector<8x1xf32>
    %cst_21 = arith.constant 9.99999974E-6 : f32
    %45 = vector.broadcast %cst_21 : f32 to vector<8x1xf32>
    %46 = arith.addf %41, %45 : vector<8x1xf32>
    %47 = math.rsqrt %46 : vector<8x1xf32>
    %48 = arith.mulf %43, %47 : vector<8x1xf32>
    %49 = arith.mulf %36, %48 : vector<8x1xf32>
    %50 = arith.subf %44, %49 : vector<8x1xf32>
    %51 = vector.broadcast %48 : vector<8x1xf32> to vector<8x640xf32>
    %52 = arith.mulf %2, %51 : vector<8x640xf32>
    %53 = vector.broadcast %50 : vector<8x1xf32> to vector<8x640xf32>
    %54 = arith.addf %52, %53 : vector<8x640xf32>
    %cst_22 = arith.constant 0.000000e+00 : f32
    %55 = vector.broadcast %cst_22 : f32 to vector<8x640xf32>
    %56 = arith.maximumf %54, %55 : vector<8x640xf32>
    %57 = arith.truncf %56 : vector<8x640xf32> to vector<8x640xbf16>
    %c0_23 = arith.constant 0 : index
    %c0_24 = arith.constant 0 : index
    %58 = vector.load %arg5[%c0_23, %c0_24] : memref<8x640xbf16, #tpu.memory_space<vmem>>, vector<8x640xbf16>
    tpu.vector_store %arg5[%c0_23, %c0_24], %57 {strides = array<i32>} : memref<8x640xbf16, #tpu.memory_space<vmem>>, vector<8x640xbf16>,
    return
  }
  func.func @transform_0(%arg0: i32) -> (i32, i32) {
    %c0_i32 = arith.constant 0 : i32
    %c0_i32_0 = arith.constant 0 : i32
    %c0_i32_1 = arith.constant 0 : i32
    return %c0_i32, %c0_i32_0 : i32, i32
  }
  func.func @transform_1(%arg0: i32) -> (i32, i32) {
    %c0_i32 = arith.constant 0 : i32
    %c0_i32_0 = arith.constant 0 : i32
    %c0_i32_1 = arith.constant 0 : i32
    return %c0_i32, %c0_i32_0 : i32, i32
  }
  func.func @transform_2(%arg0: i32) -> (i32, i32) {
    %c0_i32 = arith.constant 0 : i32
    %c0_i32_0 = arith.constant 0 : i32
    %c0_i32_1 = arith.constant 0 : i32
    return %c0_i32, %c0_i32_0 : i32, i32
  }
  func.func @transform_3(%arg0: i32) -> (i32, i32) {
    %c0_i32 = arith.constant 0 : i32
    %c0_i32_0 = arith.constant 0 : i32
    %c0_i32_1 = arith.constant 0 : i32
    return %c0_i32, %c0_i32_0 : i32, i32
  }
  func.func @transform_4(%arg0: i32) -> (i32, i32) {
    %c0_i32 = arith.constant 0 : i32
    %c0_i32_0 = arith.constant 0 : i32
    %c0_i32_1 = arith.constant 0 : i32
    return %c0_i32, %c0_i32_0 : i32, i32
  }
}

module attributes {stable_mosaic.version = 11 : i64} {
  func.func @_convt_tanh_kernel(%arg0: i32, %arg1: memref<12x8xbf16, #tpu.memory_space<vmem>>, %arg2: memref<8x2304xbf16, #tpu.memory_space<vmem>>, %arg3: memref<12x1xf32, #tpu.memory_space<vmem>>, %arg4: memref<12x2304xf32, #tpu.memory_space<vmem>>) attributes {dimension_semantics = [#tpu.dimension_semantics<arbitrary>], iteration_bounds = array<i64: 1>, scalar_prefetch = 0 : i64, scratch_operands = 0 : i64, tpu.core_type = #tpu.core_type<tc>, window_params = [{pipeline_mode = #tpu.pipeline_mode<synchronous>, transform_indices = @transform_0, window_bounds = array<i64: 12, 8>}, {pipeline_mode = #tpu.pipeline_mode<synchronous>, transform_indices = @transform_1, window_bounds = array<i64: 8, 2304>}, {pipeline_mode = #tpu.pipeline_mode<synchronous>, transform_indices = @transform_2, window_bounds = array<i64: 12, 1>}, {pipeline_mode = #tpu.pipeline_mode<synchronous>, transform_indices = @transform_3, window_bounds = array<i64: 12, 2304>}]} {
    %c0 = arith.constant 0 : index
    %c0_0 = arith.constant 0 : index
    %0 = vector.load %arg1[%c0, %c0_0] : memref<12x8xbf16, #tpu.memory_space<vmem>>, vector<12x8xbf16>
    %c0_1 = arith.constant 0 : index
    %c0_2 = arith.constant 0 : index
    %1 = vector.load %arg2[%c0_1, %c0_2] : memref<8x2304xbf16, #tpu.memory_space<vmem>>, vector<8x2304xbf16>
    %cst = arith.constant dense<0.000000e+00> : vector<12x2304xf32>
    %2 = tpu.matmul %0, %1, %cst {dimension_numbers = #tpu.dot_dimension_numbers<[1], [0], [0], [1], [0, 0, 1, 1], [], []>} : vector<12x8xbf16>, vector<8x2304xbf16>, vector<12x2304xf32> -> vector<12x2304xf32>
    %c0_3 = arith.constant 0 : index
    %c0_4 = arith.constant 0 : index
    %3 = vector.load %arg3[%c0_3, %c0_4] : memref<12x1xf32, #tpu.memory_space<vmem>>, vector<12x1xf32>
    %4 = vector.broadcast %3 : vector<12x1xf32> to vector<12x2304xf32>
    %5 = arith.addf %2, %4 : vector<12x2304xf32>
    %6 = math.tanh %5 : vector<12x2304xf32>
    %c0_5 = arith.constant 0 : index
    %c0_6 = arith.constant 0 : index
    %7 = vector.load %arg4[%c0_5, %c0_6] : memref<12x2304xf32, #tpu.memory_space<vmem>>, vector<12x2304xf32>
    tpu.vector_store %arg4[%c0_5, %c0_6], %6 {strides = array<i32>} : memref<12x2304xf32, #tpu.memory_space<vmem>>, vector<12x2304xf32>,
    return
  }
  func.func @transform_0(%arg0: i32) -> (i32, i32) {
    %c0_i32 = arith.constant 0 : i32
    %c0_i32_0 = arith.constant 0 : i32
    %c0_i32_1 = arith.constant 0 : i32
    return %c0_i32, %c0_i32_0 : i32, i32
  }
  func.func @transform_1(%arg0: i32) -> (i32, i32) {
    %c0_i32 = arith.constant 0 : i32
    %c0_i32_0 = arith.constant 0 : i32
    %c0_i32_1 = arith.constant 0 : i32
    return %c0_i32, %c0_i32_0 : i32, i32
  }
  func.func @transform_2(%arg0: i32) -> (i32, i32) {
    %c0_i32 = arith.constant 0 : i32
    %c0_i32_0 = arith.constant 0 : i32
    %c0_i32_1 = arith.constant 0 : i32
    return %c0_i32, %c0_i32_0 : i32, i32
  }
  func.func @transform_3(%arg0: i32) -> (i32, i32) {
    %c0_i32 = arith.constant 0 : i32
    %c0_i32_0 = arith.constant 0 : i32
    %c0_i32_1 = arith.constant 0 : i32
    return %c0_i32, %c0_i32_0 : i32, i32
  }
}

</mosaic_0001>

<bundles_post_ra>
// kernel: tile.48
= control target key start
LH: loop header
LB: loop body
LE: loop exit
PB: predicated region body
PF: predicated region fallthrough
CT: control target
= control target key end

     0   :  { %2 = vsyncpa [#allocation1], 0  ;;  %s48_s8 = smov [#allocation0]   ;;  %s65_s0 = inlined_call_operand.hbm [shape: f32[16], index: 0, kind: input, shape index: {}]   ;;  %s66_s1 = inlined_call_operand.vmem [shape: f32[4,16], index: 1, kind: output, shape index: {}]  }
   0x1   :  { %s8_s0 = sshll.u32 %s65_s0, 4  ;;  %s10_s9 = sshll.u32 %s48_s8, 4  ;;  %s9_s0 = int_to_ptr.hbm [resolvable:$true] %s8_s0  ;;  %s11_s9 = int_to_ptr.vmem [resolvable:$true] %s10_s9 }
   0x2   :  { %13 = dma.hbm_to_vmem [thread:$0]  %s9_s0, 16, %s11_s9, [#allocation1]  }
   0x3   :  { %46 = dma.done.wait [#allocation1], 16  }
   0x4   :  { %47 = vsyncadd [#allocation1], 4294967280  ;;  %v18_v0 = vld [vmem:[#allocation0] ss:$0 sm:$0xff] }
   0x5   :  { %19 = vst [vmem:[%s66_s1] sm:$0xf] %v18_v0 }
   0x6   :  { %20 = vsyncpa [#allocation1], 1 }

// kernel: tile.53
= control target key start
LH: loop header
LB: loop body
LE: loop exit
PB: predicated region body
PF: predicated region fallthrough
CT: control target
= control target key end

     0   :  { %s37_s8 = smov 16   ;;  %s38_s9 = smov 32   ;;  %vm7_vm0 = vcmask 130048   ;;  %vm13_vm1 = vcmask 523648   ;;  %vm19_vm2 = vcmask 392448   ;;  %vm25_vm3 = vcmask 261248   ;;  %s55_s0 = inlined_call_operand.vmem [shape: f32[4,16], index: 0, kind: input, shape index: {}]   ;;  %s56_s1 = inlined_call_operand.vmem [shape: f32[64,1], index: 1, kind: output, shape index: {}]  }
   0x1   :  { %v4_v0 = vld [vmem:[%s55_s0] sm:$0xf]  ;;  %s36_s0 = smov 48  }
   0x2   :  { %5 = vst [vmem:[#allocation1] sm:$0xf] %v4_v0 }
   0x9   :  { %v10_v1 = vld [vmem:[#allocation1 + $0x3] sm:$0x1]   ;;  %v22_v2 = vld [vmem:[#allocation1 + $0x1] sm:$0x1]   ;;  %v16_v3 = vld [vmem:[#allocation1 + $0x2] sm:$0x1]  }
   0xa   :  { %11 = vrot.lane.b32.xlu0 %v10_v1, %s36_s0  ;;  %23 = vrot.lane.b32.xlu1 %v22_v2, %s37_s8  ;;  %v6_v4 = vld [vmem:[#allocation1] sm:$0x1]  }
   0xb   :  { %8 = vst.msk [vmem:[#allocation0] sm:$0x1] %vm7_vm0, %v6_v4  }
  0x12   :  { %17 = vrot.lane.b32.xlu0 %v16_v3, %s38_s9 }
  0x7c   :  { %v12_v5 = vpop.permute.xlu0 %11   ;;  %v24_v6 = vpop.permute.xlu1 %23  }
  0x7d   :  { %14 = vst.msk [vmem:[#allocation0] sm:$0x1] %vm13_vm1, %v12_v5  }
  0x84   :  { %v18_v7 = vpop.permute.xlu0 %17  }
  0x85   :  { %20 = vst.msk [vmem:[#allocation0] sm:$0x1] %vm19_vm2, %v18_v7  }
  0x86   :  { %26 = vst.msk [vmem:[#allocation0] sm:$0x1] %vm25_vm3, %v24_v6  }
  0x8d   :  { %v29_v8 = vld [vmem:[#allocation0] sm:$0x1] }
  0x8e   :  { %32 = vst [vmem:[%s56_s1] sm:$0x1] %v29_v8 }

// kernel: tile.58
= control target key start
LH: loop header
LB: loop body
LE: loop exit
PB: predicated region body
PF: predicated region fallthrough
CT: control target
= control target key end

     0   :  { %2 = vsyncpa [#allocation1], 0  ;;  %s48_s8 = smov [#allocation0]   ;;  %s65_s0 = inlined_call_operand.hbm [shape: f32[8], index: 0, kind: input, shape index: {}]   ;;  %s66_s1 = inlined_call_operand.vmem [shape: f32[4,8], index: 1, kind: output, shape index: {}]  }
   0x1   :  { %s8_s0 = sshll.u32 %s65_s0, 4  ;;  %s10_s9 = sshll.u32 %s48_s8, 4  ;;  %s9_s0 = int_to_ptr.hbm [resolvable:$true] %s8_s0  ;;  %s11_s9 = int_to_ptr.vmem [resolvable:$true] %s10_s9 }
   0x2   :  { %13 = dma.hbm_to_vmem [thread:$0]  %s9_s0, 16, %s11_s9, [#allocation1]  }
   0x3   :  { %46 = dma.done.wait [#allocation1], 16  }
   0x4   :  { %47 = vsyncadd [#allocation1], 4294967280  ;;  %v18_v0 = vld [vmem:[#allocation0] ss:$0 sm:$0xff] }
   0x5   :  { %19 = vst [vmem:[%s66_s1] sm:$0xf] %v18_v0 }
   0x6   :  { %20 = vsyncpa [#allocation1], 1 }

// kernel: tile.63
= control target key start
LH: loop header
LB: loop body
LE: loop exit
PB: predicated region body
PF: predicated region fallthrough
CT: control target
= control target key end

     0   :  { %s37_s8 = smov 8   ;;  %s38_s9 = smov 16   ;;  %vm7_vm0 = vcmask 64512   ;;  %vm13_vm1 = vcmask 261312   ;;  %vm19_vm2 = vcmask 195712   ;;  %vm25_vm3 = vcmask 130112   ;;  %s55_s0 = inlined_call_operand.vmem [shape: f32[4,8], index: 0, kind: input, shape index: {}]   ;;  %s56_s1 = inlined_call_operand.vmem [shape: f32[32,1], index: 1, kind: output, shape index: {}]  }
   0x1   :  { %v4_v0 = vld [vmem:[%s55_s0] sm:$0xf]  ;;  %s36_s0 = smov 24  }
   0x2   :  { %5 = vst [vmem:[#allocation1] sm:$0xf] %v4_v0 }
   0x9   :  { %v10_v1 = vld [vmem:[#allocation1 + $0x3] sm:$0x1]   ;;  %v22_v2 = vld [vmem:[#allocation1 + $0x1] sm:$0x1]   ;;  %v16_v3 = vld [vmem:[#allocation1 + $0x2] sm:$0x1]  }
   0xa   :  { %11 = vrot.lane.b32.xlu0 %v10_v1, %s36_s0  ;;  %23 = vrot.lane.b32.xlu1 %v22_v2, %s37_s8  ;;  %v6_v4 = vld [vmem:[#allocation1] sm:$0x1]  }
   0xb   :  { %8 = vst.msk [vmem:[#allocation0] sm:$0x1] %vm7_vm0, %v6_v4  }
  0x12   :  { %17 = vrot.lane.b32.xlu0 %v16_v3, %s38_s9 }
  0x7c   :  { %v12_v5 = vpop.permute.xlu0 %11   ;;  %v24_v6 = vpop.permute.xlu1 %23  }
  0x7d   :  { %14 = vst.msk [vmem:[#allocation0] sm:$0x1] %vm13_vm1, %v12_v5  }
  0x84   :  { %v18_v7 = vpop.permute.xlu0 %17  }
  0x85   :  { %20 = vst.msk [vmem:[#allocation0] sm:$0x1] %vm19_vm2, %v18_v7  }
  0x86   :  { %26 = vst.msk [vmem:[#allocation0] sm:$0x1] %vm25_vm3, %v24_v6  }
  0x8d   :  { %v29_v8 = vld [vmem:[#allocation0] sm:$0x1] }
  0x8e   :  { %32 = vst [vmem:[%s56_s1] sm:$0x1] %v29_v8 }

// kernel: tile.68
= control target key start
LH: loop header
LB: loop body
LE: loop exit
PB: predicated region body
PF: predicated region fallthrough
CT: control target
= control target key end

     0   :  { %2 = vsyncpa [#allocation1], 0  ;;  %s48_s8 = smov [#allocation0]   ;;  %s65_s0 = inlined_call_operand.hbm [shape: f32[4], index: 0, kind: input, shape index: {}]   ;;  %s66_s1 = inlined_call_operand.vmem [shape: f32[4,4], index: 1, kind: output, shape index: {}]  }
   0x1   :  { %s8_s0 = sshll.u32 %s65_s0, 4  ;;  %s10_s9 = sshll.u32 %s48_s8, 4  ;;  %s9_s0 = int_to_ptr.hbm [resolvable:$true] %s8_s0  ;;  %s11_s9 = int_to_ptr.vmem [resolvable:$true] %s10_s9 }
   0x2   :  { %13 = dma.hbm_to_vmem [thread:$0]  %s9_s0, 16, %s11_s9, [#allocation1]  }
   0x3   :  { %46 = dma.done.wait [#allocation1], 16  }
   0x4   :  { %47 = vsyncadd [#allocation1], 4294967280  ;;  %v18_v0 = vld [vmem:[#allocation0] ss:$0 sm:$0xff] }
   0x5   :  { %19 = vst [vmem:[%s66_s1] sm:$0xf] %v18_v0 }
   0x6   :  { %20 = vsyncpa [#allocation1], 1 }

// kernel: tile.73
= control target key start
LH: loop header
LB: loop body
LE: loop exit
PB: predicated region body
PF: predicated region fallthrough
CT: control target
= control target key end

     0   :  { %s37_s8 = smov 4   ;;  %s38_s9 = smov 8   ;;  %vm7_vm0 = vcmask 31744   ;;  %vm13_vm1 = vcmask 130144   ;;  %vm19_vm2 = vcmask 97344   ;;  %vm25_vm3 = vcmask 64544   ;;  %s55_s0 = inlined_call_operand.vmem [shape: f32[4,4], index: 0, kind: input, shape index: {}]   ;;  %s56_s1 = inlined_call_operand.vmem [shape: f32[16,1], index: 1, kind: output, shape index: {}]  }
   0x1   :  { %v4_v0 = vld [vmem:[%s55_s0] sm:$0xf]  ;;  %s36_s0 = smov 12  }
   0x2   :  { %5 = vst [vmem:[#allocation1] sm:$0xf] %v4_v0 }
   0x9   :  { %v10_v1 = vld [vmem:[#allocation1 + $0x3] sm:$0x1]   ;;  %v22_v2 = vld [vmem:[#allocation1 + $0x1] sm:$0x1]   ;;  %v16_v3 = vld [vmem:[#allocation1 + $0x2] sm:$0x1]  }
   0xa   :  { %11 = vrot.lane.b32.xlu0 %v10_v1, %s36_s0  ;;  %23 = vrot.lane.b32.xlu1 %v22_v2, %s37_s8  ;;  %v6_v4 = vld [vmem:[#allocation1] sm:$0x1]  }
   0xb   :  { %8 = vst.msk [vmem:[#allocation0] sm:$0x1] %vm7_vm0, %v6_v4  }
  0x12   :  { %17 = vrot.lane.b32.xlu0 %v16_v3, %s38_s9 }
  0x7c   :  { %v12_v5 = vpop.permute.xlu0 %11   ;;  %v24_v6 = vpop.permute.xlu1 %23  }
  0x7d   :  { %14 = vst.msk [vmem:[#allocation0] sm:$0x1] %vm13_vm1, %v12_v5  }
  0x84   :  { %v18_v7 = vpop.permute.xlu0 %17  }
  0x85   :  { %20 = vst.msk [vmem:[#allocation0] sm:$0x1] %vm19_vm2, %v18_v7  }
  0x86   :  { %26 = vst.msk [vmem:[#allocation0] sm:$0x1] %vm25_vm3, %v24_v6  }
  0x8d   :  { %v29_v8 = vld [vmem:[#allocation0] sm:$0x1] }
  0x8e   :  { %32 = vst [vmem:[%s56_s1] sm:$0x1] %v29_v8 }

// kernel: tile.78
= control target key start
LH: loop header
LB: loop body
LE: loop exit
PB: predicated region body
PF: predicated region fallthrough
CT: control target
= control target key end

     0   :  { %2 = vsyncpa [#allocation1], 0  ;;  %s48_s8 = smov [#allocation0]   ;;  %s65_s0 = inlined_call_operand.hbm [shape: f32[2], index: 0, kind: input, shape index: {}]   ;;  %s66_s1 = inlined_call_operand.vmem [shape: f32[4,2], index: 1, kind: output, shape index: {}]  }
   0x1   :  { %s8_s0 = sshll.u32 %s65_s0, 4  ;;  %s10_s9 = sshll.u32 %s48_s8, 4  ;;  %s9_s0 = int_to_ptr.hbm [resolvable:$true] %s8_s0  ;;  %s11_s9 = int_to_ptr.vmem [resolvable:$true] %s10_s9 }
   0x2   :  { %13 = dma.hbm_to_vmem [thread:$0]  %s9_s0, 16, %s11_s9, [#allocation1]  }
   0x3   :  { %46 = dma.done.wait [#allocation1], 16  }
   0x4   :  { %47 = vsyncadd [#allocation1], 4294967280  ;;  %v18_v0 = vld [vmem:[#allocation0] ss:$0 sm:$0xff] }
   0x5   :  { %19 = vst [vmem:[%s66_s1] sm:$0xf] %v18_v0 }
   0x6   :  { %20 = vsyncpa [#allocation1], 1 }

// kernel: tile.83
= control target key start
LH: loop header
LB: loop body
LE: loop exit
PB: predicated region body
PF: predicated region fallthrough
CT: control target
= control target key end

     0   :  { %s37_s8 = smov 2   ;;  %s38_s9 = smov 4   ;;  %vm7_vm0 = vcmask 15360   ;;  %vm13_vm1 = vcmask 64560   ;;  %vm19_vm2 = vcmask 48160   ;;  %vm25_vm3 = vcmask 31760   ;;  %s55_s0 = inlined_call_operand.vmem [shape: f32[4,2], index: 0, kind: input, shape index: {}]   ;;  %s56_s1 = inlined_call_operand.vmem [shape: f32[8,1], index: 1, kind: output, shape index: {}]  }
   0x1   :  { %v4_v0 = vld [vmem:[%s55_s0] sm:$0xf]  ;;  %s36_s0 = smov 6  }
   0x2   :  { %5 = vst [vmem:[#allocation1] sm:$0xf] %v4_v0 }
   0x9   :  { %v10_v1 = vld [vmem:[#allocation1 + $0x3] sm:$0x1]   ;;  %v22_v2 = vld [vmem:[#allocation1 + $0x1] sm:$0x1]   ;;  %v16_v3 = vld [vmem:[#allocation1 + $0x2] sm:$0x1]  }
   0xa   :  { %11 = vrot.lane.b32.xlu0 %v10_v1, %s36_s0  ;;  %23 = vrot.lane.b32.xlu1 %v22_v2, %s37_s8  ;;  %v6_v4 = vld [vmem:[#allocation1] sm:$0x1]  }
   0xb   :  { %8 = vst.msk [vmem:[#allocation0] sm:$0x1] %vm7_vm0, %v6_v4  }
  0x12   :  { %17 = vrot.lane.b32.xlu0 %v16_v3, %s38_s9 }
  0x7c   :  { %v12_v5 = vpop.permute.xlu0 %11   ;;  %v24_v6 = vpop.permute.xlu1 %23  }
  0x7d   :  { %14 = vst.msk [vmem:[#allocation0] sm:$0x1] %vm13_vm1, %v12_v5  }
  0x84   :  { %v18_v7 = vpop.permute.xlu0 %17  }
  0x85   :  { %20 = vst.msk [vmem:[#allocation0] sm:$0x1] %vm19_vm2, %v18_v7  }
  0x86   :  { %26 = vst.msk [vmem:[#allocation0] sm:$0x1] %vm25_vm3, %v24_v6  }
  0x8d   :  { %v29_v8 = vld [vmem:[#allocation0] sm:$0x1] }
  0x8e   :  { %32 = vst [vmem:[%s56_s1] sm:$0x1] %v29_v8 }

// kernel: tile.88
= control target key start
LH: loop header
LB: loop body
LE: loop exit
PB: predicated region body
PF: predicated region fallthrough
CT: control target
= control target key end

     0   :  { %2 = vsyncpa [#allocation1], 0  ;;  %s48_s8 = smov [#allocation0]   ;;  %s65_s0 = inlined_call_operand.hbm [shape: f32[3], index: 0, kind: input, shape index: {}]   ;;  %s66_s1 = inlined_call_operand.vmem [shape: f32[4,3], index: 1, kind: output, shape index: {}]  }
   0x1   :  { %s8_s0 = sshll.u32 %s65_s0, 4  ;;  %s10_s9 = sshll.u32 %s48_s8, 4  ;;  %s9_s0 = int_to_ptr.hbm [resolvable:$true] %s8_s0  ;;  %s11_s9 = int_to_ptr.vmem [resolvable:$true] %s10_s9 }
   0x2   :  { %13 = dma.hbm_to_vmem [thread:$0]  %s9_s0, 16, %s11_s9, [#allocation1]  }
   0x3   :  { %46 = dma.done.wait [#allocation1], 16  }
   0x4   :  { %47 = vsyncadd [#allocation1], 4294967280  ;;  %v18_v0 = vld [vmem:[#allocation0] ss:$0 sm:$0xff] }
   0x5   :  { %19 = vst [vmem:[%s66_s1] sm:$0xf] %v18_v0 }
   0x6   :  { %20 = vsyncpa [#allocation1], 1 }

// kernel: tile.0
= control target key start
LH: loop header
LB: loop body
LE: loop exit
PB: predicated region body
PF: predicated region fallthrough
CT: control target
= control target key end

     0   :  { %s26_s8 = smov 126   ;;  %vm7_vm0 = vcmask 7168   ;;  %s49_s0 = inlined_call_operand.vmem [shape: f32[4,3], index: 0, kind: input, shape index: {}]   ;;  %s50_s1 = inlined_call_operand.vmem [shape: f32[12,1], index: 1, kind: output, shape index: {}]  }
   0x1   :  { %v4_v0 = vld [vmem:[%s49_s0] sm:$0xf]  ;;  %s25_s0 = smov 127  }
   0x2   :  { %5 = vst [vmem:[#allocation0] sm:$0xf] %v4_v0 }
   0x9   :  { %v9_v1 = vld [vmem:[#allocation0] sm:$0xf]  }
   0xa   :  { %10 = vrot.lane.b32.xlu0 %v9_v1, %s25_s0  ;;  %v15_v2 = vld [vmem:[#allocation0] sm:$0xf]  }
   0xb   :  { %v6_v3 = vld [vmem:[#allocation0] sm:$0xf]  }
   0xc   :  { %8 = vst.msk [vmem:[%s50_s1] ss:$3 sm:$0xf] %vm7_vm0, %v6_v3  }
  0x12   :  { %16 = vrot.lane.b32.xlu0 %v15_v2, %s26_s8 }
  0x7c   :  { %v11_v4 = vpop.permute.xlu0 %10  }
  0x7d   :  { %21 = vst.msk [vmem:[%s50_s1 + $0x1] ss:$3 sm:$0xf] %vm7_vm0, %v11_v4  }
  0x84   :  { %v17_v5 = vpop.permute.xlu0 %16  }
  0x85   :  { %22 = vst.msk [vmem:[%s50_s1 + $0x2] ss:$3 sm:$0xf] %vm7_vm0, %v17_v5  }

// kernel: generator_forward.5
= control target key start
LH: loop header
LB: loop body
LE: loop exit
PB: predicated region body
PF: predicated region fallthrough
CT: control target
= control target key end

     0   :  { %vm62_vm0 = vcmask 261120   ;;  %v210_v38 = vlaneseq  ;;  %vm256_vm7 = vcmask 31744   ;;  %s847_s5 = smov 1   ;;  %s1276_s1 = inlined_call_operand.vmem [shape: bf16[32,128], index: 1, kind: input, shape index: {}]   ;;  %s1277_s2 = inlined_call_operand.vmem [shape: f32[128,4], index: 2, kind: input, shape index: {}]   ;;  %s1278_s0 = inlined_call_operand.vmem [shape: bf16[64,32], index: 0, kind: input, shape index: {}]   ;;  %s1279_s3 = inlined_call_operand.vmem [shape: f32[64,2], index: 3, kind: input, shape index: {}]   ;;  %s1280_s4 = inlined_call_operand.vmem [shape: bf16[64,128], index: 4, kind: output, shape index: {}]  }
   0x1   :  { %v794_v0 = vld [vmem:[%s1276_s1 + $0x8] sm:$0xff]  ;;  %v793_v1 = vld [vmem:[%s1276_s1] sm:$0xff]  ;;  %v119_v2 = vld [vmem:[%s1277_s2 + $0x78] sm:$0xff] }
   0x2   :  { %81 = vmatpush.bf16.msra.mxu0 %v794_v0  ;;  %818 = vmatpush.bf16.msra.mxu3 %v794_v0  ;;  %v118_v3 = vld [vmem:[%s1277_s2 + $0x70] sm:$0xff]  ;;  %v117_v4 = vld [vmem:[%s1277_s2 + $0x68] sm:$0xff]  ;;  %v789_v5 = vld [vmem:[%s1278_s0] sm:$0xff]  ;;  %v985_v39 = vand.u32 127, %v210_v38  ;;  %v987_v40 = vshrl.u32 %v210_v38, 7 }
   0x3   :  { %120 = vmatpush.msra.mxu1 %v119_v2  ;;  %169 = vmatpush.msra.mxu2 %v119_v2  ;;  %v791_v6 = vld [vmem:[%s1278_s0 + $0x10] sm:$0xff]  ;;  %v116_v7 = vld [vmem:[%s1277_s2 + $0x60] sm:$0xff]  ;;  %v115_v8 = vld [vmem:[%s1277_s2 + $0x58] sm:$0xff] }
   0x4   :  { %v114_v9 = vld [vmem:[%s1277_s2 + $0x50] sm:$0xff]  ;;  %v113_v10 = vld [vmem:[%s1277_s2 + $0x48] sm:$0xff]  ;;  %v112_v11 = vld [vmem:[%s1277_s2 + $0x40] sm:$0xff]  ;;  %v230_v41 = vadd.s32 1, %v985_v39  ;;  %v991_v42 = vadd.s32 8, %v987_v40  ;;  %v996_v44 = vmul.u32 16, %v985_v39 }
   0x5   :  { %121 = vmatpush.msra.mxu1 %v118_v3  ;;  %170 = vmatpush.msra.mxu2 %v118_v3  ;;  %v111_v12 = vld [vmem:[%s1277_s2 + $0x38] sm:$0xff]  ;;  %v110_v13 = vld [vmem:[%s1277_s2 + $0x30] sm:$0xff]  ;;  %v790_v14 = vld [vmem:[%s1278_s0 + $0x8] sm:$0xff]  ;;  %v1013_v47 = vadd.s32 16, %v987_v40  ;;  %v1036_v56 = vadd.s32 24, %v987_v40  ;;  %v1055_v0 = vadd.s32 32, %v987_v40 }
   0x6   :  { %82 = vmatpush.bf16.msra.mxu0 %v793_v1  ;;  %819 = vmatpush.bf16.msra.mxu3 %v793_v1  ;;  %v792_v15 = vld [vmem:[%s1278_s0 + $0x18] sm:$0xff]  ;;  %v109_v16 = vld [vmem:[%s1277_s2 + $0x28] sm:$0xff]  ;;  %v108_v17 = vld [vmem:[%s1277_s2 + $0x20] sm:$0xff]  ;;  %v998_v45 = vmul.u32 16, %v230_v41  ;;  %vm223_vm1 = vcmp.ge.s32.totalorder %v991_v42, %v996_v44  ;;  %vm222_vm3 = vcmp.ge.s32.totalorder %v987_v40, %v996_v44  ;;  %v313_v63 = vand.u32 15, %v987_v40 }
   0x7   :  { %122 = vmatpush.msra.mxu1 %v117_v4  ;;  %171 = vmatpush.msra.mxu2 %v117_v4  ;;  %v107_v18 = vld [vmem:[%s1277_s2 + $0x18] sm:$0xff]  ;;  %v106_v19 = vld [vmem:[%s1277_s2 + $0x10] sm:$0xff]  ;;  %v105_v20 = vld [vmem:[%s1277_s2 + $0x8] sm:$0xff]  ;;  %vm224_vm8 = vcmp.ge.s32.totalorder %v1013_v47, %v996_v44  ;;  %vm225_vm11 = vcmp.ge.s32.totalorder %v1036_v56, %v996_v44  ;;  %vm226_vm14 = vcmp.ge.s32.totalorder %v1055_v0, %v996_v44 }
   0x8   :  { %v104_v21 = vld [vmem:[%s1277_s2] sm:$0xff]  ;;  %vm233_vm2 = vcmp.lt.s32.totalorder %v991_v42, %v998_v45  ;;  %vm232_vm4 = vcmp.lt.s32.totalorder %v987_v40, %v998_v45  ;;  %vm234_vm9 = vcmp.lt.s32.totalorder %v1013_v47, %v998_v45  ;;  %vm235_vm12 = vcmp.lt.s32.totalorder %v1036_v56, %v998_v45 }
   0x9   :  { %769 = vmatmul.msk.bf16.vlgmr.msra.gmra.mxu0 %vm62_vm0, %v789_v5  ;;  %771 = vmatmul.msk.bf16.vlgmr.msra.gmra.mxu3 %vm62_vm0, %v791_v6  ;;  %vm1008_vm5 = vmand %vm223_vm1, %vm233_vm2  ;;  %vm236_vm15 = vcmp.lt.s32.totalorder %v1055_v0, %v998_v45  ;;  %v1069_v6 = vadd.s32 40, %v987_v40  ;;  %v846_v5 = vmov 0.0  }
   0xa   :  { %123 = vmatpush.msra.mxu1 %v116_v7  ;;  %172 = vmatpush.msra.mxu2 %v116_v7  ;;  %vm1015_vm6 = vmand %vm222_vm3, %vm232_vm4 }
   0xb   :  { %vm1031_vm10 = vmand %vm224_vm8, %vm234_vm9  ;;  %vm227_vm1 = vcmp.ge.s32.totalorder %v1069_v6, %v996_v44  ;;  %vm237_vm2 = vcmp.lt.s32.totalorder %v1069_v6, %v998_v45 }
   0xc   :  { %124 = vmatpush.msra.mxu1 %v115_v8  ;;  %173 = vmatpush.msra.mxu2 %v115_v8  ;;  %vm1050_vm13 = vmand %vm225_vm11, %vm235_vm12 }
   0xd   :  { %vm1078_vm3 = vmand %vm227_vm1, %vm237_vm2 }
   0xe   :  { %125 = vmatpush.msra.mxu1 %v114_v9  ;;  %174 = vmatpush.msra.mxu2 %v114_v9 }
  0x10   :  { %126 = vmatpush.msra.mxu1 %v113_v10  ;;  %175 = vmatpush.msra.mxu2 %v113_v10 }
  0x12   :  { %127 = vmatpush.msra.mxu1 %v112_v11  ;;  %176 = vmatpush.msra.mxu2 %v112_v11  ;;  %v315_v11 = vand.u32 15, %v1013_v47  ;;  %v317_v47 = vand.u32 15, %v1055_v0 }
  0x14   :  { %128 = vmatpush.msra.mxu1 %v111_v12  ;;  %177 = vmatpush.msra.mxu2 %v111_v12  ;;  %v1083_v12 = vadd.s32 48, %v987_v40 }
  0x16   :  { %129 = vmatpush.msra.mxu1 %v110_v13  ;;  %178 = vmatpush.msra.mxu2 %v110_v13  ;;  %vm228_vm4 = vcmp.ge.s32.totalorder %v1083_v12, %v996_v44 }
  0x18   :  { %130 = vmatpush.msra.mxu1 %v109_v16  ;;  %179 = vmatpush.msra.mxu2 %v109_v16 }
  0x19   :  { %770 = vmatmul.msk.bf16.gmra.mxu0 %vm62_vm0, %v790_v14  ;;  %772 = vmatmul.msk.bf16.gmra.mxu3 %vm62_vm0, %v792_v15  ;;  %vm1064_vm0 = vmand %vm226_vm14, %vm236_vm15 }
  0x1a   :  { %131 = vmatpush.msra.mxu1 %v108_v17  ;;  %180 = vmatpush.msra.mxu2 %v108_v17 }
  0x1c   :  { %132 = vmatpush.msra.mxu1 %v107_v18  ;;  %181 = vmatpush.msra.mxu2 %v107_v18 }
  0x1e   :  { %133 = vmatpush.msra.mxu1 %v106_v19  ;;  %182 = vmatpush.msra.mxu2 %v106_v19  ;;  %v1100_v19 = vadd.s32 56, %v987_v40 }
  0x20   :  { %134 = vmatpush.msra.mxu1 %v105_v20  ;;  %183 = vmatpush.msra.mxu2 %v105_v20  ;;  %vm229_vm9 = vcmp.ge.s32.totalorder %v1100_v19, %v996_v44 }
  0x22   :  { %135 = vmatpush.msra.mxu1 %v104_v21  ;;  %184 = vmatpush.msra.mxu2 %v104_v21 }
  0x86   :  { %v945_v22 = vpop.f32.mrf.mxu0 }
  0x87   :  { %136 = vmatmul.f32.vlgmr.msra.gmra.mxu1 %v945_v22  ;;  %v161_v23 = vmul.f32 %v945_v22, %v945_v22 }
  0x89   :  { %185 = vmatmul.f32.vlgmr.msra.gmra.mxu2 %v161_v23 }
  0x8c   :  { %v962_v29 = vpop.f32.mrf.mxu3 }
  0x8d   :  { %v165_v31 = vmul.f32 %v962_v29, %v962_v29 }
  0x8e   :  { %v950_v24 = vpop.f32.mrf.mxu0 }
  0x8f   :  { %139 = vmatmul.f32.gmra.mxu1 %v950_v24  ;;  %v162_v25 = vmul.f32 %v950_v24, %v950_v24 }
  0x91   :  { %188 = vmatmul.f32.gmra.mxu2 %v162_v25 }
  0x94   :  { %v970_v32 = vpop.f32.mrf.mxu3 }
  0x95   :  { %v166_v33 = vmul.f32 %v970_v32, %v970_v32 }
  0x96   :  { %v955_v26 = vpop.f32.mrf.mxu0 }
  0x97   :  { %142 = vmatmul.f32.gmra.mxu1 %v955_v26  ;;  %v163_v27 = vmul.f32 %v955_v26, %v955_v26 }
  0x99   :  { %191 = vmatmul.f32.gmra.mxu2 %v163_v27 }
  0x9c   :  { %v975_v34 = vpop.f32.mrf.mxu3 }
  0x9d   :  { %v167_v35 = vmul.f32 %v975_v34, %v975_v34 }
  0x9e   :  { %v960_v28 = vpop.f32.mrf.mxu0 }
  0x9f   :  { %145 = vmatmul.f32.gmra.mxu1 %v960_v28  ;;  %v164_v30 = vmul.f32 %v960_v28, %v960_v28 }
  0xa1   :  { %194 = vmatmul.f32.gmra.mxu2 %v164_v30 }
  0xa4   :  { %v980_v36 = vpop.f32.mrf.mxu3 }
  0xa5   :  { %v168_v37 = vmul.f32 %v980_v36, %v980_v36 }
  0xa7   :  { %148 = vmatmul.f32.gmra.mxu1 %v962_v29 }
  0xa9   :  { %197 = vmatmul.f32.gmra.mxu2 %v165_v31 }
  0xaf   :  { %151 = vmatmul.f32.gmra.mxu1 %v970_v32 }
  0xb1   :  { %200 = vmatmul.f32.gmra.mxu2 %v166_v33 }
  0xb7   :  { %154 = vmatmul.f32.gmra.mxu1 %v975_v34 }
  0xb9   :  { %203 = vmatmul.f32.gmra.mxu2 %v167_v35 }
  0xbf   :  { %157 = vmatmul.f32.gmra.mxu1 %v980_v36 }
  0xc1   :  { %206 = vmatmul.f32.gmra.mxu2 %v168_v37 }
 0x104   :  { %v993_v43 = vpop.f32.mrf.mxu1 }
 0x105   :  { %v248_v18 = vsel %vm1015_vm6, %v993_v43, 0.0 }
 0x106   :  { %v257_v25 = vsel %vm256_vm7, %v248_v18, 0.0  ;;  %v318_v18 = vand.u32 15, %v1069_v6 }
 0x10c   :  { %v140_v49 = vpop.f32.mrf.mxu1  ;;  %v186_v50 = vpop.f32.mrf.mxu2 }
 0x10d   :  { %v249_v51 = vsel %vm1008_vm5, %v140_v49, 0.0  ;;  %v281_v52 = vsel %vm1015_vm6, %v186_v50, 0.0  ;;  %vm239_vm6 = vcmp.lt.s32.totalorder %v1100_v19, %v998_v45 }
 0x10e   :  { %v260_v53 = vsel %vm256_vm7, %v249_v51, 0.0  ;;  %v1025_v54 = vsel %vm256_vm7, %v281_v52, 0.0  ;;  %vm247_vm11 = vmand %vm229_vm9, %vm239_vm6 }
 0x10f   :  { %261 = vadd.xlane.f32.xlu2 %v260_v53 }
 0x114   :  { %v143_v57 = vpop.f32.mrf.mxu1  ;;  %v189_v58 = vpop.f32.mrf.mxu2 }
 0x115   :  { %v250_v59 = vsel %vm1031_vm10, %v143_v57, 0.0  ;;  %v282_v60 = vsel %vm1008_vm5, %v189_v58, 0.0  ;;  %vm238_vm5 = vcmp.lt.s32.totalorder %v1083_v12, %v998_v45 }
 0x116   :  { %v263_v61 = vsel %vm256_vm7, %v250_v59, 0.0  ;;  %v1044_v62 = vsel %vm256_vm7, %v282_v60, 0.0  ;;  %vm1092_vm8 = vmand %vm228_vm4, %vm238_vm5 }
 0x117   :  { %264 = vadd.xlane.f32.xlu0 %v263_v61 }
 0x11c   :  { %v146_v1 = vpop.f32.mrf.mxu1  ;;  %v192_v2 = vpop.f32.mrf.mxu2 }
 0x11d   :  { %v251_v3 = vsel %vm1050_vm13, %v146_v1, 0.0  ;;  %v283_v41 = vsel %vm1031_vm10, %v192_v2, 0.0  ;;  %vm338_vm10 = vcmask 523264  }
 0x11e   :  { %v266_v4 = vsel %vm256_vm7, %v251_v3, 0.0  ;;  %v295_v48 = vsel %vm256_vm7, %v283_v41, 0.0  ;;  %v321_v3 = vand.u32 15, %v985_v39 }
 0x11f   :  { %267 = vadd.xlane.f32.xlu2 %v266_v4 }
 0x120   :  { %vm326_vm15 = vcmp.eq.s32.totalorder %v317_v47, %v321_v3 }
 0x121   :  { %v334_v17 = vsel %vm326_vm15, 0.03125, %v846_v5 }
 0x124   :  { %v149_v7 = vpop.f32.mrf.mxu1  ;;  %v195_v8 = vpop.f32.mrf.mxu2 }
 0x125   :  { %v252_v9 = vsel %vm1064_vm0, %v149_v7, 0.0  ;;  %v284_v51 = vsel %vm1050_vm13, %v195_v8, 0.0  ;;  %v314_v8 = vand.u32 15, %v991_v42  ;;  %vm324_vm13 = vcmp.eq.s32.totalorder %v315_v11, %v321_v3 }
 0x126   :  { %v269_v10 = vsel %vm256_vm7, %v252_v9, 0.0  ;;  %v298_v53 = vsel %vm256_vm7, %v284_v51, 0.0  ;;  %v332_v42 = vsel %vm324_vm13, 0.03125, %v846_v5 }
 0x127   :  { %270 = vadd.xlane.f32.xlu1 %v269_v10  ;;  %vm323_vm12 = vcmp.eq.s32.totalorder %v314_v8, %v321_v3 }
 0x128   :  { %v331_v10 = vsel %vm323_vm12, 0.03125, %v846_v5 }
 0x12c   :  { %v152_v13 = vpop.f32.mrf.mxu1  ;;  %v198_v14 = vpop.f32.mrf.mxu2 }
 0x12d   :  { %v253_v15 = vsel %vm1078_vm3, %v152_v13, 0.0  ;;  %v285_v50 = vsel %vm1064_vm0, %v198_v14, 0.0  ;;  %vm327_vm0 = vcmp.eq.s32.totalorder %v318_v18, %v321_v3 }
 0x12e   :  { %v272_v16 = vsel %vm256_vm7, %v253_v15, 0.0  ;;  %v301_v52 = vsel %vm256_vm7, %v285_v50, 0.0  ;;  %v316_v15 = vand.u32 15, %v1036_v56  ;;  %v335_v56 = vsel %vm327_vm0, 0.03125, %v846_v5 }
 0x12f   :  { %273 = vadd.xlane.f32.xlu1 %v272_v16 }
 0x130   :  { %vm325_vm14 = vcmp.eq.s32.totalorder %v316_v15, %v321_v3 }
 0x131   :  { %v333_v16 = vsel %vm325_vm14, 0.03125, %v846_v5 }
 0x134   :  { %v155_v20 = vpop.f32.mrf.mxu1  ;;  %v201_v21 = vpop.f32.mrf.mxu2 }
 0x135   :  { %v254_v23 = vsel %vm1092_vm8, %v155_v20, 0.0  ;;  %v286_v43 = vsel %vm1078_vm3, %v201_v21, 0.0  ;;  %v319_v20 = vand.u32 15, %v1083_v12  ;;  %v320_v21 = vand.u32 15, %v1100_v19 }
 0x136   :  { %v275_v27 = vsel %vm256_vm7, %v254_v23, 0.0  ;;  %v304_v49 = vsel %vm256_vm7, %v286_v43, 0.0 }
 0x137   :  { %258 = vadd.xlane.f32.xlu1 %v257_v25  ;;  %276 = vadd.xlane.f32.xlu0 %v275_v27  ;;  %vm328_vm1 = vcmp.eq.s32.totalorder %v319_v20, %v321_v3  ;;  %vm329_vm2 = vcmp.eq.s32.totalorder %v320_v21, %v321_v3 }
 0x138   :  { %v336_v0 = vsel %vm328_vm1, 0.03125, %v846_v5  ;;  %v337_v6 = vsel %vm329_vm2, 0.03125, %v846_v5 }
 0x13c   :  { %v158_v30 = vpop.f32.mrf.mxu1  ;;  %v204_v31 = vpop.f32.mrf.mxu2 }
 0x13d   :  { %v255_v33 = vsel %vm247_vm11, %v158_v30, 0.0  ;;  %v287_v35 = vsel %vm1092_vm8, %v204_v31, 0.0 }
 0x13e   :  { %v307_v37 = vsel %vm256_vm7, %v287_v35, 0.0  ;;  %v278_v38 = vsel %vm256_vm7, %v255_v33, 0.0 }
 0x13f   :  { %308 = vadd.xlane.f32.xlu1 %v307_v37  ;;  %279 = vadd.xlane.f32.xlu0 %v278_v38 }
 0x144   :  { %v207_v44 = vpop.f32.mrf.mxu2 }
 0x145   :  { %v288_v45 = vsel %vm247_vm11, %v207_v44, 0.0 }
 0x146   :  { %v310_v46 = vsel %vm256_vm7, %v288_v45, 0.0  ;;  %vm322_vm7 = vcmp.eq.s32.totalorder %v313_v63, %v321_v3 }
 0x147   :  { %311 = vadd.xlane.f32.xlu2 %v310_v46  ;;  %296 = vadd.xlane.f32.xlu1 %v295_v48  ;;  %v330_v7 = vsel %vm322_vm7, 0.03125, %v846_v5 }
 0x148   :  { %305 = vadd.xlane.f32.xlu0 %v304_v49 }
 0x14f   :  { %302 = vadd.xlane.f32.xlu2 %v301_v52 }
 0x150   :  { %299 = vadd.xlane.f32.xlu0 %v298_v53 }
 0x157   :  { %293 = vadd.xlane.f32.xlu2 %v1044_v62 }
 0x158   :  { %290 = vadd.xlane.f32.xlu0 %v1025_v54 }
 0x182   :  { %v262_v59 = vpop.xlane.xlu2 %261 }
 0x18a   :  { %v265_v57 = vpop.xlane.xlu0 %264 }
 0x192   :  { %v268_v61 = vpop.xlane.xlu2 %267 }
 0x19a   :  { %v271_v55 = vpop.xlane.xlu1 %270 }
 0x1a2   :  { %v274_v58 = vpop.xlane.xlu1 %273 }
 0x1aa   :  { %v277_v60 = vpop.xlane.xlu0 %276  ;;  %v259_v1 = vpop.xlane.xlu1 %258 }
 0x1b2   :  { %v280_v2 = vpop.xlane.xlu0 %279  ;;  %v309_v54 = vpop.xlane.xlu1 %308 }
 0x1b3   :  { %371 = vmatpush.msrb.mxu3 %v280_v2 }
 0x1b5   :  { %372 = vmatpush.msrb.mxu3 %v277_v60 }
 0x1b7   :  { %373 = vmatpush.msrb.mxu3 %v274_v58 }
 0x1b9   :  { %374 = vmatpush.msrb.mxu3 %v271_v55 }
 0x1ba   :  { %v312_v4 = vpop.xlane.xlu2 %311  ;;  %v297_v9 = vpop.xlane.xlu1 %296 }
 0x1bb   :  { %v306_v62 = vpop.xlane.xlu0 %305  ;;  %375 = vmatpush.msrb.mxu3 %v268_v61  ;;  %412 = vmatpush.msrb.mxu0 %v312_v4 }
 0x1bd   :  { %376 = vmatpush.msrb.mxu3 %v265_v57  ;;  %413 = vmatpush.msrb.mxu0 %v309_v54 }
 0x1bf   :  { %377 = vmatpush.msrb.mxu3 %v262_v59  ;;  %414 = vmatpush.msrb.mxu0 %v306_v62 }
 0x1c1   :  { %378 = vmatpush.msrb.mxu3 %v259_v1  ;;  %v1165_v1 = vld [vmem:[%s1279_s3] sm:$0xff] }
 0x1c2   :  { %v303_v40 = vpop.xlane.xlu2 %302  ;;  %773 = vmatmul.msk.f32.vlgmr.msrb.gmra.mxu3 %vm338_vm10, %v330_v7 }
 0x1c3   :  { %v300_v39 = vpop.xlane.xlu0 %299  ;;  %415 = vmatpush.msrb.mxu0 %v303_v40 }
 0x1c5   :  { %416 = vmatpush.msrb.mxu0 %v300_v39 }
 0x1c7   :  { %417 = vmatpush.msrb.mxu0 %v297_v9 }
 0x1ca   :  { %v294_v13 = vpop.xlane.xlu2 %293  ;;  %774 = vmatmul.msk.f32.gmra.mxu3 %vm338_vm10, %v331_v10 }
 0x1cb   :  { %418 = vmatpush.msrb.mxu0 %v294_v13  ;;  %v291_v14 = vpop.xlane.xlu0 %290 }
 0x1cd   :  { %419 = vmatpush.msrb.mxu0 %v291_v14  ;;  %v1179_v14 = vld [vmem:[%s1279_s3 + $0x8] sm:$0xff] }
 0x1ce   :  { %781 = vmatmul.msk.f32.vlgmr.msrb.gmra.mxu0 %vm338_vm10, %v330_v7 }
 0x1d2   :  { %775 = vmatmul.msk.f32.gmra.mxu3 %vm338_vm10, %v332_v42 }
 0x1d6   :  { %782 = vmatmul.msk.f32.gmra.mxu0 %vm338_vm10, %v331_v10 }
 0x1da   :  { %776 = vmatmul.msk.f32.gmra.mxu3 %vm338_vm10, %v333_v16 }
 0x1de   :  { %783 = vmatmul.msk.f32.gmra.mxu0 %vm338_vm10, %v332_v42 }
 0x1e2   :  { %777 = vmatmul.msk.f32.gmra.mxu3 %vm338_vm10, %v334_v17 }
 0x1e6   :  { %784 = vmatmul.msk.f32.gmra.mxu0 %vm338_vm10, %v333_v16 }
 0x1ea   :  { %778 = vmatmul.msk.f32.gmra.mxu3 %vm338_vm10, %v335_v56 }
 0x1ee   :  { %785 = vmatmul.msk.f32.gmra.mxu0 %vm338_vm10, %v334_v17 }
 0x1f2   :  { %779 = vmatmul.msk.f32.gmra.mxu3 %vm338_vm10, %v336_v0 }
 0x1f6   :  { %786 = vmatmul.msk.f32.gmra.mxu0 %vm338_vm10, %v335_v56 }
 0x1fa   :  { %780 = vmatmul.msk.f32.gmra.mxu3 %vm338_vm10, %v337_v6 }
 0x1fe   :  { %787 = vmatmul.msk.f32.gmra.mxu0 %vm338_vm10, %v336_v0 }
 0x206   :  { %788 = vmatmul.msk.f32.gmra.mxu0 %vm338_vm10, %v337_v6 }
 0x245   :  { %v380_v12 = vpop.f32.mrf.mxu3 }
 0x246   :  { %v445_v23 = vmul.f32 %v380_v12, %v380_v12 }
 0x24b   :  { %v421_v25 = vpop.f32.mrf.mxu0 }
 0x24c   :  { %v453_v27 = vsub.f32 %v421_v25, %v445_v23 }
 0x24d   :  { %v383_v30 = vpop.f32.mrf.mxu3 }
 0x24e   :  { %v461_v31 = vmax.f32 %v453_v27, 0.0  ;;  %v446_v19 = vmul.f32 %v383_v30, %v383_v30 }
 0x250   :  { %v477_v33 = vadd.f32 1e-05, %v461_v31  ;;  %v1193_v31 = vld [vmem:[%s1279_s3 + $0x10] sm:$0xff] }
 0x252   :  { %830 = vrsqrt.f32 %v477_v33  ;;  %vm491_vm4 = vweird.f32 %v477_v33 }
 0x253   :  { %v424_v35 = vpop.f32.mrf.mxu0 }
 0x254   :  { %v454_v37 = vsub.f32 %v424_v35, %v446_v19 }
 0x255   :  { %v1154_v38 = vpop.f32.mrf.mxu3 }
 0x256   :  { %v462_v41 = vmax.f32 %v454_v37, 0.0  ;;  %v447_v45 = vmul.f32 %v1154_v38, %v1154_v38 }
 0x258   :  { %v831_v43 = vpop.eup %830  ;;  %v478_v44 = vadd.f32 1e-05, %v462_v41 }
 0x259   :  { %v486_v46 = vmul.f32 %v831_v43, %v477_v33  ;;  %vm492_vm3 = vweird.f32 %v831_v43 }
 0x25a   :  { %832 = vrsqrt.f32 %v478_v44  ;;  %vm493_vm5 = vmor %vm491_vm4, %vm492_vm3  ;;  %vm501_vm9 = vweird.f32 %v478_v44 }
 0x25b   :  { %v487_v48 = vmul.f32 %v831_v43, %v486_v46  ;;  %v427_v49 = vpop.f32.mrf.mxu0 }
 0x25c   :  { %v455_v50 = vsub.f32 %v427_v49, %v447_v45 }
 0x25d   :  { %v488_v51 = vmul.f32 0.5, %v487_v48  ;;  %v1158_v52 = vpop.f32.mrf.mxu3 }
 0x25e   :  { %v463_v53 = vmax.f32 %v455_v50, 0.0  ;;  %v448_v59 = vmul.f32 %v1158_v52, %v1158_v52 }
 0x25f   :  { %v489_v55 = vsub.f32 1.5, %v488_v51  ;;  %v848_v51 = vmov 0  }
 0x260   :  { %v833_v57 = vpop.eup %832  ;;  %v479_v58 = vadd.f32 1e-05, %v463_v53  ;;  %825 = vset.pattern.permute.xlu2 %v848_v51  ;;  %824 = vset.pattern.permute.xlu0 %v848_v51 }
 0x261   :  { %v490_v60 = vmul.f32 %v831_v43, %v489_v55  ;;  %v496_v61 = vmul.f32 %v833_v57, %v478_v44  ;;  %vm502_vm8 = vweird.f32 %v833_v57  ;;  %826 = vset.pattern.permute.xlu1 %v848_v51 }
 0x262   :  { %834 = vrsqrt.f32 %v479_v58  ;;  %vm503_vm6 = vmor %vm501_vm9, %vm502_vm8  ;;  %vm511_vm7 = vweird.f32 %v479_v58 }
 0x263   :  { %v497_v2 = vmul.f32 %v833_v57, %v496_v61  ;;  %v430_v63 = vpop.f32.mrf.mxu0  ;;  %v494_v3 = vsel %vm493_vm5, %v831_v43, %v490_v60 }
 0x264   :  { %v456_v4 = vsub.f32 %v430_v63, %v448_v59  ;;  %v1168_v62 = vmul.f32 %v494_v3, %v1165_v1 }
 0x265   :  { %v498_v54 = vmul.f32 0.5, %v497_v2  ;;  %v1170_v5 = vpop.f32.mrf.mxu3 }
 0x266   :  { %v464_v7 = vmax.f32 %v456_v4, 0.0  ;;  %v573_v8 = vmul.f32 %v1168_v62, %v380_v12  ;;  %v449_v10 = vmul.f32 %v1170_v5, %v1170_v5 }
 0x267   :  { %v499_v40 = vsub.f32 1.5, %v498_v54 }
 0x268   :  { %v835_v39 = vpop.eup %834  ;;  %v480_v9 = vadd.f32 1e-05, %v464_v7  ;;  %589 = vrot.lane.b32.xlu1 %v573_v8, %s847_s5 }
 0x269   :  { %v500_v11 = vmul.f32 %v833_v57, %v499_v40  ;;  %v506_v13 = vmul.f32 %v835_v39, %v479_v58  ;;  %vm512_vm11 = vweird.f32 %v835_v39 }
 0x26a   :  { %836 = vrsqrt.f32 %v480_v9  ;;  %vm513_vm10 = vmor %vm511_vm7, %vm512_vm11  ;;  %vm521_vm13 = vweird.f32 %v480_v9 }
 0x26b   :  { %v507_v42 = vmul.f32 %v835_v39, %v506_v13  ;;  %v433_v15 = vpop.f32.mrf.mxu0  ;;  %v504_v16 = vsel %vm503_vm6, %v833_v57, %v500_v11  ;;  %v1208_v57 = vld [vmem:[%s1279_s3 + $0x18] sm:$0xff] }
 0x26c   :  { %v457_v47 = vsub.f32 %v433_v15, %v449_v10  ;;  %v1182_v17 = vmul.f32 %v504_v16, %v1179_v14  ;;  %v1223_v10 = vld [vmem:[%s1279_s3 + $0x20] sm:$0xff] }
 0x26d   :  { %v508_v18 = vmul.f32 0.5, %v507_v42  ;;  %v1184_v56 = vpop.f32.mrf.mxu3 }
 0x26e   :  { %v465_v20 = vmax.f32 %v457_v47, 0.0  ;;  %v574_v0 = vmul.f32 %v1182_v17, %v383_v30  ;;  %v450_v23 = vmul.f32 %v1184_v56, %v1184_v56 }
 0x26f   :  { %v509_v21 = vsub.f32 1.5, %v508_v18 }
 0x270   :  { %v837_v6 = vpop.eup %836  ;;  %v481_v12 = vadd.f32 1e-05, %v465_v20  ;;  %591 = vrot.lane.b32.xlu2 %v574_v0, %s847_s5 }
 0x271   :  { %v510_v25 = vmul.f32 %v835_v39, %v509_v21  ;;  %v516_v27 = vmul.f32 %v837_v6, %v480_v9  ;;  %vm522_vm12 = vweird.f32 %v837_v6 }
 0x272   :  { %838 = vrsqrt.f32 %v481_v12  ;;  %vm523_vm14 = vmor %vm521_vm13, %vm522_vm12  ;;  %vm531_vm0 = vweird.f32 %v481_v12 }
 0x273   :  { %v517_v30 = vmul.f32 %v837_v6, %v516_v27  ;;  %v436_v33 = vpop.f32.mrf.mxu0  ;;  %v514_v19 = vsel %vm513_vm10, %v835_v39, %v510_v25 }
 0x274   :  { %v458_v35 = vsub.f32 %v436_v33, %v450_v23  ;;  %v1196_v37 = vmul.f32 %v514_v19, %v1193_v31  ;;  %v1231_v23 = vld [vmem:[%s1279_s3 + $0x28] sm:$0xff] }
 0x275   :  { %v518_v41 = vmul.f32 0.5, %v517_v30  ;;  %v1198_v43 = vpop.f32.mrf.mxu3 }
 0x276   :  { %v466_v44 = vmax.f32 %v458_v35, 0.0  ;;  %v575_v45 = vmul.f32 %v1196_v37, %v1154_v38  ;;  %v451_v50 = vmul.f32 %v1198_v43, %v1198_v43 }
 0x277   :  { %v519_v46 = vsub.f32 1.5, %v518_v41 }
 0x278   :  { %v839_v48 = vpop.eup %838  ;;  %v482_v49 = vadd.f32 1e-05, %v466_v44  ;;  %593 = vrot.lane.b32.xlu0 %v575_v45, %s847_s5  ;;  %v475_v45 = vld [vmem:[%s1279_s3 + $0x30] sm:$0xff] }
 0x279   :  { %v520_v53 = vmul.f32 %v837_v6, %v519_v46  ;;  %v526_v55 = vmul.f32 %v839_v48, %v481_v12  ;;  %vm532_vm15 = vweird.f32 %v839_v48 }
 0x27a   :  { %840 = vrsqrt.f32 %v482_v49  ;;  %vm533_vm1 = vmor %vm531_vm0, %vm532_vm15  ;;  %vm541_vm3 = vweird.f32 %v482_v49 }
 0x27b   :  { %v527_v38 = vmul.f32 %v839_v48, %v526_v55  ;;  %v439_v58 = vpop.f32.mrf.mxu0  ;;  %v524_v59 = vsel %vm523_vm14, %v837_v6, %v520_v53  ;;  %v476_v55 = vld [vmem:[%s1279_s3 + $0x38] sm:$0xff] }
 0x27c   :  { %v459_v60 = vsub.f32 %v439_v58, %v451_v50  ;;  %v1211_v61 = vmul.f32 %v524_v59, %v1208_v57 }
 0x27d   :  { %v528_v2 = vmul.f32 0.5, %v527_v38  ;;  %v1213_v63 = vpop.f32.mrf.mxu3 }
 0x27e   :  { %v467_v3 = vmax.f32 %v459_v60, 0.0  ;;  %v576_v4 = vmul.f32 %v1211_v61, %v1158_v52  ;;  %v452_v40 = vmul.f32 %v1213_v63, %v1213_v63 }
 0x27f   :  { %v529_v54 = vsub.f32 1.5, %v528_v2 }
 0x280   :  { %v841_v7 = vpop.eup %840  ;;  %v483_v8 = vadd.f32 1e-05, %v467_v3  ;;  %595 = vrot.lane.b32.xlu2 %v576_v4, %s847_s5 }
 0x281   :  { %v530_v39 = vmul.f32 %v839_v48, %v529_v54  ;;  %v536_v9 = vmul.f32 %v841_v7, %v482_v49  ;;  %vm542_vm2 = vweird.f32 %v841_v7 }
 0x282   :  { %842 = vrsqrt.f32 %v483_v8  ;;  %vm543_vm4 = vmor %vm541_vm3, %vm542_vm2  ;;  %vm551_vm8 = vweird.f32 %v483_v8 }
 0x283   :  { %v537_v52 = vmul.f32 %v841_v7, %v536_v9  ;;  %v442_v11 = vpop.f32.mrf.mxu0  ;;  %v534_v13 = vsel %vm533_vm1, %v839_v48, %v530_v39 }
 0x284   :  { %v460_v42 = vsub.f32 %v442_v11, %v452_v40  ;;  %v569_v15 = vmul.f32 %v534_v13, %v1223_v10 }
 0x285   :  { %v538_v16 = vmul.f32 0.5, %v537_v52 }
 0x286   :  { %v468_v47 = vmax.f32 %v460_v42, 0.0  ;;  %v577_v18 = vmul.f32 %v569_v15, %v1170_v5 }
 0x287   :  { %v539_v20 = vsub.f32 1.5, %v538_v16 }
 0x288   :  { %v843_v0 = vpop.eup %842  ;;  %v484_v21 = vadd.f32 1e-05, %v468_v47  ;;  %597 = vrot.lane.b32.xlu1 %v577_v18, %s847_s5 }
 0x289   :  { %v540_v6 = vmul.f32 %v841_v7, %v539_v20  ;;  %v546_v12 = vmul.f32 %v843_v0, %v483_v8  ;;  %vm552_vm5 = vweird.f32 %v843_v0 }
 0x28a   :  { %844 = vrsqrt.f32 %v484_v21  ;;  %vm553_vm9 = vmor %vm551_vm8, %vm552_vm5  ;;  %vm561_vm11 = vweird.f32 %v484_v21 }
 0x28b   :  { %v547_v25 = vmul.f32 %v843_v0, %v546_v12  ;;  %v544_v27 = vsel %vm543_vm4, %v841_v7, %v540_v6 }
 0x28c   :  { %v570_v5 = vmul.f32 %v544_v27, %v1231_v23 }
 0x28d   :  { %v548_v30 = vmul.f32 0.5, %v547_v25 }
 0x28e   :  { %v578_v33 = vmul.f32 %v570_v5, %v1184_v56 }
 0x28f   :  { %v549_v19 = vsub.f32 1.5, %v548_v30 }
 0x290   :  { %v845_v35 = vpop.eup %844  ;;  %599 = vrot.lane.b32.xlu0 %v578_v33, %s847_s5 }
 0x291   :  { %v550_v41 = vmul.f32 %v843_v0, %v549_v19  ;;  %v556_v44 = vmul.f32 %v845_v35, %v484_v21  ;;  %vm562_vm6 = vweird.f32 %v845_v35 }
 0x292   :  { %vm563_vm7 = vmor %vm561_vm11, %vm562_vm6 }
 0x293   :  { %v557_v46 = vmul.f32 %v845_v35, %v556_v44  ;;  %v554_v48 = vsel %vm553_vm9, %v843_v0, %v550_v41 }
 0x294   :  { %v571_v49 = vmul.f32 %v554_v48, %v475_v45 }
 0x295   :  { %v558_v50 = vmul.f32 0.5, %v557_v46 }
 0x296   :  { %v579_v51 = vmul.f32 %v571_v49, %v1198_v43 }
 0x297   :  { %v559_v56 = vsub.f32 1.5, %v558_v50 }
 0x298   :  { %623 = vperm.xlu0 %824, %v1168_v62   ;;  %601 = vrot.lane.b32.xlu2 %v579_v51, %s847_s5  ;;  %v849_v62 = vmov 1  }
 0x299   :  { %v560_v53 = vmul.f32 %v845_v35, %v559_v56 }
 0x29b   :  { %v564_v38 = vsel %vm563_vm7, %v845_v35, %v560_v53 }
 0x29c   :  { %v572_v58 = vmul.f32 %v564_v38, %v476_v55 }
 0x29e   :  { %v580_v59 = vmul.f32 %v572_v58, %v1213_v63 }
 0x2a0   :  { %648 = vperm.xlu0 %824, %v570_v5   ;;  %628 = vperm.xlu2 %825, %v1182_v17  }
 0x2a1   :  { %603 = vrot.lane.b32.xlu1 %v580_v59, %s847_s5 }
 0x2a8   :  { %638 = vperm.xlu2 %825, %v1211_v61   ;;  %827 = vset.pattern.permute.xlu0 %v849_v62 }
 0x2a9   :  { %633 = vperm.xlu1 %826, %v1196_v37  }
 0x2b0   :  { %653 = vperm.xlu2 %825, %v571_v49  }
 0x2b1   :  { %643 = vperm.xlu1 %826, %v569_v15  }
 0x2b8   :  { %828 = vset.pattern.permute.xlu2 %v849_v62 }
 0x2b9   :  { %658 = vperm.xlu1 %826, %v572_v58  }
 0x2c1   :  { %829 = vset.pattern.permute.xlu1 %v849_v62 }
 0x2ca   :  { %v592_v43 = vpop.permute.xlu2 %591 }
 0x2cb   :  { %v614_v60 = vsub.f32 %v1179_v14, %v592_v43 }
 0x2cd   :  { %676 = vperm.xlu2 %828, %v614_v60  }
 0x2da   :  { %v590_v2 = vpop.permute.xlu1 %589  ;;  %v596_v63 = vpop.permute.xlu2 %595 }
 0x2db   :  { %v613_v17 = vsub.f32 %v1165_v1, %v590_v2  ;;  %v616_v3 = vsub.f32 %v1208_v57, %v596_v63 }
 0x2dd   :  { %671 = vperm.xlu0 %827, %v613_v17   ;;  %686 = vperm.xlu2 %828, %v616_v3  }
 0x2ea   :  { %v594_v37 = vpop.permute.xlu0 %593 }
 0x2eb   :  { %v615_v61 = vsub.f32 %v1193_v31, %v594_v37 }
 0x2ed   :  { %681 = vperm.xlu1 %829, %v615_v61  }
 0x2f2   :  { %v602_v4 = vpop.permute.xlu2 %601 }
 0x2f3   :  { %v619_v54 = vsub.f32 %v475_v45, %v602_v4 }
 0x2f5   :  { %701 = vperm.xlu2 %828, %v619_v54  }
 0x2fa   :  { %v598_v7 = vpop.permute.xlu1 %597  ;;  %v629_v57 = vpop.permute.xlu2 %628 }
 0x2fb   :  { %v617_v8 = vsub.f32 %v1223_v10, %v598_v7  ;;  %v662_v15 = vmul.f32 %v629_v57, %v950_v24 }
 0x2fd   :  { %691 = vperm.xlu1 %829, %v617_v8  }
 0x302   :  { %v600_v14 = vpop.permute.xlu0 %599  ;;  %v639_v9 = vpop.permute.xlu2 %638 }
 0x303   :  { %v618_v40 = vsub.f32 %v1231_v23, %v600_v14  ;;  %v664_v25 = vmul.f32 %v639_v9, %v960_v28 }
 0x305   :  { %696 = vperm.xlu0 %827, %v618_v40  }
 0x30a   :  { %v624_v52 = vpop.permute.xlu0 %623  ;;  %v654_v11 = vpop.permute.xlu2 %653 }
 0x30b   :  { %v661_v10 = vmul.f32 %v624_v52, %v945_v22  ;;  %v667_v51 = vmul.f32 %v654_v11, %v975_v34 }
 0x312   :  { %v649_v13 = vpop.permute.xlu0 %648 }
 0x313   :  { %v604_v1 = vpop.permute.xlu1 %603  ;;  %v666_v44 = vmul.f32 %v649_v13, %v970_v32 }
 0x314   :  { %v620_v39 = vsub.f32 %v476_v55, %v604_v1 }
 0x316   :  { %706 = vperm.xlu1 %829, %v620_v39  }
 0x31b   :  { %v634_v31 = vpop.permute.xlu1 %633 }
 0x31c   :  { %v663_v27 = vmul.f32 %v634_v31, %v955_v26 }
 0x323   :  { %v644_v16 = vpop.permute.xlu1 %643 }
 0x324   :  { %v665_v41 = vmul.f32 %v644_v16, %v962_v29 }
 0x327   :  { %v677_v42 = vpop.permute.xlu2 %676 }
 0x328   :  { %v710_v47 = vadd.f32 %v677_v42, %v662_v15 }
 0x32a   :  { %v718_v0 = vmax.f32 %v710_v47, 0.0 }
 0x32b   :  { %v659_v12 = vpop.permute.xlu1 %658 }
 0x32c   :  { %v668_v56 = vmul.f32 %v659_v12, %v980_v36 }
 0x337   :  { %v687_v23 = vpop.permute.xlu2 %686 }
 0x338   :  { %v712_v24 = vadd.f32 %v687_v23, %v664_v25 }
 0x33a   :  { %v720_v22 = vmax.f32 %v712_v24, 0.0 }
 0x34f   :  { %v672_v18 = vpop.permute.xlu0 %671  ;;  %v702_v50 = vpop.permute.xlu2 %701 }
 0x350   :  { %v709_v20 = vadd.f32 %v672_v18, %v661_v10  ;;  %v715_v53 = vadd.f32 %v702_v50, %v667_v51 }
 0x352   :  { %v717_v21 = vmax.f32 %v709_v20, 0.0  ;;  %v723_v38 = vmax.f32 %v715_v53, 0.0 }
 0x354   :  { %v798_v6 = vpack.c.bf16 %v718_v0, %v717_v21 }
 0x356   :  { %799 = vst [vmem:[%s1280_s4] sm:$0xff] %v798_v6  }
 0x35f   :  { %v682_v5 = vpop.permute.xlu1 %681 }
 0x360   :  { %v711_v30 = vadd.f32 %v682_v5, %v663_v27 }
 0x362   :  { %v719_v33 = vmax.f32 %v711_v30, 0.0 }
 0x364   :  { %v803_v19 = vpack.c.bf16 %v720_v22, %v719_v33 }
 0x366   :  { %815 = vst [vmem:[%s1280_s4 + $0x8] sm:$0xff] %v803_v19  }
 0x36f   :  { %v692_v35 = vpop.permute.xlu1 %691 }
 0x370   :  { %v713_v45 = vadd.f32 %v692_v35, %v665_v41 }
 0x372   :  { %v721_v48 = vmax.f32 %v713_v45, 0.0 }
 0x377   :  { %v697_v46 = vpop.permute.xlu0 %696 }
 0x378   :  { %v714_v28 = vadd.f32 %v697_v46, %v666_v44 }
 0x37a   :  { %v722_v26 = vmax.f32 %v714_v28, 0.0 }
 0x37c   :  { %v808_v49 = vpack.c.bf16 %v722_v26, %v721_v48 }
 0x37e   :  { %816 = vst [vmem:[%s1280_s4 + $0x10] sm:$0xff] %v808_v49  }
 0x388   :  { %v707_v55 = vpop.permute.xlu1 %706 }
 0x389   :  { %v716_v29 = vadd.f32 %v707_v55, %v668_v56 }
 0x38b   :  { %v724_v32 = vmax.f32 %v716_v29, 0.0 }
 0x38d   :  { %v813_v58 = vpack.c.bf16 %v724_v32, %v723_v38 }
 0x38f   :  { %817 = vst [vmem:[%s1280_s4 + $0x18] sm:$0xff] %v813_v58  }

// kernel: generator_forward.6
= control target key start
LH: loop header
LB: loop body
LE: loop exit
PB: predicated region body
PF: predicated region fallthrough
CT: control target
= control target key end

     0   :  { %vm64_vm0 = vcmask 523264   ;;  %v168_v30 = vlaneseq  ;;  %vm194_vm6 = vcmask 31744   ;;  %s534_s6 = smov 1   ;;  %s747_s1 = inlined_call_operand.vmem [shape: bf16[64,128], index: 1, kind: input, shape index: {}]   ;;  %s748_s2 = inlined_call_operand.vmem [shape: f32[128,4], index: 2, kind: input, shape index: {}]   ;;  %s749_s0 = inlined_call_operand.vmem [shape: bf16[32,64], index: 0, kind: input, shape index: {}]   ;;  %s750_s3 = inlined_call_operand.vmem [shape: f32[32,2], index: 3, kind: input, shape index: {}]   ;;  %s751_s4 = inlined_call_operand.vmem [shape: bf16[32,128], index: 4, kind: output, shape index: {}]  }
   0x1   :  { %v498_v0 = vld [vmem:[%s747_s1 + $0x18] sm:$0xff]  ;;  %v497_v1 = vld [vmem:[%s747_s1 + $0x10] sm:$0xff]  ;;  %v103_v4 = vld [vmem:[%s748_s2 + $0x68] sm:$0xff] }
   0x2   :  { %75 = vmatpush.bf16.msra.mxu0 %v498_v0  ;;  %v105_v2 = vld [vmem:[%s748_s2 + $0x78] sm:$0xff]  ;;  %v104_v3 = vld [vmem:[%s748_s2 + $0x70] sm:$0xff]  ;;  %v496_v5 = vld [vmem:[%s747_s1 + $0x8] sm:$0xff]  ;;  %v174_v31 = vand.u32 127, %v168_v30  ;;  %v649_v32 = vshrl.u32 %v168_v30, 7 }
   0x3   :  { %106 = vmatpush.msra.mxu1 %v105_v2  ;;  %139 = vmatpush.msra.mxu2 %v105_v2  ;;  %v102_v6 = vld [vmem:[%s748_s2 + $0x60] sm:$0xff]  ;;  %v101_v7 = vld [vmem:[%s748_s2 + $0x58] sm:$0xff]  ;;  %v100_v9 = vld [vmem:[%s748_s2 + $0x50] sm:$0xff] }
   0x4   :  { %v495_v8 = vld [vmem:[%s747_s1] sm:$0xff]  ;;  %v99_v10 = vld [vmem:[%s748_s2 + $0x48] sm:$0xff]  ;;  %v97_v13 = vld [vmem:[%s748_s2 + $0x38] sm:$0xff]  ;;  %v180_v33 = vadd.s32 1, %v174_v31  ;;  %v170_v34 = vadd.s32 8, %v649_v32  ;;  %v175_v36 = vmul.u32 8, %v174_v31 }
   0x5   :  { %107 = vmatpush.msra.mxu1 %v104_v3  ;;  %140 = vmatpush.msra.mxu2 %v104_v3  ;;  %v493_v11 = vld [vmem:[%s749_s0] sm:$0xff]  ;;  %v96_v14 = vld [vmem:[%s748_s2 + $0x30] sm:$0xff]  ;;  %v95_v15 = vld [vmem:[%s748_s2 + $0x28] sm:$0xff]  ;;  %v668_v45 = vadd.s32 24, %v649_v32  ;;  %v171_v49 = vadd.s32 16, %v649_v32 }
   0x6   :  { %76 = vmatpush.bf16.msra.mxu0 %v497_v1  ;;  %v98_v12 = vld [vmem:[%s748_s2 + $0x40] sm:$0xff]  ;;  %v93_v17 = vld [vmem:[%s748_s2 + $0x18] sm:$0xff]  ;;  %v92_v18 = vld [vmem:[%s748_s2 + $0x10] sm:$0xff]  ;;  %v181_v37 = vmul.u32 8, %v180_v33  ;;  %vm177_vm1 = vcmp.ge.s32.totalorder %v170_v34, %v175_v36  ;;  %vm176_vm4 = vcmp.ge.s32.totalorder %v649_v32, %v175_v36 }
   0x7   :  { %108 = vmatpush.msra.mxu1 %v103_v4  ;;  %141 = vmatpush.msra.mxu2 %v103_v4  ;;  %v94_v16 = vld [vmem:[%s748_s2 + $0x20] sm:$0xff]  ;;  %v91_v19 = vld [vmem:[%s748_s2 + $0x8] sm:$0xff]  ;;  %vm179_vm8 = vcmp.ge.s32.totalorder %v668_v45, %v175_v36  ;;  %vm178_vm11 = vcmp.ge.s32.totalorder %v171_v49, %v175_v36  ;;  %v224_v4 = vand.u32 7, %v170_v34 }
   0x8   :  { %v494_v20 = vld [vmem:[%s749_s0 + $0x8] sm:$0xff]  ;;  %v90_v21 = vld [vmem:[%s748_s2] sm:$0xff]  ;;  %vm183_vm2 = vcmp.lt.s32.totalorder %v170_v34, %v181_v37  ;;  %vm182_vm5 = vcmp.lt.s32.totalorder %v649_v32, %v181_v37  ;;  %vm185_vm9 = vcmp.lt.s32.totalorder %v668_v45, %v181_v37  ;;  %vm184_vm12 = vcmp.lt.s32.totalorder %v171_v49, %v181_v37 }
   0x9   :  { %109 = vmatpush.msra.mxu1 %v102_v6  ;;  %142 = vmatpush.msra.mxu2 %v102_v6  ;;  %vm652_vm3 = vmand %vm177_vm1, %vm183_vm2  ;;  %v223_v6 = vand.u32 7, %v649_v32 }
   0xa   :  { %77 = vmatpush.bf16.msra.mxu0 %v496_v5  ;;  %vm661_vm7 = vmand %vm176_vm4, %vm182_vm5  ;;  %v227_v5 = vand.u32 7, %v174_v31 }
   0xb   :  { %110 = vmatpush.msra.mxu1 %v101_v7  ;;  %143 = vmatpush.msra.mxu2 %v101_v7  ;;  %vm674_vm10 = vmand %vm179_vm8, %vm185_vm9 }
   0xc   :  { %vm188_vm13 = vmand %vm178_vm11, %vm184_vm12  ;;  %vm229_vm14 = vcmp.eq.s32.totalorder %v224_v4, %v227_v5  ;;  %vm228_vm15 = vcmp.eq.s32.totalorder %v223_v6, %v227_v5 }
   0xd   :  { %111 = vmatpush.msra.mxu1 %v100_v9  ;;  %144 = vmatpush.msra.mxu2 %v100_v9 }
   0xe   :  { %78 = vmatpush.bf16.msra.mxu0 %v495_v8 }
   0xf   :  { %112 = vmatpush.msra.mxu1 %v99_v10  ;;  %145 = vmatpush.msra.mxu2 %v99_v10  ;;  %v532_v10 = vmov 0.0  }
  0x11   :  { %483 = vmatmul.msk.bf16.vlgmr.msra.gmra.mxu0 %vm64_vm0, %v493_v11  ;;  %113 = vmatpush.msra.mxu1 %v98_v12  ;;  %v233_v11 = vsel %vm229_vm14, 0.0078125, %v532_v10 }
  0x12   :  { %146 = vmatpush.msra.mxu2 %v98_v12  ;;  %v225_v12 = vand.u32 7, %v171_v49 }
  0x13   :  { %114 = vmatpush.msra.mxu1 %v97_v13 }
  0x14   :  { %147 = vmatpush.msra.mxu2 %v97_v13  ;;  %v232_v13 = vsel %vm228_vm15, 0.0078125, %v532_v10  ;;  %vm230_vm1 = vcmp.eq.s32.totalorder %v225_v12, %v227_v5 }
  0x15   :  { %115 = vmatpush.msra.mxu1 %v96_v14 }
  0x16   :  { %148 = vmatpush.msra.mxu2 %v96_v14 }
  0x17   :  { %116 = vmatpush.msra.mxu1 %v95_v15 }
  0x18   :  { %149 = vmatpush.msra.mxu2 %v95_v15 }
  0x19   :  { %117 = vmatpush.msra.mxu1 %v94_v16 }
  0x1a   :  { %150 = vmatpush.msra.mxu2 %v94_v16  ;;  %v234_v16 = vsel %vm230_vm1, 0.0078125, %v532_v10 }
  0x1b   :  { %118 = vmatpush.msra.mxu1 %v93_v17 }
  0x1c   :  { %151 = vmatpush.msra.mxu2 %v93_v17 }
  0x1d   :  { %119 = vmatpush.msra.mxu1 %v92_v18 }
  0x1e   :  { %152 = vmatpush.msra.mxu2 %v92_v18  ;;  %v226_v18 = vand.u32 7, %v668_v45 }
  0x1f   :  { %120 = vmatpush.msra.mxu1 %v91_v19 }
  0x20   :  { %153 = vmatpush.msra.mxu2 %v91_v19  ;;  %vm231_vm2 = vcmp.eq.s32.totalorder %v226_v18, %v227_v5 }
  0x21   :  { %484 = vmatmul.msk.bf16.gmra.mxu0 %vm64_vm0, %v494_v20  ;;  %121 = vmatpush.msra.mxu1 %v90_v21  ;;  %vm236_vm0 = vcmask 261120   ;;  %v235_v19 = vsel %vm231_vm2, 0.0078125, %v532_v10 }
  0x22   :  { %154 = vmatpush.msra.mxu2 %v90_v21 }
  0x8e   :  { %v629_v22 = vpop.f32.mrf.mxu0 }
  0x8f   :  { %122 = vmatmul.f32.vlgmr.msra.gmra.mxu1 %v629_v22  ;;  %v135_v23 = vmul.f32 %v629_v22, %v629_v22 }
  0x91   :  { %155 = vmatmul.f32.vlgmr.msra.gmra.mxu2 %v135_v23 }
  0x96   :  { %v634_v24 = vpop.f32.mrf.mxu0 }
  0x97   :  { %125 = vmatmul.f32.gmra.mxu1 %v634_v24  ;;  %v136_v25 = vmul.f32 %v634_v24, %v634_v24 }
  0x99   :  { %158 = vmatmul.f32.gmra.mxu2 %v136_v25 }
  0x9e   :  { %v639_v26 = vpop.f32.mrf.mxu0 }
  0x9f   :  { %128 = vmatmul.f32.gmra.mxu1 %v639_v26  ;;  %v137_v27 = vmul.f32 %v639_v26, %v639_v26 }
  0xa1   :  { %161 = vmatmul.f32.gmra.mxu2 %v137_v27 }
  0xa6   :  { %v644_v28 = vpop.f32.mrf.mxu0 }
  0xa7   :  { %131 = vmatmul.f32.gmra.mxu1 %v644_v28  ;;  %v138_v29 = vmul.f32 %v644_v28, %v644_v28 }
  0xa9   :  { %164 = vmatmul.f32.gmra.mxu2 %v138_v29 }
 0x10c   :  { %v123_v35 = vpop.f32.mrf.mxu1 }
 0x10d   :  { %v190_v44 = vsel %vm661_vm7, %v123_v35, 0.0 }
 0x10e   :  { %v195_v48 = vsel %vm194_vm6, %v190_v44, 0.0 }
 0x114   :  { %v126_v39 = vpop.f32.mrf.mxu1  ;;  %v156_v40 = vpop.f32.mrf.mxu2 }
 0x115   :  { %v191_v41 = vsel %vm652_vm3, %v126_v39, 0.0  ;;  %v207_v51 = vsel %vm661_vm7, %v156_v40, 0.0  ;;  %v533_v39 = vmov 0  }
 0x116   :  { %v198_v42 = vsel %vm194_vm6, %v191_v41, 0.0  ;;  %v211_v55 = vsel %vm194_vm6, %v207_v51, 0.0  ;;  %518 = vset.pattern.permute.xlu0 %v533_v39  ;;  %520 = vset.pattern.permute.xlu1 %v533_v39 }
 0x117   :  { %199 = vadd.xlane.f32.xlu1 %v198_v42  ;;  %519 = vset.pattern.permute.xlu2 %v533_v39 }
 0x11c   :  { %v129_v46 = vpop.f32.mrf.mxu1  ;;  %v159_v47 = vpop.f32.mrf.mxu2 }
 0x11d   :  { %v192_v57 = vsel %vm188_vm13, %v129_v46, 0.0  ;;  %v208_v62 = vsel %vm652_vm3, %v159_v47, 0.0 }
 0x11e   :  { %v201_v61 = vsel %vm194_vm6, %v192_v57, 0.0  ;;  %v214_v1 = vsel %vm194_vm6, %v208_v62, 0.0 }
 0x11f   :  { %196 = vadd.xlane.f32.xlu1 %v195_v48 }
 0x124   :  { %v132_v52 = vpop.f32.mrf.mxu1  ;;  %v162_v53 = vpop.f32.mrf.mxu2 }
 0x125   :  { %v193_v54 = vsel %vm674_vm10, %v132_v52, 0.0  ;;  %v209_v63 = vsel %vm188_vm13, %v162_v53, 0.0  ;;  %v715_v52 = vld [vmem:[%s750_s3] sm:$0xff] }
 0x126   :  { %v204_v56 = vsel %vm194_vm6, %v193_v54, 0.0  ;;  %v217_v0 = vsel %vm194_vm6, %v209_v63, 0.0 }
 0x127   :  { %212 = vadd.xlane.f32.xlu1 %v211_v55  ;;  %205 = vadd.xlane.f32.xlu0 %v204_v56 }
 0x12c   :  { %v165_v58 = vpop.f32.mrf.mxu2 }
 0x12d   :  { %v210_v59 = vsel %vm674_vm10, %v165_v58, 0.0 }
 0x12e   :  { %v220_v60 = vsel %vm194_vm6, %v210_v59, 0.0 }
 0x12f   :  { %221 = vadd.xlane.f32.xlu2 %v220_v60  ;;  %202 = vadd.xlane.f32.xlu0 %v201_v61 }
 0x137   :  { %218 = vadd.xlane.f32.xlu2 %v217_v0  ;;  %215 = vadd.xlane.f32.xlu0 %v214_v1 }
 0x18a   :  { %v200_v2 = vpop.xlane.xlu1 %199 }
 0x192   :  { %v197_v9 = vpop.xlane.xlu1 %196 }
 0x19a   :  { %v206_v3 = vpop.xlane.xlu0 %205  ;;  %v213_v17 = vpop.xlane.xlu1 %212 }
 0x19b   :  { %261 = vmatpush.msrb.mxu0 %v206_v3  ;;  %510 = vmatpush.msra.mxu3 %v206_v3  ;;  %v320_v3 = vld [vmem:[%s750_s3 + $0x8] sm:$0xff] }
 0x1a2   :  { %v222_v7 = vpop.xlane.xlu2 %221  ;;  %v203_v8 = vpop.xlane.xlu0 %202 }
 0x1a3   :  { %262 = vmatpush.msrb.mxu0 %v203_v8  ;;  %511 = vmatpush.msra.mxu3 %v203_v8 }
 0x1a5   :  { %263 = vmatpush.msrb.mxu0 %v200_v2  ;;  %512 = vmatpush.msra.mxu3 %v200_v2 }
 0x1a7   :  { %264 = vmatpush.msrb.mxu0 %v197_v9  ;;  %513 = vmatpush.msra.mxu3 %v197_v9 }
 0x1a8   :  { %486 = vmatmul.msk.f32.vlgmr.msra.gmra.mxu3 %vm236_vm0, %v233_v11  ;;  %485 = vmatmul.msk.f32.vlgmr.msrb.gmra.mxu0 %vm236_vm0, %v232_v13 }
 0x1a9   :  { %290 = vmatpush.msrb.mxu3 %v222_v7 }
 0x1aa   :  { %v219_v14 = vpop.xlane.xlu2 %218  ;;  %v216_v15 = vpop.xlane.xlu0 %215 }
 0x1ab   :  { %291 = vmatpush.msrb.mxu3 %v219_v14 }
 0x1ad   :  { %292 = vmatpush.msrb.mxu3 %v216_v15 }
 0x1af   :  { %293 = vmatpush.msrb.mxu3 %v213_v17 }
 0x1b0   :  { %487 = vmatmul.msk.f32.gmra.mxu3 %vm236_vm0, %v234_v16 }
 0x1b8   :  { %488 = vmatmul.msk.f32.gmra.mxu3 %vm236_vm0, %v235_v19 }
 0x1c0   :  { %489 = vmatmul.msk.f32.vlgmr.msrb.gmra.mxu3 %vm236_vm0, %v232_v13  ;;  %v321_v13 = vld [vmem:[%s750_s3 + $0x10] sm:$0xff] }
 0x1c8   :  { %490 = vmatmul.msk.f32.gmra.mxu3 %vm236_vm0, %v233_v11 }
 0x1d0   :  { %491 = vmatmul.msk.f32.gmra.mxu3 %vm236_vm0, %v234_v16 }
 0x1d8   :  { %492 = vmatmul.msk.f32.gmra.mxu3 %vm236_vm0, %v235_v19 }
 0x225   :  { %v266_v25 = vpop.f32.mrf.mxu0 }
 0x226   :  { %v307_v27 = vmul.f32 %v266_v25, %v266_v25 }
 0x22b   :  { %v702_v20 = vpop.f32.mrf.mxu3 }
 0x22c   :  { %v308_v33 = vmul.f32 %v702_v20, %v702_v20 }
 0x233   :  { %v704_v21 = vpop.f32.mrf.mxu3 }
 0x234   :  { %v309_v41 = vmul.f32 %v704_v21, %v704_v21 }
 0x23b   :  { %v706_v23 = vpop.f32.mrf.mxu3 }
 0x23c   :  { %v310_v53 = vmul.f32 %v706_v23, %v706_v23 }
 0x243   :  { %v295_v29 = vpop.f32.mrf.mxu3 }
 0x244   :  { %v311_v30 = vsub.f32 %v295_v29, %v307_v27 }
 0x246   :  { %v315_v31 = vmax.f32 %v311_v30, 0.0 }
 0x248   :  { %v323_v32 = vadd.f32 1e-05, %v315_v31 }
 0x24a   :  { %524 = vrsqrt.f32 %v323_v32  ;;  %vm333_vm4 = vweird.f32 %v323_v32 }
 0x24b   :  { %v298_v34 = vpop.f32.mrf.mxu3 }
 0x24c   :  { %v312_v35 = vsub.f32 %v298_v34, %v308_v33 }
 0x24e   :  { %v316_v36 = vmax.f32 %v312_v35, 0.0 }
 0x250   :  { %v525_v37 = vpop.eup %524  ;;  %v324_v38 = vadd.f32 1e-05, %v316_v36 }
 0x251   :  { %v328_v40 = vmul.f32 %v525_v37, %v323_v32  ;;  %vm334_vm3 = vweird.f32 %v525_v37 }
 0x252   :  { %526 = vrsqrt.f32 %v324_v38  ;;  %vm335_vm5 = vmor %vm333_vm4, %vm334_vm3  ;;  %vm343_vm7 = vweird.f32 %v324_v38 }
 0x253   :  { %v329_v42 = vmul.f32 %v525_v37, %v328_v40  ;;  %v301_v43 = vpop.f32.mrf.mxu3 }
 0x254   :  { %v313_v44 = vsub.f32 %v301_v43, %v309_v41 }
 0x255   :  { %v330_v45 = vmul.f32 0.5, %v329_v42 }
 0x256   :  { %v317_v46 = vmax.f32 %v313_v44, 0.0 }
 0x257   :  { %v331_v47 = vsub.f32 1.5, %v330_v45 }
 0x258   :  { %v527_v48 = vpop.eup %526  ;;  %v325_v49 = vadd.f32 1e-05, %v317_v46 }
 0x259   :  { %v332_v50 = vmul.f32 %v525_v37, %v331_v47  ;;  %v338_v51 = vmul.f32 %v527_v48, %v324_v38  ;;  %vm344_vm6 = vweird.f32 %v527_v48 }
 0x25a   :  { %528 = vrsqrt.f32 %v325_v49  ;;  %vm345_vm8 = vmor %vm343_vm7, %vm344_vm6  ;;  %vm353_vm10 = vweird.f32 %v325_v49 }
 0x25b   :  { %v339_v54 = vmul.f32 %v527_v48, %v338_v51  ;;  %v304_v55 = vpop.f32.mrf.mxu3  ;;  %v336_v56 = vsel %vm335_vm5, %v525_v37, %v332_v50 }
 0x25c   :  { %v314_v57 = vsub.f32 %v304_v55, %v310_v53  ;;  %v367_v58 = vmul.f32 %v336_v56, %v715_v52 }
 0x25d   :  { %v340_v59 = vmul.f32 0.5, %v339_v54 }
 0x25e   :  { %v318_v60 = vmax.f32 %v314_v57, 0.0  ;;  %v371_v61 = vmul.f32 %v367_v58, %v266_v25  ;;  %v322_v25 = vld [vmem:[%s750_s3 + $0x18] sm:$0xff] }
 0x25f   :  { %v341_v62 = vsub.f32 1.5, %v340_v59 }
 0x260   :  { %v529_v63 = vpop.eup %528  ;;  %v326_v0 = vadd.f32 1e-05, %v318_v60  ;;  %379 = vrot.lane.b32.xlu2 %v371_v61, %s534_s6 }
 0x261   :  { %v342_v1 = vmul.f32 %v527_v48, %v341_v62  ;;  %v348_v2 = vmul.f32 %v529_v63, %v325_v49  ;;  %vm354_vm9 = vweird.f32 %v529_v63 }
 0x262   :  { %530 = vrsqrt.f32 %v326_v0  ;;  %vm355_vm11 = vmor %vm353_vm10, %vm354_vm9  ;;  %vm363_vm13 = vweird.f32 %v326_v0 }
 0x263   :  { %v349_v4 = vmul.f32 %v529_v63, %v348_v2  ;;  %v346_v5 = vsel %vm345_vm8, %v527_v48, %v342_v1 }
 0x264   :  { %v368_v6 = vmul.f32 %v346_v5, %v320_v3 }
 0x265   :  { %v350_v7 = vmul.f32 0.5, %v349_v4 }
 0x266   :  { %v372_v8 = vmul.f32 %v368_v6, %v702_v20 }
 0x267   :  { %v351_v9 = vsub.f32 1.5, %v350_v7 }
 0x268   :  { %v531_v10 = vpop.eup %530  ;;  %381 = vrot.lane.b32.xlu0 %v372_v8, %s534_s6 }
 0x269   :  { %v352_v11 = vmul.f32 %v529_v63, %v351_v9  ;;  %v358_v12 = vmul.f32 %v531_v10, %v326_v0  ;;  %vm364_vm12 = vweird.f32 %v531_v10 }
 0x26a   :  { %vm365_vm14 = vmor %vm363_vm13, %vm364_vm12 }
 0x26b   :  { %v359_v14 = vmul.f32 %v531_v10, %v358_v12  ;;  %v356_v15 = vsel %vm355_vm11, %v529_v63, %v352_v11 }
 0x26c   :  { %v369_v16 = vmul.f32 %v356_v15, %v321_v13 }
 0x26d   :  { %v360_v17 = vmul.f32 0.5, %v359_v14 }
 0x26e   :  { %v373_v18 = vmul.f32 %v369_v16, %v704_v21  ;;  %v535_v21 = vmov 1  }
 0x26f   :  { %v361_v19 = vsub.f32 1.5, %v360_v17 }
 0x270   :  { %397 = vperm.xlu0 %518, %v367_v58   ;;  %383 = vrot.lane.b32.xlu1 %v373_v18, %s534_s6 }
 0x271   :  { %v362_v20 = vmul.f32 %v531_v10, %v361_v19 }
 0x273   :  { %v366_v27 = vsel %vm365_vm14, %v531_v10, %v362_v20 }
 0x274   :  { %v370_v29 = vmul.f32 %v366_v27, %v322_v25 }
 0x276   :  { %v374_v30 = vmul.f32 %v370_v29, %v706_v23 }
 0x278   :  { %407 = vperm.xlu1 %520, %v369_v16   ;;  %385 = vrot.lane.b32.xlu2 %v374_v30, %s534_s6 }
 0x279   :  { %522 = vset.pattern.permute.xlu0 %v535_v21 }
 0x280   :  { %402 = vperm.xlu2 %519, %v368_v6   ;;  %521 = vset.pattern.permute.xlu1 %v535_v21 }
 0x288   :  { %412 = vperm.xlu2 %519, %v370_v29  }
 0x290   :  { %523 = vset.pattern.permute.xlu2 %v535_v21 }
 0x2ba   :  { %v380_v31 = vpop.permute.xlu2 %379 }
 0x2bb   :  { %v391_v32 = vsub.f32 %v715_v52, %v380_v31 }
 0x2bd   :  { %421 = vperm.xlu1 %521, %v391_v32  }
 0x2d2   :  { %v386_v33 = vpop.permute.xlu2 %385 }
 0x2d3   :  { %v394_v34 = vsub.f32 %v322_v25, %v386_v33 }
 0x2d5   :  { %436 = vperm.xlu1 %521, %v394_v34  }
 0x2da   :  { %v382_v35 = vpop.permute.xlu0 %381  ;;  %v403_v38 = vpop.permute.xlu2 %402 }
 0x2db   :  { %v392_v36 = vsub.f32 %v320_v3, %v382_v35  ;;  %v416_v53 = vmul.f32 %v403_v38, %v634_v24 }
 0x2dd   :  { %426 = vperm.xlu0 %522, %v392_v36  }
 0x2e2   :  { %v384_v23 = vpop.permute.xlu1 %383  ;;  %v413_v40 = vpop.permute.xlu2 %412 }
 0x2e3   :  { %v393_v37 = vsub.f32 %v321_v13, %v384_v23  ;;  %v418_v44 = vmul.f32 %v413_v40, %v644_v28  ;;  %v398_v46 = vpop.permute.xlu0 %397 }
 0x2e4   :  { %v415_v51 = vmul.f32 %v398_v46, %v629_v22 }
 0x2e5   :  { %431 = vperm.xlu2 %523, %v393_v37  }
 0x2ea   :  { %v408_v39 = vpop.permute.xlu1 %407 }
 0x2eb   :  { %v417_v43 = vmul.f32 %v408_v39, %v639_v26 }
 0x32f   :  { %v422_v41 = vpop.permute.xlu1 %421 }
 0x330   :  { %v439_v54 = vadd.f32 %v422_v41, %v415_v51 }
 0x332   :  { %v443_v56 = vmax.f32 %v439_v54, 0.0 }
 0x33f   :  { %v432_v42 = vpop.permute.xlu2 %431 }
 0x340   :  { %v441_v45 = vadd.f32 %v432_v42, %v417_v43 }
 0x342   :  { %v445_v49 = vmax.f32 %v441_v45, 0.0 }
 0x347   :  { %v437_v47 = vpop.permute.xlu1 %436 }
 0x348   :  { %v442_v48 = vadd.f32 %v437_v47, %v418_v44 }
 0x34a   :  { %v446_v50 = vmax.f32 %v442_v48, 0.0 }
 0x34c   :  { %v507_v52 = vpack.c.bf16 %v446_v50, %v445_v49 }
 0x34e   :  { %509 = vst [vmem:[%s751_s4 + $0x8] sm:$0xff] %v507_v52  }
 0x34f   :  { %v427_v55 = vpop.permute.xlu0 %426 }
 0x350   :  { %v440_v26 = vadd.f32 %v427_v55, %v416_v53 }
 0x352   :  { %v444_v28 = vmax.f32 %v440_v26, 0.0 }
 0x354   :  { %v502_v57 = vpack.c.bf16 %v444_v28, %v443_v56 }
 0x356   :  { %503 = vst [vmem:[%s751_s4] sm:$0xff] %v502_v57  }

// kernel: generator_forward.7
= control target key start
LH: loop header
LB: loop body
LE: loop exit
PB: predicated region body
PF: predicated region fallthrough
CT: control target
= control target key end

     0   :  { %vm49_vm0 = vcmask 261120   ;;  %v209_v53 = vlaneseq  ;;  %vm225_vm4 = vcmask 31744   ;;  %vm247_vm9 = vcmask 130048   ;;  %s429_s15 = smov 1   ;;  %s637_s1 = inlined_call_operand.vmem [shape: bf16[32,256], index: 1, kind: input, shape index: {}]   ;;  %s638_s2 = inlined_call_operand.vmem [shape: f32[256,4], index: 2, kind: input, shape index: {}]   ;;  %s639_s0 = inlined_call_operand.vmem [shape: bf16[16,32], index: 0, kind: input, shape index: {}]   ;;  %s640_s3 = inlined_call_operand.vmem [shape: f32[16,2], index: 3, kind: input, shape index: {}]   ;;  %s641_s4 = inlined_call_operand.vmem [shape: bf16[16,256], index: 4, kind: output, shape index: {}]  }
   0x1   :  { %v398_v0 = vld [vmem:[%s637_s1 + $0x10] sm:$0xf]  ;;  %v414_v1 = vld [vmem:[%s637_s1 + $0x14] sm:$0xf0]  ;;  %v413_v2 = vld [vmem:[%s637_s1 + $0x14] sm:$0xf] }
   0x2   :  { %v399_v3 = vor.u32 %v414_v1, %v398_v0  ;;  %v400_v4 = vld [vmem:[%s637_s1 + $0x18] sm:$0xf0]  ;;  %v390_v5 = vld [vmem:[%s637_s1] sm:$0xf]  ;;  %v412_v6 = vld [vmem:[%s637_s1 + $0x4] sm:$0xf0] }
   0x3   :  { %v403_v7 = vor.u32 %v413_v2, %v400_v4  ;;  %v411_v8 = vld [vmem:[%s637_s1 + $0x4] sm:$0xf]  ;;  %v392_v9 = vld [vmem:[%s637_s1 + $0x8] sm:$0xf0]  ;;  %v391_v10 = vor.u32 %v412_v6, %v390_v5  ;;  %v96_v11 = vld [vmem:[%s638_s2 + $0x78] sm:$0xff]  ;;  %v213_v54 = vand.u32 127, %v209_v53 }
   0x4   :  { %59 = vmatpush.bf16.msra.mxu0 %v399_v3  ;;  %v112_v12 = vld [vmem:[%s638_s2 + $0xf8] sm:$0xff]  ;;  %v95_v13 = vld [vmem:[%s638_s2 + $0x70] sm:$0xff]  ;;  %v395_v14 = vor.u32 %v411_v8, %v392_v9  ;;  %113 = vmatpush.msra.mxu2 %v96_v11  ;;  %v410_v16 = vld [vmem:[%s639_s0] sm:$0xff]  ;;  %v210_v56 = vshrl.u32 %v209_v53, 7 }
   0x5   :  { %73 = vmatpush.bf16.msra.mxu1 %v403_v7  ;;  %v111_v15 = vld [vmem:[%s638_s2 + $0xf0] sm:$0xff]  ;;  %136 = vmatpush.msra.mxu3 %v112_v12  ;;  %v94_v17 = vld [vmem:[%s638_s2 + $0x68] sm:$0xff]  ;;  %v93_v19 = vld [vmem:[%s638_s2 + $0x60] sm:$0xff]  ;;  %v217_v57 = vadd.s32 1, %v213_v54  ;;  %v214_v61 = vmul.u32 4, %v213_v54 }
   0x6   :  { %114 = vmatpush.msra.mxu2 %v95_v13  ;;  %v110_v18 = vld [vmem:[%s638_s2 + $0xe8] sm:$0xff]  ;;  %v109_v20 = vld [vmem:[%s638_s2 + $0xe0] sm:$0xff]  ;;  %v92_v21 = vld [vmem:[%s638_s2 + $0x58] sm:$0xff]  ;;  %v211_v59 = vadd.s32 8, %v210_v56 }
   0x7   :  { %137 = vmatpush.msra.mxu3 %v111_v15  ;;  %v108_v22 = vld [vmem:[%s638_s2 + $0xd8] sm:$0xff]  ;;  %v91_v23 = vld [vmem:[%s638_s2 + $0x50] sm:$0xff]  ;;  %v90_v25 = vld [vmem:[%s638_s2 + $0x48] sm:$0xff]  ;;  %v218_v62 = vmul.u32 4, %v217_v57  ;;  %vm611_vm5 = vcmp.ge.s32.totalorder %v210_v56, %v214_v61 }
   0x8   :  { %60 = vmatpush.bf16.msra.mxu0 %v391_v10  ;;  %115 = vmatpush.msra.mxu2 %v94_v17  ;;  %v107_v24 = vld [vmem:[%s638_s2 + $0xd0] sm:$0xff]  ;;  %v106_v26 = vld [vmem:[%s638_s2 + $0xc8] sm:$0xff]  ;;  %v89_v27 = vld [vmem:[%s638_s2 + $0x40] sm:$0xff]  ;;  %vm599_vm1 = vcmp.ge.s32.totalorder %v211_v59, %v214_v61 }
   0x9   :  { %74 = vmatpush.bf16.msra.mxu1 %v395_v14  ;;  %138 = vmatpush.msra.mxu3 %v110_v18  ;;  %v105_v28 = vld [vmem:[%s638_s2 + $0xc0] sm:$0xff]  ;;  %v88_v29 = vld [vmem:[%s638_s2 + $0x38] sm:$0xff]  ;;  %v87_v31 = vld [vmem:[%s638_s2 + $0x30] sm:$0xff]  ;;  %vm603_vm2 = vcmp.lt.s32.totalorder %v211_v59, %v218_v62  ;;  %vm219_vm6 = vcmp.lt.s32.totalorder %v210_v56, %v218_v62 }
   0xa   :  { %116 = vmatpush.msra.mxu2 %v93_v19  ;;  %v104_v30 = vld [vmem:[%s638_s2 + $0xb8] sm:$0xff]  ;;  %v103_v32 = vld [vmem:[%s638_s2 + $0xb0] sm:$0xff]  ;;  %v86_v33 = vld [vmem:[%s638_s2 + $0x28] sm:$0xff] }
   0xb   :  { %404 = vmatmul.msk.bf16.vlgmr.msra.gmra.mxu0 %vm49_vm0, %v410_v16  ;;  %139 = vmatpush.msra.mxu3 %v109_v20  ;;  %v102_v34 = vld [vmem:[%s638_s2 + $0xa8] sm:$0xff]  ;;  %v85_v35 = vld [vmem:[%s638_s2 + $0x20] sm:$0xff]  ;;  %v84_v37 = vld [vmem:[%s638_s2 + $0x18] sm:$0xff] }
   0xc   :  { %163 = vmatpush.msrb.mxu0 %v96_v11  ;;  %405 = vmatmul.msk.bf16.vlgmr.msra.gmra.mxu1 %vm49_vm0, %v410_v16  ;;  %v101_v36 = vld [vmem:[%s638_s2 + $0xa0] sm:$0xff]  ;;  %v100_v38 = vld [vmem:[%s638_s2 + $0x98] sm:$0xff]  ;;  %v83_v39 = vld [vmem:[%s638_s2 + $0x10] sm:$0xff] }
   0xd   :  { %186 = vmatpush.msrb.mxu1 %v112_v12  ;;  %117 = vmatpush.msra.mxu2 %v92_v21  ;;  %v99_v40 = vld [vmem:[%s638_s2 + $0x90] sm:$0xff]  ;;  %v82_v41 = vld [vmem:[%s638_s2 + $0x8] sm:$0xff]  ;;  %v81_v43 = vld [vmem:[%s638_s2] sm:$0xff] }
   0xe   :  { %164 = vmatpush.msrb.mxu0 %v95_v13  ;;  %140 = vmatpush.msra.mxu3 %v108_v22  ;;  %v98_v42 = vld [vmem:[%s638_s2 + $0x88] sm:$0xff]  ;;  %v97_v44 = vld [vmem:[%s638_s2 + $0x80] sm:$0xff]  ;;  %vm222_vm3 = vmand %vm599_vm1, %vm603_vm2 }
   0xf   :  { %187 = vmatpush.msrb.mxu1 %v111_v15  ;;  %118 = vmatpush.msra.mxu2 %v91_v23  ;;  %vm221_vm7 = vmand %vm611_vm5, %vm219_vm6  ;;  %v306_v53 = vld [vmem:[%s640_s3] sm:$0xff]  ;;  %v307_v61 = vld [vmem:[%s640_s3 + $0x8] sm:$0xff] }
  0x10   :  { %165 = vmatpush.msrb.mxu0 %v94_v17  ;;  %141 = vmatpush.msra.mxu3 %v107_v24 }
  0x11   :  { %188 = vmatpush.msrb.mxu1 %v110_v18  ;;  %119 = vmatpush.msra.mxu2 %v90_v25 }
  0x12   :  { %166 = vmatpush.msrb.mxu0 %v93_v19  ;;  %142 = vmatpush.msra.mxu3 %v106_v26 }
  0x13   :  { %189 = vmatpush.msrb.mxu1 %v109_v20  ;;  %120 = vmatpush.msra.mxu2 %v89_v27  ;;  %v240_v20 = vand.u32 3, %v210_v56 }
  0x14   :  { %167 = vmatpush.msrb.mxu0 %v92_v21  ;;  %143 = vmatpush.msra.mxu3 %v105_v28  ;;  %v242_v21 = vand.u32 3, %v213_v54 }
  0x15   :  { %190 = vmatpush.msrb.mxu1 %v108_v22  ;;  %121 = vmatpush.msra.mxu2 %v88_v29 }
  0x16   :  { %168 = vmatpush.msrb.mxu0 %v91_v23  ;;  %144 = vmatpush.msra.mxu3 %v104_v30  ;;  %vm243_vm8 = vcmp.eq.s32.totalorder %v240_v20, %v242_v21 }
  0x17   :  { %191 = vmatpush.msrb.mxu1 %v107_v24  ;;  %122 = vmatpush.msra.mxu2 %v87_v31  ;;  %v427_v24 = vmov 0.0  }
  0x18   :  { %169 = vmatpush.msrb.mxu0 %v90_v25  ;;  %145 = vmatpush.msra.mxu3 %v103_v32  ;;  %v245_v25 = vsel %vm243_vm8, 0.001953125, %v427_v24 }
  0x19   :  { %192 = vmatpush.msrb.mxu1 %v106_v26  ;;  %123 = vmatpush.msra.mxu2 %v86_v33  ;;  %v241_v26 = vand.u32 3, %v211_v59 }
  0x1a   :  { %170 = vmatpush.msrb.mxu0 %v89_v27  ;;  %146 = vmatpush.msra.mxu3 %v102_v34 }
  0x1b   :  { %193 = vmatpush.msrb.mxu1 %v105_v28  ;;  %124 = vmatpush.msra.mxu2 %v85_v35  ;;  %vm244_vm10 = vcmp.eq.s32.totalorder %v241_v26, %v242_v21 }
  0x1c   :  { %171 = vmatpush.msrb.mxu0 %v88_v29  ;;  %147 = vmatpush.msra.mxu3 %v101_v36  ;;  %v246_v28 = vsel %vm244_vm10, 0.001953125, %v427_v24  ;;  %v428_v29 = vmov 0  }
  0x1d   :  { %194 = vmatpush.msrb.mxu1 %v104_v30  ;;  %125 = vmatpush.msra.mxu2 %v84_v37 }
  0x1e   :  { %172 = vmatpush.msrb.mxu0 %v87_v31  ;;  %148 = vmatpush.msra.mxu3 %v100_v38 }
  0x1f   :  { %195 = vmatpush.msrb.mxu1 %v103_v32  ;;  %126 = vmatpush.msra.mxu2 %v83_v39 }
  0x20   :  { %173 = vmatpush.msrb.mxu0 %v86_v33  ;;  %149 = vmatpush.msra.mxu3 %v99_v40 }
  0x21   :  { %196 = vmatpush.msrb.mxu1 %v102_v34  ;;  %127 = vmatpush.msra.mxu2 %v82_v41 }
  0x22   :  { %174 = vmatpush.msrb.mxu0 %v85_v35  ;;  %150 = vmatpush.msra.mxu3 %v98_v42 }
  0x23   :  { %197 = vmatpush.msrb.mxu1 %v101_v36  ;;  %128 = vmatpush.msra.mxu2 %v81_v43 }
  0x24   :  { %175 = vmatpush.msrb.mxu0 %v84_v37  ;;  %151 = vmatpush.msra.mxu3 %v97_v44 }
  0x25   :  { %198 = vmatpush.msrb.mxu1 %v100_v38  ;;  %419 = vset.pattern.permute.xlu0 %v428_v29 }
  0x26   :  { %176 = vmatpush.msrb.mxu0 %v83_v39  ;;  %420 = vset.pattern.permute.xlu1 %v428_v29 }
  0x27   :  { %199 = vmatpush.msrb.mxu1 %v99_v40 }
  0x28   :  { %177 = vmatpush.msrb.mxu0 %v82_v41 }
  0x29   :  { %200 = vmatpush.msrb.mxu1 %v98_v42 }
  0x2a   :  { %178 = vmatpush.msrb.mxu0 %v81_v43 }
  0x2b   :  { %201 = vmatpush.msrb.mxu1 %v97_v44 }
  0x88   :  { %v579_v45 = vpop.f32.mrf.mxu0 }
  0x89   :  { %v159_v46 = vmul.f32 %v579_v45, %v579_v45  ;;  %v583_v47 = vpop.f32.mrf.mxu1  ;;  %129 = vmatmul.f32.vlgmr.msra.gmra.mxu2 %v579_v45 }
  0x8a   :  { %v160_v48 = vmul.f32 %v583_v47, %v583_v47  ;;  %152 = vmatmul.f32.vlgmr.msra.gmra.mxu3 %v583_v47 }
  0x8b   :  { %179 = vmatmul.f32.vlgmr.msrb.gmra.mxu0 %v159_v46 }
  0x8c   :  { %202 = vmatmul.f32.vlgmr.msrb.gmra.mxu1 %v160_v48 }
  0x90   :  { %v589_v49 = vpop.f32.mrf.mxu0 }
  0x91   :  { %v591_v50 = vpop.f32.mrf.mxu1  ;;  %132 = vmatmul.f32.gmra.mxu2 %v589_v49  ;;  %v161_v51 = vmul.f32 %v589_v49, %v589_v49 }
  0x92   :  { %155 = vmatmul.f32.gmra.mxu3 %v591_v50  ;;  %v162_v52 = vmul.f32 %v591_v50, %v591_v50 }
  0x93   :  { %182 = vmatmul.f32.gmra.mxu0 %v161_v51 }
  0x94   :  { %205 = vmatmul.f32.gmra.mxu1 %v162_v52 }
 0x108   :  { %v180_v55 = vpop.f32.mrf.mxu0 }
 0x109   :  { %v203_v58 = vpop.f32.mrf.mxu1 }
 0x10a   :  { %v204_v10 = vadd.f32 %v203_v58, %v180_v55 }
 0x10c   :  { %v130_v60 = vpop.f32.mrf.mxu2  ;;  %v232_v15 = vsel %vm221_vm7, %v204_v10, 0.0 }
 0x10d   :  { %v153_v63 = vpop.f32.mrf.mxu3  ;;  %v234_v16 = vsel %vm225_vm4, %v232_v15, 0.0 }
 0x10e   :  { %v154_v14 = vadd.f32 %v153_v63, %v130_v60 }
 0x110   :  { %v183_v2 = vpop.f32.mrf.mxu0  ;;  %v223_v17 = vsel %vm221_vm7, %v154_v14, 0.0 }
 0x111   :  { %v206_v3 = vpop.f32.mrf.mxu1  ;;  %v226_v18 = vsel %vm225_vm4, %v223_v17, 0.0 }
 0x112   :  { %v207_v4 = vadd.f32 %v206_v3, %v183_v2  ;;  %v430_v2 = vmov 1  }
 0x113   :  { %421 = vset.pattern.permute.xlu2 %v430_v2 }
 0x114   :  { %v133_v5 = vpop.f32.mrf.mxu2  ;;  %v233_v6 = vsel %vm222_vm3, %v207_v4, 0.0 }
 0x115   :  { %v156_v8 = vpop.f32.mrf.mxu3  ;;  %v237_v9 = vsel %vm225_vm4, %v233_v6, 0.0 }
 0x116   :  { %v157_v11 = vadd.f32 %v156_v8, %v133_v5  ;;  %238 = vadd.xlane.f32.xlu1 %v237_v9 }
 0x118   :  { %v224_v12 = vsel %vm222_vm3, %v157_v11, 0.0 }
 0x119   :  { %v229_v13 = vsel %vm225_vm4, %v224_v12, 0.0 }
 0x11a   :  { %230 = vadd.xlane.f32.xlu0 %v229_v13 }
 0x11e   :  { %235 = vadd.xlane.f32.xlu1 %v234_v16 }
 0x122   :  { %227 = vadd.xlane.f32.xlu0 %v226_v18 }
 0x189   :  { %v239_v19 = vpop.xlane.xlu1 %238 }
 0x18a   :  { %291 = vmatpush.msrb.mxu3 %v239_v19 }
 0x18d   :  { %v231_v22 = vpop.xlane.xlu0 %230 }
 0x18e   :  { %268 = vmatpush.msrb.mxu2 %v231_v22 }
 0x191   :  { %v236_v23 = vpop.xlane.xlu1 %235 }
 0x192   :  { %292 = vmatpush.msrb.mxu3 %v236_v23 }
 0x193   :  { %408 = vmatmul.msk.f32.vlgmr.msrb.gmra.mxu3 %vm247_vm9, %v245_v25 }
 0x195   :  { %v228_v27 = vpop.xlane.xlu0 %227 }
 0x196   :  { %269 = vmatpush.msrb.mxu2 %v228_v27 }
 0x197   :  { %406 = vmatmul.msk.f32.vlgmr.msrb.gmra.mxu2 %vm247_vm9, %v245_v25 }
 0x19b   :  { %409 = vmatmul.msk.f32.gmra.mxu3 %vm247_vm9, %v246_v28 }
 0x19f   :  { %407 = vmatmul.msk.f32.gmra.mxu2 %vm247_vm9, %v246_v28 }
 0x216   :  { %v294_v30 = vpop.f32.mrf.mxu3 }
 0x21a   :  { %v271_v31 = vpop.f32.mrf.mxu2 }
 0x21b   :  { %v300_v32 = vmul.f32 %v271_v31, %v271_v31 }
 0x21d   :  { %v302_v33 = vsub.f32 %v294_v30, %v300_v32 }
 0x21e   :  { %v297_v37 = vpop.f32.mrf.mxu3 }
 0x21f   :  { %v304_v34 = vmax.f32 %v302_v33, 0.0 }
 0x221   :  { %v308_v35 = vadd.f32 1e-05, %v304_v34 }
 0x222   :  { %v274_v36 = vpop.f32.mrf.mxu2 }
 0x223   :  { %423 = vrsqrt.f32 %v308_v35  ;;  %v301_v38 = vmul.f32 %v274_v36, %v274_v36  ;;  %vm316_vm12 = vweird.f32 %v308_v35 }
 0x225   :  { %v303_v39 = vsub.f32 %v297_v37, %v301_v38 }
 0x227   :  { %v305_v40 = vmax.f32 %v303_v39, 0.0 }
 0x229   :  { %v424_v41 = vpop.eup %423  ;;  %v309_v42 = vadd.f32 1e-05, %v305_v40 }
 0x22a   :  { %v311_v43 = vmul.f32 %v424_v41, %v308_v35  ;;  %vm317_vm11 = vweird.f32 %v424_v41 }
 0x22b   :  { %425 = vrsqrt.f32 %v309_v42  ;;  %vm318_vm13 = vmor %vm316_vm12, %vm317_vm11  ;;  %vm326_vm15 = vweird.f32 %v309_v42 }
 0x22c   :  { %v312_v44 = vmul.f32 %v424_v41, %v311_v43 }
 0x22e   :  { %v313_v46 = vmul.f32 0.5, %v312_v44 }
 0x230   :  { %v314_v48 = vsub.f32 1.5, %v313_v46 }
 0x231   :  { %v426_v51 = vpop.eup %425 }
 0x232   :  { %v321_v52 = vmul.f32 %v426_v51, %v309_v42  ;;  %v315_v54 = vmul.f32 %v424_v41, %v314_v48  ;;  %vm327_vm14 = vweird.f32 %v426_v51 }
 0x233   :  { %vm328_vm0 = vmor %vm326_vm15, %vm327_vm14 }
 0x234   :  { %v322_v55 = vmul.f32 %v426_v51, %v321_v52  ;;  %v319_v56 = vsel %vm318_vm13, %v424_v41, %v315_v54 }
 0x235   :  { %v330_v57 = vmul.f32 %v319_v56, %v306_v53 }
 0x236   :  { %v323_v58 = vmul.f32 0.5, %v322_v55 }
 0x237   :  { %346 = vperm.xlu0 %419, %v330_v57   ;;  %v332_v59 = vmul.f32 %v330_v57, %v271_v31 }
 0x238   :  { %v324_v60 = vsub.f32 1.5, %v323_v58 }
 0x239   :  { %336 = vrot.lane.b32.xlu2 %v332_v59, %s429_s15 }
 0x23a   :  { %v325_v62 = vmul.f32 %v426_v51, %v324_v60 }
 0x23c   :  { %v329_v63 = vsel %vm328_vm0, %v426_v51, %v325_v62 }
 0x23d   :  { %v331_v0 = vmul.f32 %v329_v63, %v307_v61 }
 0x23f   :  { %351 = vperm.xlu1 %420, %v331_v0   ;;  %v333_v1 = vmul.f32 %v331_v0, %v274_v36  ;;  %422 = vset.pattern.permute.xlu0 %v430_v2 }
 0x241   :  { %338 = vrot.lane.b32.xlu2 %v333_v1, %s429_s15 }
 0x293   :  { %v337_v3 = vpop.permute.xlu2 %336 }
 0x294   :  { %v342_v4 = vsub.f32 %v306_v53, %v337_v3 }
 0x296   :  { %360 = vperm.xlu2 %421, %v342_v4  }
 0x29b   :  { %v339_v5 = vpop.permute.xlu2 %338 }
 0x29c   :  { %v343_v6 = vsub.f32 %v307_v61, %v339_v5 }
 0x29e   :  { %365 = vperm.xlu2 %421, %v343_v6  }
 0x2a9   :  { %v347_v7 = vpop.permute.xlu0 %346 }
 0x2aa   :  { %v354_v8 = vmul.f32 %v347_v7, %v579_v45  ;;  %v355_v9 = vmul.f32 %v347_v7, %v583_v47 }
 0x2b1   :  { %v352_v15 = vpop.permute.xlu1 %351 }
 0x2b2   :  { %v356_v17 = vmul.f32 %v352_v15, %v589_v49  ;;  %v357_v18 = vmul.f32 %v352_v15, %v591_v50 }
 0x2f0   :  { %v361_v10 = vpop.permute.xlu2 %360 }
 0x2f1   :  { %v368_v11 = vadd.f32 %v361_v10, %v354_v8  ;;  %v369_v12 = vadd.f32 %v361_v10, %v355_v9 }
 0x2f3   :  { %v372_v13 = vmax.f32 %v368_v11, 0.0  ;;  %v373_v14 = vmax.f32 %v369_v12, 0.0 }
 0x2f5   :  { %v376_v16 = vpack.c.bf16 %v373_v14, %v372_v13 }
 0x2f7   :  { %378 = vst [vmem:[%s641_s4] sm:$0xff] %v376_v16 }
 0x2f8   :  { %v366_v19 = vpop.permute.xlu2 %365 }
 0x2f9   :  { %v370_v20 = vadd.f32 %v366_v19, %v356_v17  ;;  %v371_v45 = vadd.f32 %v366_v19, %v357_v18 }
 0x2fb   :  { %v374_v21 = vmax.f32 %v370_v20, 0.0  ;;  %v375_v47 = vmax.f32 %v371_v45, 0.0 }
 0x2fd   :  { %v377_v22 = vpack.c.bf16 %v375_v47, %v374_v21 }
 0x2ff   :  { %379 = vst [vmem:[%s641_s4 + $0x8] sm:$0xff] %v377_v22 }

// kernel: generator_forward.8
= control target key start
LH: loop header
LB: loop body
LE: loop exit
PB: predicated region body
PF: predicated region fallthrough
CT: control target
= control target key end

     0   :  { %vm51_vm0 = vcmask 130048   ;;  %vm416_vm4 = vcmask 31744   ;;  %vm428_vm6 = vcmask 64512   ;;  %s572_s30 = smov 1   ;;  %s1254_s1 = inlined_call_operand.vmem [shape: bf16[16,640], index: 1, kind: input, shape index: {}]   ;;  %s1255_s0 = inlined_call_operand.vmem [shape: bf16[8,16], index: 0, kind: input, shape index: {}]   ;;  %s1256_s2 = inlined_call_operand.vmem [shape: f32[640,4], index: 2, kind: input, shape index: {}]   ;;  %s1257_s3 = inlined_call_operand.vmem [shape: f32[8,2], index: 3, kind: input, shape index: {}]   ;;  %s1258_s4 = inlined_call_operand.vmem [shape: bf16[8,640], index: 4, kind: output, shape index: {}]  }
   0x1   :  { %v531_v0 = vld [vmem:[%s1254_s1] sm:$0xf]  ;;  %v558_v1 = vld [vmem:[%s1254_s1 + $0x10] sm:$0xf0]  ;;  %v556_v2 = vld [vmem:[%s1254_s1 + $0x4] sm:$0xf] }
   0x2   :  { %v532_v3 = vor.u32 %v558_v1, %v531_v0  ;;  %v533_v4 = vld [vmem:[%s1254_s1 + $0x14] sm:$0xf0]  ;;  %v539_v5 = vld [vmem:[%s1254_s1 + $0x8] sm:$0xf]  ;;  %v559_v6 = vld [vmem:[%s1254_s1 + $0x18] sm:$0xf0] }
   0x3   :  { %v536_v7 = vor.u32 %v556_v2, %v533_v4  ;;  %v540_v8 = vor.u32 %v559_v6, %v539_v5  ;;  %v620_v9 = vld [vmem:[%s1255_s0] sm:$0xf]  ;;  %v557_v10 = vld [vmem:[%s1254_s1 + $0xc] sm:$0xf]  ;;  %v547_v13 = vld [vmem:[%s1254_s1 + $0x10] sm:$0xf] }
   0x4   :  { %v541_v11 = vld [vmem:[%s1254_s1 + $0x1c] sm:$0xf0]  ;;  %62 = vmatpush.bf16.msra.mxu0 %v532_v3  ;;  %v560_v14 = vld [vmem:[%s1254_s1 + $0x20] sm:$0xf0]  ;;  %v637_v15 = vld [vmem:[%s1256_s2 + $0x78] sm:$0xff] }
   0x5   :  { %v544_v12 = vor.u32 %v557_v10, %v541_v11  ;;  %75 = vmatpush.bf16.msra.mxu1 %v536_v7  ;;  %88 = vmatpush.bf16.msra.mxu2 %v540_v8  ;;  %v548_v16 = vor.u32 %v560_v14, %v547_v13  ;;  %v642_v17 = vld [vmem:[%s1256_s2 + $0xf8] sm:$0xff]  ;;  %v651_v18 = vld [vmem:[%s1256_s2 + $0x70] sm:$0xff]  ;;  %v667_v20 = vld [vmem:[%s1256_s2 + $0x68] sm:$0xff] }
   0x6   :  { %v656_v19 = vld [vmem:[%s1256_s2 + $0xf0] sm:$0xff]  ;;  %v672_v21 = vld [vmem:[%s1256_s2 + $0xe8] sm:$0xff]  ;;  %v679_v22 = vld [vmem:[%s1256_s2 + $0x178] sm:$0xff] }
   0x7   :  { %101 = vmatpush.bf16.msra.mxu3 %v544_v12  ;;  %549 = vmatmul.msk.bf16.vlgmr.msra.gmra.mxu0 %vm51_vm0, %v620_v9  ;;  %v684_v23 = vld [vmem:[%s1256_s2 + $0x60] sm:$0xff]  ;;  %v695_v25 = vld [vmem:[%s1256_s2 + $0x170] sm:$0xff]  ;;  %v702_v26 = vld [vmem:[%s1256_s2 + $0x168] sm:$0xff] }
   0x8   :  { %550 = vmatmul.msk.bf16.vlgmr.msra.gmra.mxu1 %vm51_vm0, %v620_v9  ;;  %551 = vmatmul.msk.bf16.vlgmr.msra.gmra.mxu2 %vm51_vm0, %v620_v9  ;;  %v689_v24 = vld [vmem:[%s1256_s2 + $0xe0] sm:$0xff]  ;;  %v707_v27 = vld [vmem:[%s1256_s2 + $0x1f8] sm:$0xff]  ;;  %v724_v30 = vld [vmem:[%s1256_s2 + $0x1f0] sm:$0xff] }
   0x9   :  { %200 = vmatpush.msrb.mxu1 %v637_v15  ;;  %220 = vmatpush.msrb.mxu2 %v642_v17  ;;  %v712_v28 = vld [vmem:[%s1256_s2 + $0x58] sm:$0xff]  ;;  %v731_v31 = vld [vmem:[%s1256_s2 + $0x160] sm:$0xff]  ;;  %v736_v32 = vld [vmem:[%s1256_s2 + $0x50] sm:$0xff] }
   0xa   :  { %552 = vmatmul.msk.bf16.vlgmr.msra.gmra.mxu3 %vm51_vm0, %v620_v9  ;;  %114 = vmatpush.bf16.msrb.mxu0 %v548_v16  ;;  %v717_v29 = vld [vmem:[%s1256_s2 + $0xd8] sm:$0xff]  ;;  %v741_v33 = vld [vmem:[%s1256_s2 + $0xd0] sm:$0xff]  ;;  %v748_v34 = vld [vmem:[%s1256_s2 + $0x1e8] sm:$0xff] }
   0xb   :  { %201 = vmatpush.msrb.mxu1 %v651_v18  ;;  %221 = vmatpush.msrb.mxu2 %v656_v19  ;;  %v755_v35 = vld [vmem:[%s1256_s2 + $0x158] sm:$0xff]  ;;  %v760_v36 = vld [vmem:[%s1256_s2 + $0x1e0] sm:$0xff]  ;;  %v765_v37 = vld [vmem:[%s1256_s2 + $0x48] sm:$0xff] }
   0xc   :  { %240 = vmatpush.msrb.mxu3 %v679_v22  ;;  %v770_v38 = vld [vmem:[%s1256_s2 + $0xc8] sm:$0xff]  ;;  %v779_v39 = vld [vmem:[%s1256_s2 + $0x150] sm:$0xff]  ;;  %v784_v40 = vld [vmem:[%s1256_s2 + $0x1d8] sm:$0xff] }
   0xd   :  { %202 = vmatpush.msrb.mxu1 %v667_v20  ;;  %222 = vmatpush.msrb.mxu2 %v672_v21  ;;  %v789_v41 = vld [vmem:[%s1256_s2 + $0x40] sm:$0xff]  ;;  %v803_v43 = vld [vmem:[%s1256_s2 + $0x148] sm:$0xff]  ;;  %v808_v44 = vld [vmem:[%s1256_s2 + $0x38] sm:$0xff] }
   0xe   :  { %241 = vmatpush.msrb.mxu3 %v695_v25  ;;  %260 = vmatpush.msra.mxu0 %v707_v27  ;;  %v794_v42 = vld [vmem:[%s1256_s2 + $0xc0] sm:$0xff]  ;;  %v813_v45 = vld [vmem:[%s1256_s2 + $0xb8] sm:$0xff]  ;;  %v827_v47 = vld [vmem:[%s1256_s2 + $0x1d0] sm:$0xff] }
   0xf   :  { %203 = vmatpush.msrb.mxu1 %v684_v23  ;;  %223 = vmatpush.msrb.mxu2 %v689_v24  ;;  %v822_v46 = vld [vmem:[%s1256_s2 + $0x140] sm:$0xff]  ;;  %v834_v48 = vld [vmem:[%s1256_s2 + $0x30] sm:$0xff]  ;;  %v847_v50 = vld [vmem:[%s1256_s2 + $0x138] sm:$0xff] }
  0x10   :  { %242 = vmatpush.msrb.mxu3 %v702_v26  ;;  %261 = vmatpush.msra.mxu0 %v724_v30  ;;  %v839_v49 = vld [vmem:[%s1256_s2 + $0xb0] sm:$0xff]  ;;  %v852_v51 = vld [vmem:[%s1256_s2 + $0x1c8] sm:$0xff]  ;;  %v876_v55 = vld [vmem:[%s1256_s2 + $0x1c0] sm:$0xff] }
  0x11   :  { %204 = vmatpush.msrb.mxu1 %v712_v28  ;;  %224 = vmatpush.msrb.mxu2 %v717_v29  ;;  %v857_v52 = vld [vmem:[%s1256_s2 + $0x28] sm:$0xff]  ;;  %v871_v54 = vld [vmem:[%s1256_s2 + $0x130] sm:$0xff]  ;;  %v881_v56 = vld [vmem:[%s1256_s2 + $0x20] sm:$0xff] }
  0x12   :  { %243 = vmatpush.msrb.mxu3 %v731_v31  ;;  %262 = vmatpush.msra.mxu0 %v748_v34  ;;  %v862_v53 = vld [vmem:[%s1256_s2 + $0xa8] sm:$0xff]  ;;  %v886_v57 = vld [vmem:[%s1256_s2 + $0xa0] sm:$0xff]  ;;  %v900_v59 = vld [vmem:[%s1256_s2 + $0x1b8] sm:$0xff] }
  0x13   :  { %205 = vmatpush.msrb.mxu1 %v736_v32  ;;  %225 = vmatpush.msrb.mxu2 %v741_v33  ;;  %v895_v58 = vld [vmem:[%s1256_s2 + $0x128] sm:$0xff]  ;;  %v905_v60 = vld [vmem:[%s1256_s2 + $0x18] sm:$0xff]  ;;  %v919_v62 = vld [vmem:[%s1256_s2 + $0x120] sm:$0xff] }
  0x14   :  { %244 = vmatpush.msrb.mxu3 %v755_v35  ;;  %263 = vmatpush.msra.mxu0 %v760_v36  ;;  %v910_v61 = vld [vmem:[%s1256_s2 + $0x98] sm:$0xff]  ;;  %v924_v63 = vld [vmem:[%s1256_s2 + $0x1b0] sm:$0xff]  ;;  %v948_v3 = vld [vmem:[%s1256_s2 + $0x1a8] sm:$0xff] }
  0x15   :  { %206 = vmatpush.msrb.mxu1 %v765_v37  ;;  %226 = vmatpush.msrb.mxu2 %v770_v38  ;;  %v929_v0 = vld [vmem:[%s1256_s2 + $0x10] sm:$0xff]  ;;  %v943_v2 = vld [vmem:[%s1256_s2 + $0x118] sm:$0xff]  ;;  %1262 = vst [vmem:[#allocation2_spill] sm:$0xff] %v948_v3  ;;  %v953_v4 = vld [vmem:[%s1256_s2 + $0x8] sm:$0xff] }
  0x16   :  { %245 = vmatpush.msrb.mxu3 %v779_v39  ;;  %264 = vmatpush.msra.mxu0 %v784_v40  ;;  %v934_v1 = vld [vmem:[%s1256_s2 + $0x90] sm:$0xff]  ;;  %v958_v5 = vld [vmem:[%s1256_s2 + $0x88] sm:$0xff]  ;;  %v972_v7 = vld [vmem:[%s1256_s2 + $0x1a0] sm:$0xff] }
  0x17   :  { %207 = vmatpush.msrb.mxu1 %v789_v41  ;;  %227 = vmatpush.msrb.mxu2 %v794_v42  ;;  %v967_v6 = vld [vmem:[%s1256_s2 + $0x110] sm:$0xff]  ;;  %1263 = vst [vmem:[#allocation3_spill] sm:$0xff] %v972_v7  ;;  %v977_v8 = vld [vmem:[%s1256_s2] sm:$0xff]  ;;  %v991_v10 = vld [vmem:[%s1256_s2 + $0x278] sm:$0xff] }
  0x18   :  { %553 = vmatmul.msk.bf16.vlgmr.msrb.gmra.mxu0 %vm51_vm0, %v620_v9  ;;  %246 = vmatpush.msrb.mxu3 %v803_v43  ;;  %v982_v9 = vld [vmem:[%s1256_s2 + $0x80] sm:$0xff]  ;;  %v998_v11 = vld [vmem:[%s1256_s2 + $0x108] sm:$0xff]  ;;  %v1003_v12 = vld [vmem:[%s1256_s2 + $0x198] sm:$0xff] }
  0x19   :  { %208 = vmatpush.msrb.mxu1 %v808_v44  ;;  %228 = vmatpush.msrb.mxu2 %v813_v45  ;;  %1264 = vst [vmem:[#allocation4_spill] sm:$0xff] %v1003_v12  ;;  %v1010_v13 = vld [vmem:[%s1256_s2 + $0x270] sm:$0xff]  ;;  %v1017_v14 = vld [vmem:[%s1256_s2 + $0x100] sm:$0xff] }
  0x1a   :  { %247 = vmatpush.msrb.mxu3 %v822_v46  ;;  %265 = vmatpush.msra.mxu0 %v827_v47  ;;  %v1022_v16 = vld [vmem:[%s1256_s2 + $0x190] sm:$0xff] }
  0x1b   :  { %209 = vmatpush.msrb.mxu1 %v834_v48  ;;  %229 = vmatpush.msrb.mxu2 %v839_v49 }
  0x1c   :  { %248 = vmatpush.msrb.mxu3 %v847_v50  ;;  %266 = vmatpush.msra.mxu0 %v852_v51 }
  0x1d   :  { %210 = vmatpush.msrb.mxu1 %v857_v52  ;;  %230 = vmatpush.msrb.mxu2 %v862_v53 }
  0x1e   :  { %249 = vmatpush.msrb.mxu3 %v871_v54  ;;  %267 = vmatpush.msra.mxu0 %v876_v55 }
  0x1f   :  { %211 = vmatpush.msrb.mxu1 %v881_v56  ;;  %231 = vmatpush.msrb.mxu2 %v886_v57 }
  0x20   :  { %250 = vmatpush.msrb.mxu3 %v895_v58  ;;  %268 = vmatpush.msra.mxu0 %v900_v59 }
  0x21   :  { %212 = vmatpush.msrb.mxu1 %v905_v60  ;;  %232 = vmatpush.msrb.mxu2 %v910_v61 }
  0x22   :  { %251 = vmatpush.msrb.mxu3 %v919_v62  ;;  %269 = vmatpush.msra.mxu0 %v924_v63 }
  0x23   :  { %213 = vmatpush.msrb.mxu1 %v929_v0  ;;  %233 = vmatpush.msrb.mxu2 %v934_v1 }
  0x24   :  { %252 = vmatpush.msrb.mxu3 %v943_v2  ;;  %270 = vmatpush.msra.mxu0 %v948_v3  ;;  %v1041_v3 = vld [vmem:[%s1256_s2 + $0x260] sm:$0xff] }
  0x25   :  { %214 = vmatpush.msrb.mxu1 %v953_v4  ;;  %234 = vmatpush.msrb.mxu2 %v958_v5 }
  0x26   :  { %253 = vmatpush.msrb.mxu3 %v967_v6  ;;  %271 = vmatpush.msra.mxu0 %v972_v7  ;;  %v1027_v7 = vld [vmem:[%s1256_s2 + $0x268] sm:$0xff] }
  0x27   :  { %215 = vmatpush.msrb.mxu1 %v977_v8  ;;  %235 = vmatpush.msrb.mxu2 %v982_v9 }
  0x28   :  { %254 = vmatpush.msrb.mxu3 %v998_v11  ;;  %272 = vmatpush.msra.mxu0 %v1003_v12  ;;  %v1055_v12 = vld [vmem:[%s1256_s2 + $0x258] sm:$0xff] }
  0x29   :  { %280 = vmatpush.msra.mxu1 %v991_v10  ;;  %305 = vmatpush.msra.mxu2 %v637_v15  ;;  %v1036_v15 = vld [vmem:[%s1256_s2 + $0x188] sm:$0xff] }
  0x2a   :  { %255 = vmatpush.msrb.mxu3 %v1017_v14  ;;  %273 = vmatpush.msra.mxu0 %v1022_v16 }
  0x2b   :  { %281 = vmatpush.msra.mxu1 %v1010_v13  ;;  %306 = vmatpush.msra.mxu2 %v651_v18  ;;  %v1050_v18 = vld [vmem:[%s1256_s2 + $0x180] sm:$0xff] }
  0x2c   :  { %325 = vmatpush.msra.mxu3 %v642_v17  ;;  %274 = vmatpush.msra.mxu0 %v1036_v15  ;;  %v1073_v17 = vld [vmem:[%s1256_s2 + $0x248] sm:$0xff] }
  0x2d   :  { %282 = vmatpush.msra.mxu1 %v1027_v7  ;;  %307 = vmatpush.msra.mxu2 %v667_v20  ;;  %v1064_v20 = vld [vmem:[%s1256_s2 + $0x250] sm:$0xff] }
  0x2e   :  { %326 = vmatpush.msra.mxu3 %v656_v19  ;;  %275 = vmatpush.msra.mxu0 %v1050_v18  ;;  %v1082_v19 = vld [vmem:[%s1256_s2 + $0x240] sm:$0xff] }
  0x2f   :  { %283 = vmatpush.msra.mxu1 %v1041_v3  ;;  %308 = vmatpush.msra.mxu2 %v684_v23  ;;  %v1109_v23 = vld [vmem:[%s1256_s2 + $0x228] sm:$0xff] }
  0x30   :  { %327 = vmatpush.msra.mxu3 %v672_v21  ;;  %345 = vmatpush.msrb.mxu0 %v679_v22  ;;  %v1091_v21 = vld [vmem:[%s1256_s2 + $0x238] sm:$0xff]  ;;  %v1100_v22 = vld [vmem:[%s1256_s2 + $0x230] sm:$0xff] }
  0x31   :  { %284 = vmatpush.msra.mxu1 %v1055_v12  ;;  %309 = vmatpush.msra.mxu2 %v712_v28  ;;  %v1145_v28 = vld [vmem:[%s1256_s2 + $0x208] sm:$0xff] }
  0x32   :  { %328 = vmatpush.msra.mxu3 %v689_v24  ;;  %346 = vmatpush.msrb.mxu0 %v695_v25  ;;  %v1118_v24 = vld [vmem:[%s1256_s2 + $0x220] sm:$0xff]  ;;  %v1127_v25 = vld [vmem:[%s1256_s2 + $0x218] sm:$0xff] }
  0x33   :  { %285 = vmatpush.msra.mxu1 %v1064_v20  ;;  %310 = vmatpush.msra.mxu2 %v736_v32 }
  0x34   :  { %329 = vmatpush.msra.mxu3 %v717_v29  ;;  %347 = vmatpush.msrb.mxu0 %v702_v26  ;;  %v1136_v26 = vld [vmem:[%s1256_s2 + $0x210] sm:$0xff]  ;;  %v184_v29 = vld [vmem:[%s1256_s2 + $0x200] sm:$0xff] }
  0x35   :  { %286 = vmatpush.msra.mxu1 %v1073_v17  ;;  %311 = vmatpush.msra.mxu2 %v765_v37 }
  0x36   :  { %330 = vmatpush.msra.mxu3 %v741_v33  ;;  %348 = vmatpush.msrb.mxu0 %v731_v31 }
  0x37   :  { %287 = vmatpush.msra.mxu1 %v1082_v19  ;;  %312 = vmatpush.msra.mxu2 %v789_v41  ;;  %v1265_v41 = vld [vmem:[#allocation2_spill] sm:$0xff] }
  0x38   :  { %331 = vmatpush.msra.mxu3 %v770_v38  ;;  %349 = vmatpush.msrb.mxu0 %v755_v35 }
  0x39   :  { %288 = vmatpush.msra.mxu1 %v1091_v21  ;;  %313 = vmatpush.msra.mxu2 %v808_v44  ;;  %v1267_v44 = vld [vmem:[#allocation4_spill] sm:$0xff] }
  0x3a   :  { %332 = vmatpush.msra.mxu3 %v794_v42  ;;  %350 = vmatpush.msrb.mxu0 %v779_v39  ;;  %v1266_v42 = vld [vmem:[#allocation3_spill] sm:$0xff] }
  0x3b   :  { %289 = vmatpush.msra.mxu1 %v1100_v22  ;;  %314 = vmatpush.msra.mxu2 %v834_v48 }
  0x3c   :  { %333 = vmatpush.msra.mxu3 %v813_v45  ;;  %351 = vmatpush.msrb.mxu0 %v803_v43 }
  0x3d   :  { %290 = vmatpush.msra.mxu1 %v1109_v23  ;;  %315 = vmatpush.msra.mxu2 %v857_v52 }
  0x3e   :  { %334 = vmatpush.msra.mxu3 %v839_v49  ;;  %352 = vmatpush.msrb.mxu0 %v822_v46 }
  0x3f   :  { %291 = vmatpush.msra.mxu1 %v1118_v24  ;;  %316 = vmatpush.msra.mxu2 %v881_v56 }
  0x40   :  { %335 = vmatpush.msra.mxu3 %v862_v53  ;;  %353 = vmatpush.msrb.mxu0 %v847_v50 }
  0x41   :  { %292 = vmatpush.msra.mxu1 %v1127_v25  ;;  %317 = vmatpush.msra.mxu2 %v905_v60 }
  0x42   :  { %336 = vmatpush.msra.mxu3 %v886_v57  ;;  %354 = vmatpush.msrb.mxu0 %v871_v54 }
  0x43   :  { %293 = vmatpush.msra.mxu1 %v1136_v26  ;;  %318 = vmatpush.msra.mxu2 %v929_v0 }
  0x44   :  { %337 = vmatpush.msra.mxu3 %v910_v61  ;;  %355 = vmatpush.msrb.mxu0 %v895_v58 }
  0x45   :  { %294 = vmatpush.msra.mxu1 %v1145_v28  ;;  %319 = vmatpush.msra.mxu2 %v953_v4 }
  0x46   :  { %338 = vmatpush.msra.mxu3 %v934_v1  ;;  %356 = vmatpush.msrb.mxu0 %v919_v62 }
  0x47   :  { %320 = vmatpush.msra.mxu2 %v977_v8  ;;  %295 = vmatpush.msra.mxu1 %v184_v29 }
  0x48   :  { %339 = vmatpush.msra.mxu3 %v958_v5  ;;  %357 = vmatpush.msrb.mxu0 %v943_v2 }
  0x4a   :  { %340 = vmatpush.msra.mxu3 %v982_v9  ;;  %358 = vmatpush.msrb.mxu0 %v967_v6 }
  0x4c   :  { %359 = vmatpush.msrb.mxu0 %v998_v11 }
  0x4e   :  { %360 = vmatpush.msrb.mxu0 %v1017_v14 }
  0x84   :  { %v1169_v31 = vpop.f32.mrf.mxu0 }
  0x85   :  { %v1171_v32 = vpop.f32.mrf.mxu1  ;;  %216 = vmatmul.f32.vlgmr.msrb.gmra.mxu1 %v1169_v31  ;;  %v300_v35 = vmul.f32 %v1169_v31, %v1169_v31 }
  0x86   :  { %236 = vmatmul.f32.vlgmr.msrb.gmra.mxu2 %v1171_v32  ;;  %365 = vmatpush.msrb.mxu1 %v707_v27 }
  0x87   :  { %385 = vmatpush.msrb.mxu2 %v991_v10 }
  0x88   :  { %366 = vmatpush.msrb.mxu1 %v724_v30 }
  0x89   :  { %386 = vmatpush.msrb.mxu2 %v1010_v13 }
  0x8a   :  { %367 = vmatpush.msrb.mxu1 %v748_v34  ;;  %v301_v34 = vmul.f32 %v1171_v32, %v1171_v32 }
  0x8b   :  { %387 = vmatpush.msrb.mxu2 %v1027_v7  ;;  %v1181_v33 = vpop.f32.mrf.mxu2 }
  0x8c   :  { %256 = vmatmul.f32.vlgmr.msrb.gmra.mxu3 %v1181_v33  ;;  %368 = vmatpush.msrb.mxu1 %v760_v36  ;;  %v66_v27 = vpop.f32.mrf.mxu0  ;;  %v302_v36 = vmul.f32 %v1181_v33, %v1181_v33 }
  0x8d   :  { %v1187_v37 = vpop.f32.mrf.mxu3  ;;  %388 = vmatpush.msrb.mxu2 %v1041_v3  ;;  %v79_v30 = vpop.f32.mrf.mxu1 }
  0x8e   :  { %276 = vmatmul.f32.vlgmr.msra.gmra.mxu0 %v1187_v37  ;;  %321 = vmatmul.f32.vlgmr.msra.gmra.mxu2 %v300_v35  ;;  %v303_v45 = vmul.f32 %v1187_v37, %v1187_v37  ;;  %v475_v30 = vld [vmem:[%s1257_s3] sm:$0xff] }
  0x8f   :  { %369 = vmatpush.msrb.mxu1 %v784_v40  ;;  %389 = vmatpush.msrb.mxu2 %v1055_v12 }
  0x91   :  { %370 = vmatpush.msrb.mxu1 %v827_v47  ;;  %390 = vmatpush.msrb.mxu2 %v1064_v20  ;;  %v405_v47 = vlaneseq }
  0x93   :  { %371 = vmatpush.msrb.mxu1 %v852_v51  ;;  %391 = vmatpush.msrb.mxu2 %v1073_v17  ;;  %v92_v38 = vpop.f32.mrf.mxu2  ;;  %v408_v48 = vand.u32 127, %v405_v47  ;;  %v406_v52 = vshrl.u32 %v405_v47, 7 }
  0x94   :  { %341 = vmatmul.f32.vlgmr.msra.gmra.mxu3 %v301_v34 }
  0x95   :  { %372 = vmatpush.msrb.mxu1 %v876_v55  ;;  %v1202_v39 = vpop.f32.mrf.mxu0  ;;  %v105_v40 = vpop.f32.mrf.mxu3  ;;  %392 = vmatpush.msrb.mxu2 %v1082_v19  ;;  %v411_v49 = vadd.s32 1, %v408_v48  ;;  %v409_v53 = vmul.u32 2, %v408_v48  ;;  %v424_v13 = vand.u32 1, %v406_v52  ;;  %v425_v14 = vand.u32 1, %v408_v48 }
  0x96   :  { %296 = vmatmul.f32.vlgmr.msra.gmra.mxu1 %v1202_v39  ;;  %361 = vmatmul.f32.vlgmr.msrb.gmra.mxu0 %v302_v36  ;;  %v304_v46 = vmul.f32 %v1202_v39, %v1202_v39  ;;  %v571_v19 = vmov 0  }
  0x97   :  { %373 = vmatpush.msrb.mxu1 %v900_v59  ;;  %393 = vmatpush.msrb.mxu2 %v1091_v21  ;;  %v412_v54 = vmul.u32 2, %v411_v49  ;;  %vm1225_vm1 = vcmp.ge.s32.totalorder %v406_v52, %v409_v53  ;;  %vm426_vm5 = vcmp.eq.s32.totalorder %v424_v13, %v425_v14 }
  0x98   :  { %565 = vset.pattern.permute.xlu1 %v571_v19 }
  0x99   :  { %374 = vmatpush.msrb.mxu1 %v924_v63  ;;  %394 = vmatpush.msrb.mxu2 %v1100_v22  ;;  %vm1229_vm2 = vcmp.lt.s32.totalorder %v406_v52, %v412_v54 }
  0x9a   :  { %vm414_vm3 = vmand %vm1225_vm1, %vm1229_vm2 }
  0x9b   :  { %375 = vmatpush.msrb.mxu1 %v1265_v41  ;;  %395 = vmatpush.msrb.mxu2 %v1109_v23  ;;  %v573_v41 = vmov 1  }
  0x9c   :  { %566 = vset.pattern.permute.xlu2 %v573_v41  ;;  %567 = vset.pattern.permute.xlu0 %v573_v41 }
  0x9d   :  { %376 = vmatpush.msrb.mxu1 %v1266_v42  ;;  %v118_v43 = vpop.f32.mrf.mxu0  ;;  %396 = vmatpush.msrb.mxu2 %v1118_v24 }
  0x9f   :  { %377 = vmatpush.msrb.mxu1 %v1267_v44  ;;  %397 = vmatpush.msrb.mxu2 %v1127_v25 }
  0xa1   :  { %378 = vmatpush.msrb.mxu1 %v1022_v16  ;;  %398 = vmatpush.msrb.mxu2 %v1136_v26  ;;  %v570_v16 = vmov 0.0  }
  0xa3   :  { %379 = vmatpush.msrb.mxu1 %v1036_v15  ;;  %399 = vmatpush.msrb.mxu2 %v1145_v28  ;;  %v427_v15 = vsel %vm426_vm5, 0.00048828125, %v570_v16 }
  0xa5   :  { %380 = vmatpush.msrb.mxu1 %v1050_v18  ;;  %400 = vmatpush.msrb.mxu2 %v184_v29 }
  0xa6   :  { %381 = vmatmul.f32.vlgmr.msrb.gmra.mxu1 %v303_v45  ;;  %401 = vmatmul.f32.vlgmr.msrb.gmra.mxu2 %v304_v46 }
 0x102   :  { %v217_v50 = vpop.f32.mrf.mxu1 }
 0x109   :  { %v237_v51 = vpop.f32.mrf.mxu2 }
 0x10a   :  { %v238_v55 = vadd.f32 %v237_v51, %v217_v50 }
 0x10b   :  { %v277_v60 = vpop.f32.mrf.mxu0 }
 0x10f   :  { %v257_v56 = vpop.f32.mrf.mxu3 }
 0x110   :  { %v258_v57 = vadd.f32 %v257_v56, %v238_v55 }
 0x111   :  { %v322_v3 = vpop.f32.mrf.mxu2 }
 0x112   :  { %v278_v61 = vadd.f32 %v277_v60, %v258_v57 }
 0x113   :  { %v297_v62 = vpop.f32.mrf.mxu1  ;;  %v362_v5 = vpop.f32.mrf.mxu0 }
 0x114   :  { %v298_v63 = vadd.f32 %v297_v62, %v278_v61 }
 0x116   :  { %v415_v0 = vsel %vm414_vm3, %v298_v63, 0.0 }
 0x117   :  { %v417_v1 = vsel %vm416_vm4, %v415_v0, 0.0  ;;  %v342_v2 = vpop.f32.mrf.mxu3 }
 0x118   :  { %418 = vadd.xlane.f32.xlu0 %v417_v1  ;;  %v343_v4 = vadd.f32 %v342_v2, %v322_v3 }
 0x11a   :  { %v363_v7 = vadd.f32 %v362_v5, %v343_v4 }
 0x123   :  { %v382_v6 = vpop.f32.mrf.mxu1 }
 0x124   :  { %v383_v8 = vadd.f32 %v382_v6, %v363_v7 }
 0x129   :  { %v402_v9 = vpop.f32.mrf.mxu2 }
 0x12a   :  { %v403_v10 = vadd.f32 %v402_v9, %v383_v8 }
 0x12c   :  { %v420_v11 = vsel %vm414_vm3, %v403_v10, 0.0 }
 0x12d   :  { %v421_v12 = vsel %vm416_vm4, %v420_v11, 0.0 }
 0x12e   :  { %422 = vadd.xlane.f32.xlu0 %v421_v12 }
 0x18b   :  { %v419_v18 = vpop.xlane.xlu0 %418 }
 0x18c   :  { %447 = vmatpush.msrb.mxu3 %v419_v18 }
 0x18d   :  { %554 = vmatmul.msk.f32.vlgmr.msrb.gmra.mxu3 %vm428_vm6, %v427_v15 }
 0x1a1   :  { %v423_v20 = vpop.xlane.xlu0 %422 }
 0x1a2   :  { %467 = vmatpush.msra.mxu3 %v423_v20 }
 0x1a3   :  { %555 = vmatmul.msk.f32.vlgmr.msra.gmra.mxu3 %vm428_vm6, %v427_v15 }
 0x210   :  { %v449_v17 = vpop.f32.mrf.mxu3 }
 0x211   :  { %v472_v21 = vmul.f32 %v449_v17, %v449_v17 }
 0x226   :  { %v469_v22 = vpop.f32.mrf.mxu3 }
 0x227   :  { %v473_v23 = vsub.f32 %v469_v22, %v472_v21 }
 0x229   :  { %v474_v24 = vmax.f32 %v473_v23, 0.0 }
 0x22b   :  { %v476_v25 = vadd.f32 1e-05, %v474_v24 }
 0x22d   :  { %568 = vrsqrt.f32 %v476_v25  ;;  %vm483_vm8 = vweird.f32 %v476_v25 }
 0x233   :  { %v569_v26 = vpop.eup %568 }
 0x234   :  { %v478_v28 = vmul.f32 %v569_v26, %v476_v25  ;;  %vm484_vm7 = vweird.f32 %v569_v26 }
 0x235   :  { %vm485_vm9 = vmor %vm483_vm8, %vm484_vm7 }
 0x236   :  { %v479_v29 = vmul.f32 %v569_v26, %v478_v28 }
 0x238   :  { %v480_v35 = vmul.f32 0.5, %v479_v29 }
 0x23a   :  { %v481_v27 = vsub.f32 1.5, %v480_v35 }
 0x23c   :  { %v482_v34 = vmul.f32 %v569_v26, %v481_v27 }
 0x23e   :  { %v486_v36 = vsel %vm485_vm9, %v569_v26, %v482_v34 }
 0x23f   :  { %v487_v38 = vmul.f32 %v486_v36, %v475_v30 }
 0x241   :  { %v488_v40 = vmul.f32 %v487_v38, %v449_v17 }
 0x243   :  { %490 = vrot.lane.b32.xlu1 %v488_v40, %s572_s30 }
 0x24b   :  { %496 = vperm.xlu1 %565, %v487_v38  }
 0x2b5   :  { %v491_v42 = vpop.permute.xlu1 %490 }
 0x2b6   :  { %v493_v43 = vsub.f32 %v475_v30, %v491_v42 }
 0x2b8   :  { %506 = vperm.xlu2 %566, %v493_v43  }
 0x2bd   :  { %v497_v44 = vpop.permute.xlu1 %496 }
 0x2be   :  { %v499_v45 = vmul.f32 %v497_v44, %v1169_v31  ;;  %v500_v46 = vmul.f32 %v497_v44, %v1171_v32  ;;  %v501_v47 = vmul.f32 %v497_v44, %v1181_v33  ;;  %v502_v48 = vmul.f32 %v497_v44, %v1187_v37 }
 0x2bf   :  { %v503_v49 = vmul.f32 %v497_v44, %v1202_v39 }
 0x312   :  { %v507_v50 = vpop.permute.xlu2 %506 }
 0x313   :  { %v509_v51 = vadd.f32 %v507_v50, %v499_v45  ;;  %v510_v52 = vadd.f32 %v507_v50, %v500_v46  ;;  %v511_v53 = vadd.f32 %v507_v50, %v501_v47  ;;  %v512_v54 = vadd.f32 %v507_v50, %v502_v48 }
 0x314   :  { %v513_v55 = vadd.f32 %v507_v50, %v503_v49 }
 0x315   :  { %v514_v56 = vmax.f32 %v509_v51, 0.0  ;;  %v515_v57 = vmax.f32 %v510_v52, 0.0  ;;  %v516_v58 = vmax.f32 %v511_v53, 0.0  ;;  %v517_v59 = vmax.f32 %v512_v54, 0.0 }
 0x316   :  { %v518_v60 = vmax.f32 %v513_v55, 0.0 }
 0x317   :  { %v519_v31 = vpack.c.bf16 %v515_v57, %v514_v56  ;;  %v520_v61 = vpack.c.bf16 %v517_v59, %v516_v58 }
 0x318   :  { %v521_v32 = vpack.c.bf16 %v518_v60, %v518_v60 }
 0x319   :  { %522 = vst [vmem:[%s1258_s4] sm:$0xff] %v519_v31 }
 0x31a   :  { %523 = vst [vmem:[%s1258_s4 + $0x8] sm:$0xff] %v520_v61 }
 0x31b   :  { %524 = vst [vmem:[%s1258_s4 + $0x10] sm:$0xf] %v521_v32 }

// kernel: generator_forward.9
= control target key start
LH: loop header
LB: loop body
LE: loop exit
PB: predicated region body
PF: predicated region fallthrough
CT: control target
= control target key end

     0   :  { %vm92_vm0 = vcmask 1043456   ;;  %v572_v3 = vmov 0   ;;  %vm88_vm1 = vcmask 64512   ;;  %s836_s1 = inlined_call_operand.vmem [shape: bf16[8,2304], index: 1, kind: input, shape index: {}]   ;;  %s837_s0 = inlined_call_operand.vmem [shape: bf16[12,8], index: 0, kind: input, shape index: {}]   ;;  %s838_s2 = inlined_call_operand.vmem [shape: f32[12,1], index: 2, kind: input, shape index: {}]   ;;  %s839_s3 = inlined_call_operand.vmem [shape: f32[12,2304], index: 3, kind: output, shape index: {}]  }
   0x1   :  { %v17_v0 = vld [vmem:[%s836_s1] sm:$0xff]  ;;  %v18_v1 = vld [vmem:[%s836_s1 + $0x8] sm:$0xff]  ;;  %499 = vset.pattern.permute.xlu0 %v572_v3  ;;  %v19_v9 = vld [vmem:[%s836_s1 + $0x10] sm:$0xff] }
   0x2   :  { %v477_v2 = vld [vmem:[%s837_s0] sm:$0xf]  ;;  %v52_v4 = vunpack.c.l.b16 %v17_v0  ;;  %v53_v5 = vunpack.c.h.b16 %v17_v0  ;;  %v54_v6 = vunpack.c.l.b16 %v18_v1  ;;  %v55_v7 = vunpack.c.h.b16 %v18_v1  ;;  %v497_v8 = vld [vmem:[%s837_s0] sm:$0x30]  ;;  %v20_v10 = vld [vmem:[%s836_s1 + $0x18] sm:$0xff] }
   0x3   :  { %v611_v11 = vor.u32 %v497_v8, %v477_v2  ;;  %v56_v12 = vunpack.c.l.b16 %v19_v9  ;;  %v57_v13 = vunpack.c.h.b16 %v19_v9  ;;  %v58_v14 = vunpack.c.l.b16 %v20_v10  ;;  %v26_v15 = vld [vmem:[%s838_s2] sm:$0xff]  ;;  %v22_v25 = vld [vmem:[%s836_s1 + $0x28] sm:$0xff]  ;;  %v23_v48 = vld [vmem:[%s836_s1 + $0x30] sm:$0xff] }
   0x4   :  { %v70_v16 = vpack.c.b16 %v52_v4, %v52_v4  ;;  %v71_v17 = vpack.c.b16 %v53_v5, %v53_v5  ;;  %v72_v18 = vpack.c.b16 %v54_v6, %v54_v6  ;;  %v73_v19 = vpack.c.b16 %v55_v7, %v55_v7  ;;  %30 = vperm.xlu0 %499, %v26_v15   ;;  %v21_v24 = vld [vmem:[%s836_s1 + $0x20] sm:$0xff]  ;;  %v27_v42 = vld [vmem:[%s838_s2 + $0x8] sm:$0xf]  ;;  %v24_v49 = vld [vmem:[%s836_s1 + $0x38] sm:$0xff] }
   0x5   :  { %v74_v20 = vpack.c.b16 %v56_v12, %v56_v12  ;;  %v75_v21 = vpack.c.b16 %v57_v13, %v57_v13  ;;  %v76_v22 = vpack.c.b16 %v58_v14, %v58_v14  ;;  %v59_v23 = vunpack.c.h.b16 %v20_v10  ;;  %v25_v62 = vld [vmem:[%s836_s1 + $0x40] sm:$0xff] }
   0x6   :  { %v94_v26 = vsel %vm92_vm0, %v70_v16, 0  ;;  %v97_v27 = vsel %vm92_vm0, %v71_v17, 0  ;;  %v100_v28 = vsel %vm92_vm0, %v72_v18, 0  ;;  %v103_v29 = vsel %vm92_vm0, %v73_v19, 0 }
   0x7   :  { %154 = vmatpush.bf16.msra.mxu0 %v94_v26  ;;  %168 = vmatpush.bf16.msra.mxu1 %v97_v27  ;;  %v106_v30 = vsel %vm92_vm0, %v74_v20, 0  ;;  %v109_v31 = vsel %vm92_vm0, %v75_v21, 0  ;;  %v77_v32 = vpack.c.b16 %v59_v23, %v59_v23  ;;  %v60_v33 = vunpack.c.l.b16 %v21_v24 }
   0x8   :  { %182 = vmatpush.bf16.msra.mxu2 %v100_v28  ;;  %196 = vmatpush.bf16.msra.mxu3 %v103_v29  ;;  %v61_v34 = vunpack.c.h.b16 %v21_v24  ;;  %v62_v35 = vunpack.c.l.b16 %v22_v25  ;;  %v63_v36 = vunpack.c.h.b16 %v22_v25  ;;  %v112_v37 = vsel %vm92_vm0, %v76_v22, 0 }
   0x9   :  { %v115_v38 = vsel %vm92_vm0, %v77_v32, 0  ;;  %v78_v39 = vpack.c.b16 %v60_v33, %v60_v33  ;;  %v64_v50 = vunpack.c.l.b16 %v23_v48  ;;  %v65_v51 = vunpack.c.h.b16 %v23_v48 }
   0xa   :  { %479 = vmatmul.msk.bf16.vlgmr.msra.gmra.mxu0 %vm88_vm1, %v611_v11  ;;  %480 = vmatmul.msk.bf16.vlgmr.msra.gmra.mxu1 %vm88_vm1, %v611_v11  ;;  %v79_v40 = vpack.c.b16 %v61_v34, %v61_v34  ;;  %v80_v41 = vpack.c.b16 %v62_v35, %v62_v35  ;;  %v81_v43 = vpack.c.b16 %v63_v36, %v63_v36  ;;  %v66_v52 = vunpack.c.l.b16 %v24_v49 }
   0xb   :  { %210 = vmatpush.bf16.msrb.mxu0 %v106_v30  ;;  %224 = vmatpush.bf16.msrb.mxu1 %v109_v31  ;;  %v118_v44 = vsel %vm92_vm0, %v78_v39, 0  ;;  %v67_v53 = vunpack.c.h.b16 %v24_v49  ;;  %v82_v54 = vpack.c.b16 %v64_v50, %v64_v50  ;;  %v83_v55 = vpack.c.b16 %v65_v51, %v65_v51 }
   0xc   :  { %481 = vmatmul.msk.bf16.vlgmr.msra.gmra.mxu2 %vm88_vm1, %v611_v11  ;;  %482 = vmatmul.msk.bf16.vlgmr.msra.gmra.mxu3 %vm88_vm1, %v611_v11  ;;  %v121_v45 = vsel %vm92_vm0, %v79_v40, 0  ;;  %v124_v46 = vsel %vm92_vm0, %v80_v41, 0  ;;  %v127_v47 = vsel %vm92_vm0, %v81_v43, 0  ;;  %v84_v56 = vpack.c.b16 %v66_v52, %v66_v52 }
   0xd   :  { %238 = vmatpush.bf16.msrb.mxu2 %v112_v37  ;;  %252 = vmatpush.bf16.msrb.mxu3 %v115_v38  ;;  %v85_v57 = vpack.c.b16 %v67_v53, %v67_v53  ;;  %v130_v58 = vsel %vm92_vm0, %v82_v54, 0  ;;  %v133_v59 = vsel %vm92_vm0, %v83_v55, 0  ;;  %v68_v63 = vunpack.c.l.b16 %v25_v62 }
   0xe   :  { %35 = vperm.xlu0 %499, %v27_v42   ;;  %v136_v60 = vsel %vm92_vm0, %v84_v56, 0  ;;  %v69_v0 = vunpack.c.h.b16 %v25_v62 }
   0xf   :  { %266 = vmatpush.bf16.msra.mxu0 %v118_v44  ;;  %280 = vmatpush.bf16.msra.mxu1 %v121_v45  ;;  %v139_v61 = vsel %vm92_vm0, %v85_v57, 0  ;;  %v86_v1 = vpack.c.b16 %v68_v63, %v68_v63 }
  0x10   :  { %v87_v2 = vpack.c.b16 %v69_v0, %v69_v0 }
  0x11   :  { %294 = vmatpush.bf16.msra.mxu2 %v124_v46  ;;  %308 = vmatpush.bf16.msra.mxu3 %v127_v47  ;;  %v142_v3 = vsel %vm92_vm0, %v86_v1, 0 }
  0x12   :  { %v145_v4 = vsel %vm92_vm0, %v87_v2, 0 }
  0x1a   :  { %483 = vmatmul.msk.bf16.vlgmr.msrb.gmra.mxu0 %vm88_vm1, %v611_v11  ;;  %484 = vmatmul.msk.bf16.vlgmr.msrb.gmra.mxu1 %vm88_vm1, %v611_v11 }
  0x1b   :  { %322 = vmatpush.bf16.msrb.mxu0 %v130_v58  ;;  %336 = vmatpush.bf16.msrb.mxu1 %v133_v59 }
  0x1c   :  { %485 = vmatmul.msk.bf16.vlgmr.msrb.gmra.mxu2 %vm88_vm1, %v611_v11  ;;  %486 = vmatmul.msk.bf16.vlgmr.msrb.gmra.mxu3 %vm88_vm1, %v611_v11 }
  0x1d   :  { %350 = vmatpush.bf16.msrb.mxu2 %v136_v60  ;;  %364 = vmatpush.bf16.msrb.mxu3 %v139_v61 }
  0x2a   :  { %487 = vmatmul.msk.bf16.vlgmr.msra.gmra.mxu0 %vm88_vm1, %v611_v11  ;;  %488 = vmatmul.msk.bf16.vlgmr.msra.gmra.mxu1 %vm88_vm1, %v611_v11 }
  0x2b   :  { %378 = vmatpush.bf16.msra.mxu0 %v142_v3  ;;  %392 = vmatpush.bf16.msra.mxu1 %v145_v4 }
  0x2c   :  { %489 = vmatmul.msk.bf16.vlgmr.msra.gmra.mxu2 %vm88_vm1, %v611_v11  ;;  %490 = vmatmul.msk.bf16.vlgmr.msra.gmra.mxu3 %vm88_vm1, %v611_v11 }
  0x3a   :  { %491 = vmatmul.msk.bf16.vlgmr.msrb.gmra.mxu0 %vm88_vm1, %v611_v11  ;;  %492 = vmatmul.msk.bf16.vlgmr.msrb.gmra.mxu1 %vm88_vm1, %v611_v11 }
  0x3c   :  { %493 = vmatmul.msk.bf16.vlgmr.msrb.gmra.mxu2 %vm88_vm1, %v611_v11  ;;  %494 = vmatmul.msk.bf16.vlgmr.msrb.gmra.mxu3 %vm88_vm1, %v611_v11 }
  0x4a   :  { %495 = vmatmul.msk.bf16.vlgmr.msra.gmra.mxu0 %vm88_vm1, %v611_v11  ;;  %496 = vmatmul.msk.bf16.vlgmr.msra.gmra.mxu1 %vm88_vm1, %v611_v11 }
  0x76   :  { %v688_v5 = vpop.permute.xlu0 %30 }
  0x80   :  { %v692_v10 = vpop.permute.xlu0 %35 }
  0x87   :  { %v156_v6 = vpop.f32.mrf.mxu0  ;;  %v170_v7 = vpop.f32.mrf.mxu1 }
  0x88   :  { %v157_v8 = vadd.f32 %v156_v6, %v688_v5  ;;  %v171_v9 = vadd.f32 %v170_v7, %v688_v5 }
  0x8a   :  { %500 = vtanh.f32 %v157_v8 }
  0x8b   :  { %502 = vtanh.f32 %v171_v9 }
  0x8f   :  { %v184_v12 = vpop.f32.mrf.mxu2  ;;  %v198_v13 = vpop.f32.mrf.mxu3 }
  0x90   :  { %v158_v14 = vpop.f32.mrf.mxu0  ;;  %v172_v15 = vpop.f32.mrf.mxu1  ;;  %v185_v16 = vadd.f32 %v184_v12, %v688_v5  ;;  %v199_v19 = vadd.f32 %v198_v13, %v688_v5 }
  0x91   :  { %v501_v17 = vpop.eup %500  ;;  %v159_v11 = vadd.f32 %v158_v14, %v692_v10  ;;  %v173_v18 = vadd.f32 %v172_v15, %v692_v10 }
  0x92   :  { %v503_v20 = vpop.eup %502  ;;  %435 = vst [vmem:[%s839_s3] sm:$0xff] %v501_v17  ;;  %504 = vtanh.f32 %v185_v16 }
  0x93   :  { %436 = vst [vmem:[%s839_s3 + $0x8] sm:$0xff] %v503_v20  ;;  %506 = vtanh.f32 %v159_v11 }
  0x94   :  { %508 = vtanh.f32 %v173_v18 }
  0x95   :  { %510 = vtanh.f32 %v199_v19 }
  0x97   :  { %v186_v21 = vpop.f32.mrf.mxu2  ;;  %v200_v22 = vpop.f32.mrf.mxu3 }
  0x98   :  { %v505_v23 = vpop.eup %504  ;;  %v187_v24 = vadd.f32 %v186_v21, %v692_v10  ;;  %v201_v25 = vadd.f32 %v200_v22, %v692_v10  ;;  %v212_v26 = vpop.f32.mrf.mxu0 }
  0x99   :  { %v226_v27 = vpop.f32.mrf.mxu1  ;;  %v507_v28 = vpop.eup %506  ;;  %437 = vst [vmem:[%s839_s3 + $0x10] sm:$0xff] %v505_v23  ;;  %v213_v29 = vadd.f32 %v212_v26, %v688_v5 }
  0x9a   :  { %v227_v30 = vadd.f32 %v226_v27, %v688_v5  ;;  %v509_v31 = vpop.eup %508  ;;  %453 = vst [vmem:[%s839_s3 + $0x90] sm:$0xf] %v507_v28  ;;  %512 = vtanh.f32 %v187_v24 }
  0x9b   :  { %v511_v32 = vpop.eup %510  ;;  %454 = vst [vmem:[%s839_s3 + $0x98] sm:$0xf] %v509_v31  ;;  %514 = vtanh.f32 %v201_v25 }
  0x9c   :  { %438 = vst [vmem:[%s839_s3 + $0x18] sm:$0xff] %v511_v32  ;;  %516 = vtanh.f32 %v213_v29 }
  0x9d   :  { %518 = vtanh.f32 %v227_v30 }
  0x9f   :  { %v240_v33 = vpop.f32.mrf.mxu2  ;;  %v254_v34 = vpop.f32.mrf.mxu3 }
  0xa0   :  { %v513_v35 = vpop.eup %512  ;;  %v214_v36 = vpop.f32.mrf.mxu0  ;;  %v241_v38 = vadd.f32 %v240_v33, %v688_v5  ;;  %v255_v42 = vadd.f32 %v254_v34, %v688_v5 }
  0xa1   :  { %v228_v37 = vpop.f32.mrf.mxu1  ;;  %v515_v39 = vpop.eup %514  ;;  %455 = vst [vmem:[%s839_s3 + $0xa0] sm:$0xf] %v513_v35  ;;  %v215_v40 = vadd.f32 %v214_v36, %v692_v10 }
  0xa2   :  { %v229_v41 = vadd.f32 %v228_v37, %v692_v10  ;;  %v517_v43 = vpop.eup %516  ;;  %456 = vst [vmem:[%s839_s3 + $0xa8] sm:$0xf] %v515_v39  ;;  %520 = vtanh.f32 %v241_v38 }
  0xa3   :  { %v519_v44 = vpop.eup %518  ;;  %439 = vst [vmem:[%s839_s3 + $0x20] sm:$0xff] %v517_v43  ;;  %522 = vtanh.f32 %v215_v40 }
  0xa4   :  { %440 = vst [vmem:[%s839_s3 + $0x28] sm:$0xff] %v519_v44  ;;  %524 = vtanh.f32 %v229_v41 }
  0xa5   :  { %526 = vtanh.f32 %v255_v42 }
  0xa7   :  { %v242_v45 = vpop.f32.mrf.mxu2  ;;  %v256_v46 = vpop.f32.mrf.mxu3 }
  0xa8   :  { %v521_v47 = vpop.eup %520  ;;  %v243_v48 = vadd.f32 %v242_v45, %v692_v10  ;;  %v257_v49 = vadd.f32 %v256_v46, %v692_v10  ;;  %v268_v50 = vpop.f32.mrf.mxu0 }
  0xa9   :  { %v282_v51 = vpop.f32.mrf.mxu1  ;;  %v523_v52 = vpop.eup %522  ;;  %441 = vst [vmem:[%s839_s3 + $0x30] sm:$0xff] %v521_v47  ;;  %v269_v53 = vadd.f32 %v268_v50, %v688_v5 }
  0xaa   :  { %v283_v54 = vadd.f32 %v282_v51, %v688_v5  ;;  %v525_v55 = vpop.eup %524  ;;  %457 = vst [vmem:[%s839_s3 + $0xb0] sm:$0xf] %v523_v52  ;;  %528 = vtanh.f32 %v243_v48 }
  0xab   :  { %v527_v56 = vpop.eup %526  ;;  %458 = vst [vmem:[%s839_s3 + $0xb8] sm:$0xf] %v525_v55  ;;  %530 = vtanh.f32 %v257_v49 }
  0xac   :  { %442 = vst [vmem:[%s839_s3 + $0x38] sm:$0xff] %v527_v56  ;;  %532 = vtanh.f32 %v269_v53 }
  0xad   :  { %534 = vtanh.f32 %v283_v54 }
  0xaf   :  { %v296_v57 = vpop.f32.mrf.mxu2  ;;  %v310_v58 = vpop.f32.mrf.mxu3 }
  0xb0   :  { %v529_v59 = vpop.eup %528  ;;  %v270_v60 = vpop.f32.mrf.mxu0  ;;  %v297_v62 = vadd.f32 %v296_v57, %v688_v5  ;;  %v311_v2 = vadd.f32 %v310_v58, %v688_v5 }
  0xb1   :  { %v284_v61 = vpop.f32.mrf.mxu1  ;;  %v531_v63 = vpop.eup %530  ;;  %459 = vst [vmem:[%s839_s3 + $0xc0] sm:$0xf] %v529_v59  ;;  %v271_v0 = vadd.f32 %v270_v60, %v692_v10 }
  0xb2   :  { %v285_v1 = vadd.f32 %v284_v61, %v692_v10  ;;  %v533_v3 = vpop.eup %532  ;;  %460 = vst [vmem:[%s839_s3 + $0xc8] sm:$0xf] %v531_v63  ;;  %536 = vtanh.f32 %v297_v62 }
  0xb3   :  { %v535_v4 = vpop.eup %534  ;;  %443 = vst [vmem:[%s839_s3 + $0x40] sm:$0xff] %v533_v3  ;;  %538 = vtanh.f32 %v271_v0 }
  0xb4   :  { %444 = vst [vmem:[%s839_s3 + $0x48] sm:$0xff] %v535_v4  ;;  %540 = vtanh.f32 %v285_v1 }
  0xb5   :  { %542 = vtanh.f32 %v311_v2 }
  0xb7   :  { %v298_v6 = vpop.f32.mrf.mxu2  ;;  %v312_v7 = vpop.f32.mrf.mxu3 }
  0xb8   :  { %v537_v8 = vpop.eup %536  ;;  %v299_v9 = vadd.f32 %v298_v6, %v692_v10  ;;  %v313_v12 = vadd.f32 %v312_v7, %v692_v10  ;;  %v324_v13 = vpop.f32.mrf.mxu0 }
  0xb9   :  { %v338_v14 = vpop.f32.mrf.mxu1  ;;  %v539_v15 = vpop.eup %538  ;;  %445 = vst [vmem:[%s839_s3 + $0x50] sm:$0xff] %v537_v8  ;;  %v325_v16 = vadd.f32 %v324_v13, %v688_v5 }
  0xba   :  { %v339_v17 = vadd.f32 %v338_v14, %v688_v5  ;;  %v541_v11 = vpop.eup %540  ;;  %461 = vst [vmem:[%s839_s3 + $0xd0] sm:$0xf] %v539_v15  ;;  %544 = vtanh.f32 %v299_v9 }
  0xbb   :  { %v543_v18 = vpop.eup %542  ;;  %462 = vst [vmem:[%s839_s3 + $0xd8] sm:$0xf] %v541_v11  ;;  %546 = vtanh.f32 %v313_v12 }
  0xbc   :  { %446 = vst [vmem:[%s839_s3 + $0x58] sm:$0xff] %v543_v18  ;;  %548 = vtanh.f32 %v325_v16 }
  0xbd   :  { %550 = vtanh.f32 %v339_v17 }
  0xbf   :  { %v352_v19 = vpop.f32.mrf.mxu2  ;;  %v366_v20 = vpop.f32.mrf.mxu3 }
  0xc0   :  { %v545_v21 = vpop.eup %544  ;;  %v326_v22 = vpop.f32.mrf.mxu0  ;;  %v353_v24 = vadd.f32 %v352_v19, %v688_v5  ;;  %v367_v28 = vadd.f32 %v366_v20, %v688_v5 }
  0xc1   :  { %v340_v23 = vpop.f32.mrf.mxu1  ;;  %v547_v25 = vpop.eup %546  ;;  %463 = vst [vmem:[%s839_s3 + $0xe0] sm:$0xf] %v545_v21  ;;  %v327_v26 = vadd.f32 %v326_v22, %v692_v10 }
  0xc2   :  { %v341_v27 = vadd.f32 %v340_v23, %v692_v10  ;;  %v549_v29 = vpop.eup %548  ;;  %464 = vst [vmem:[%s839_s3 + $0xe8] sm:$0xf] %v547_v25  ;;  %552 = vtanh.f32 %v353_v24 }
  0xc3   :  { %v551_v30 = vpop.eup %550  ;;  %447 = vst [vmem:[%s839_s3 + $0x60] sm:$0xff] %v549_v29  ;;  %554 = vtanh.f32 %v327_v26 }
  0xc4   :  { %448 = vst [vmem:[%s839_s3 + $0x68] sm:$0xff] %v551_v30  ;;  %556 = vtanh.f32 %v341_v27 }
  0xc5   :  { %558 = vtanh.f32 %v367_v28 }
  0xc7   :  { %v354_v31 = vpop.f32.mrf.mxu2  ;;  %v368_v32 = vpop.f32.mrf.mxu3 }
  0xc8   :  { %v553_v33 = vpop.eup %552  ;;  %v355_v34 = vadd.f32 %v354_v31, %v692_v10  ;;  %v369_v35 = vadd.f32 %v368_v32, %v692_v10  ;;  %v380_v36 = vpop.f32.mrf.mxu0 }
  0xc9   :  { %v394_v37 = vpop.f32.mrf.mxu1  ;;  %v555_v38 = vpop.eup %554  ;;  %449 = vst [vmem:[%s839_s3 + $0x70] sm:$0xff] %v553_v33  ;;  %v381_v39 = vadd.f32 %v380_v36, %v688_v5 }
  0xca   :  { %v395_v40 = vadd.f32 %v394_v37, %v688_v5  ;;  %v557_v41 = vpop.eup %556  ;;  %465 = vst [vmem:[%s839_s3 + $0xf0] sm:$0xf] %v555_v38  ;;  %560 = vtanh.f32 %v355_v34 }
  0xcb   :  { %v559_v42 = vpop.eup %558  ;;  %466 = vst [vmem:[%s839_s3 + $0xf8] sm:$0xf] %v557_v41  ;;  %562 = vtanh.f32 %v369_v35 }
  0xcc   :  { %450 = vst [vmem:[%s839_s3 + $0x78] sm:$0xff] %v559_v42  ;;  %564 = vtanh.f32 %v381_v39 }
  0xcd   :  { %566 = vtanh.f32 %v395_v40 }
  0xd0   :  { %v561_v43 = vpop.eup %560  ;;  %v382_v5 = vpop.f32.mrf.mxu0 }
  0xd1   :  { %v396_v44 = vpop.f32.mrf.mxu1  ;;  %v563_v45 = vpop.eup %562  ;;  %467 = vst [vmem:[%s839_s3 + $0x100] sm:$0xf] %v561_v43  ;;  %v383_v46 = vadd.f32 %v382_v5, %v692_v10 }
  0xd2   :  { %v397_v47 = vadd.f32 %v396_v44, %v692_v10  ;;  %v565_v48 = vpop.eup %564  ;;  %468 = vst [vmem:[%s839_s3 + $0x108] sm:$0xf] %v563_v45 }
  0xd3   :  { %v567_v49 = vpop.eup %566  ;;  %451 = vst [vmem:[%s839_s3 + $0x80] sm:$0xff] %v565_v48  ;;  %568 = vtanh.f32 %v383_v46 }
  0xd4   :  { %452 = vst [vmem:[%s839_s3 + $0x88] sm:$0xff] %v567_v49  ;;  %570 = vtanh.f32 %v397_v47 }
  0xd9   :  { %v569_v50 = vpop.eup %568 }
  0xda   :  { %v571_v51 = vpop.eup %570  ;;  %469 = vst [vmem:[%s839_s3 + $0x110] sm:$0xf] %v569_v50 }
  0xdb   :  { %470 = vst [vmem:[%s839_s3 + $0x118] sm:$0xf] %v571_v51 }

</bundles_post_ra>
